<compile_context>
chip_gen: v6e
topology: v6e:2x2x1
jax: 0.10.0
libtpu: 0.0.40
codegen_flags: <defaults>
</compile_context>

<pallas_src>
import jax
import jax.numpy as jnp
from jax.experimental import pallas as pl
from jax.experimental.pallas import tpu as pltpu

IMAGENET_INCEPTION_MEAN = (0.5, 0.5, 0.5)
IMAGENET_INCEPTION_STD = (0.5, 0.5, 0.5)
NUM_TRAIN_TIMESTEPS = 1000
COMMITMENT_WEIGHT = 1.0


# ----------------------------------------------------------------------------
# Resize matrices (separable resize: out = A_h @ img @ A_w.T), built in plain JAX.
# ----------------------------------------------------------------------------
def bilinear_resize_matrix(out_size, in_size):
    """Row-interpolation matrix matching F.interpolate(mode='bilinear', align_corners=False)."""
    scale = in_size / out_size
    i = jnp.arange(out_size, dtype=jnp.float32)
    src = jnp.maximum((i + 0.5) * scale - 0.5, 0.0)
    i0 = jnp.minimum(jnp.floor(src).astype(jnp.int32), in_size - 1)
    i1 = jnp.minimum(i0 + 1, in_size - 1)
    w1 = src - i0.astype(jnp.float32)
    w0 = 1.0 - w1
    rows = jnp.arange(out_size)
    A = jnp.zeros((out_size, in_size), jnp.float32)
    A = A.at[rows, i0].add(w0)
    A = A.at[rows, i1].add(w1)
    return A


def area_resize_matrix(out_size, in_size):
    """Row matrix matching F.interpolate(mode='area') for an integer downscale factor."""
    assert in_size % out_size == 0
    k = in_size // out_size
    rows = jnp.repeat(jnp.arange(out_size), k)
    cols = jnp.arange(in_size)
    return jnp.zeros((out_size, in_size), jnp.float32).at[rows, cols].set(1.0 / k)


# ----------------------------------------------------------------------------
# Fused per-batch kernel.
#
# TODO(synk): the real DiVAE ('EPFL-VILAB/4M_tokenizers_rgb_16k_224-448': ViT
# encoder + VQ quantizer + diffusion UNet decoder) cannot be reproduced in-script;
# a deterministic 1x1-conv mix of (x_normalized, noisy_images) keeps the shapes /
# dataflow of prediction_type='sample' identical. Folding the channel-mean and the
# add_noise scalars into (cx, cn, cb) is exact only because this surrogate is linear.
# ----------------------------------------------------------------------------
def _fused_kernel(coef_ref,                                   # SMEM (B, 5) f32
                  x_ref, noise_ref,                            # VMEM per-batch blocks
                  ah_ref, awt_ref, ph_ref, pwt_ref,            # VMEM resident bf16 matrices
                  out_ref, code_ssq_ref, recon_ssq_ref):       # outputs
    b = pl.program_id(0)

    # ---- bilinear upsample H->2H, W->2W : a_h @ (x @ a_wT), bf16 MXU, f32 acc
    x_bf = x_ref[0, 0].astype(jnp.bfloat16)                                  # (H, W)
    xw = jnp.dot(x_bf, awt_ref[...], preferred_element_type=jnp.float32)     # (H, 2W)
    x_up = jnp.dot(ah_ref[...], xw.astype(jnp.bfloat16),
                   preferred_element_type=jnp.float32)                       # (2H, 2W)

    # ---- inception normalize (mean = std = 0.5  ->  xn = 2*x_up - 1);
    #      the 3 repeated channels are identical, so compute one channel only.
    xn = 2.0 * x_up - 1.0

    # surrogate commitment-loss partial: sum(xn^2) of one channel for this batch
    code_ssq_ref[...] = jnp.sum(xn * xn).reshape(1, 1, 1)

    # ---- DDPM add_noise + 1x1-conv surrogate + channel-mean, factored into
    #      per-batch scalar coefficients (computed outside the kernel):
    #        acc = cx*xn + cn0*n0 + cn1*n1 + cn2*n2 + cb
    # TODO(synk): noise could also be generated in-kernel (pltpu.prng_seed +
    # pltpu.prng_random_bits) to remove this DMA entirely; kept as a bf16 input
    # for deterministic parity with the torch.randn_like reference.
    acc = coef_ref[b, 0] * xn + coef_ref[b, 4]
    acc = acc + coef_ref[b, 1] * noise_ref[0, 0].astype(jnp.float32)
    acc = acc + coef_ref[b, 2] * noise_ref[0, 1].astype(jnp.float32)
    acc = acc + coef_ref[b, 3] * noise_ref[0, 2].astype(jnp.float32)

    # ---- area downsample 2H->H, 2W->W : p_h @ (acc @ p_wT), bf16 MXU, f32 acc
    t = jnp.dot(acc.astype(jnp.bfloat16), pwt_ref[...],
                preferred_element_type=jnp.float32)                           # (2H, W)
    recon = jnp.dot(ph_ref[...], t.astype(jnp.bfloat16),
                    preferred_element_type=jnp.float32)                       # (H, W)
    out_ref[0, 0] = recon

    # recon MSE partial vs. the original x (re-read from VMEM ref: no long live range)
    d = recon - x_ref[0, 0]
    recon_ssq_ref[...] = jnp.sum(d * d).reshape(1, 1, 1)


def fused_forward(x, noise_bf16, coef, a_h, a_wT, p_h, p_wT):
    B, _, H, W = x.shape
    H2, W2 = a_h.shape[0], a_wT.shape[1]
    return pl.pallas_call(
        _fused_kernel,
        grid=(B,),
        in_specs=[
            pl.BlockSpec(memory_space=pltpu.SMEM),                     # coef (B,5) f32
            pl.BlockSpec((1, 1, H, W), lambda b: (b, 0, 0, 0)),        # x (f32)
            pl.BlockSpec((1, 3, H2, W2), lambda b: (b, 0, 0, 0)),      # noise (bf16)
            pl.BlockSpec((H2, H), lambda b: (0, 0)),                   # a_h   (bf16, resident)
            pl.BlockSpec((W, W2), lambda b: (0, 0)),                   # a_w.T (bf16, resident)
            pl.BlockSpec((H, H2), lambda b: (0, 0)),                   # p_h   (bf16, resident)
            pl.BlockSpec((W2, W), lambda b: (0, 0)),                   # p_w.T (bf16, resident)
        ],
        out_specs=[
            pl.BlockSpec((1, 1, H, W), lambda b: (b, 0, 0, 0)),        # model_output
            pl.BlockSpec((1, 1, 1), lambda b: (b, 0, 0)),              # code ssq / batch
            pl.BlockSpec((1, 1, 1), lambda b: (b, 0, 0)),              # recon ssq / batch
        ],
        out_shape=(
            jax.ShapeDtypeStruct((B, 1, H, W), jnp.float32),
            jax.ShapeDtypeStruct((B, 1, 1), jnp.float32),
            jax.ShapeDtypeStruct((B, 1, 1), jnp.float32),
        ),
        compiler_params=pltpu.CompilerParams(dimension_semantics=("parallel",)),
    )(coef, x, noise_bf16, a_h, a_wT, p_h, p_wT)


# ----------------------------------------------------------------------------
# DDPM scheduler tables (diffusers default: linear betas 1e-4 .. 0.02)
# ----------------------------------------------------------------------------
def make_scheduler_tables(num_timesteps=NUM_TRAIN_TIMESTEPS):
    betas = jnp.linspace(1e-4, 0.02, num_timesteps, dtype=jnp.float32)
    acp = jnp.cumprod(1.0 - betas)
    return jnp.sqrt(acp), jnp.sqrt(1.0 - acp)


# ----------------------------------------------------------------------------
# SpatialModel.forward
# ----------------------------------------------------------------------------
def spatial_model_forward(x, params, noise, timesteps):
    B, C_in, H, W = x.shape          # (B, 1, 128, 128), NCHW
    assert C_in == 1
    x = x.astype(jnp.float32)
    H2, W2 = 2 * H, 2 * W

    # Separable resize matrices, cast to bf16 for the MXU (f32 accumulation kept
    # via preferred_element_type; area weights = 0.5 are exact in bf16).
    a_h = bilinear_resize_matrix(H2, H).astype(jnp.bfloat16)            # (2H, H)
    a_wT = bilinear_resize_matrix(W2, W).T.astype(jnp.bfloat16)         # (W, 2W)
    p_h = area_resize_matrix(H, H2).astype(jnp.bfloat16)                # (H, 2H)
    p_wT = area_resize_matrix(W, W2).T.astype(jnp.bfloat16)             # (2W, W)

    # DDPM add_noise scalars
    sqrt_acp_tbl, sqrt_1macp_tbl = make_scheduler_tables()
    sa = sqrt_acp_tbl[timesteps].astype(jnp.float32)                    # (B,)
    sb = sqrt_1macp_tbl[timesteps].astype(jnp.float32)                  # (B,)

    # Surrogate DiVAE weights with channel-mean(dim=1) folded in (exact: linear),
    # then the whole add_noise + 1x1-conv mix factored to per-batch scalars:
    #   out = (s1 + sa*s2)*xn + sb*(w2e . noise) + be
    w1e = jnp.mean(params["w1"], axis=0).astype(jnp.float32)            # (3,)
    w2e = jnp.mean(params["w2"], axis=0).astype(jnp.float32)            # (3,)
    be = jnp.mean(params["bias"]).astype(jnp.float32)                   # ()
    s1 = jnp.sum(w1e)
    s2 = jnp.sum(w2e)
    cx = s1 + sa * s2                                                   # (B,)
    cn = sb[:, None] * w2e[None, :]                                     # (B, 3)
    cb = jnp.broadcast_to(be, (B,))                                     # (B,)
    coef = jnp.concatenate([cx[:, None], cn, cb[:, None]], axis=1)      # (B, 5)
    coef = coef.astype(jnp.float32)

    # Noise stream in bf16 (halves its HBM traffic; upcast in-kernel).
    noise_bf16 = noise.astype(jnp.bfloat16)

    model_output, code_ssq, recon_ssq = fused_forward(
        x, noise_bf16, coef, a_h, a_wT, p_h, p_wT)

    # final_recon_loss = F.mse_loss(target=x, model_output) over (B,1,H,W)
    final_recon_loss = jnp.sum(recon_ssq) / float(B * 1 * H * W)

    # TODO(synk): surrogate commitment loss (real code_loss comes from the VQ codebook).
    # 0.25 * MSE(x_normalized, 0) over (B,3,2H,2W); the 3 channels are identical so the
    # 1-channel per-batch sums computed in-kernel give the exact same value.
    code_loss = 0.25 * jnp.sum(code_ssq) / float(B * H2 * W2)

    percept_loss_value = 0.0                 # config['loss']['use_percept'] = False
    total_loss = final_recon_loss + code_loss * COMMITMENT_WEIGHT
    return (total_loss, final_recon_loss, percept_loss_value, code_loss,
            None, model_output, None)


if __name__ == "__main__":
    key = jax.random.PRNGKey(0)
    k_x, k_t, k_n, k_w1, k_w2, k_b = jax.random.split(key, 6)

    B, H, W = 2, 128, 128
    x = jax.random.normal(k_x, (B, 1, H, W), jnp.float32)
    timesteps = jax.random.randint(k_t, (B,), 0, NUM_TRAIN_TIMESTEPS)
    noise = jax.random.normal(k_n, (B, 3, 2 * H, 2 * W), jnp.float32)

    # Deterministic synthetic parameters for the DiVAE surrogate (1x1 conv mix).
    params = {
        "w1": jnp.eye(3, dtype=jnp.float32)
              + 0.1 * jax.random.normal(k_w1, (3, 3), jnp.float32),
        "w2": 0.05 * jax.random.normal(k_w2, (3, 3), jnp.float32),
        "bias": 0.01 * jax.random.normal(k_b, (3,), jnp.float32),
    }

    fwd = jax.jit(spatial_model_forward)
    outs = fwd(x, params, noise, timesteps)
    jax.block_until_ready([o for o in outs if o is not None])
    print("KERNEL_OK")
</pallas_src>

<mosaic_0001>
module attributes {stable_mosaic.version = 11 : i64} {
  func.func private @main(%arg0: i32) attributes {dimension_semantics = [#tpu.dimension_semantics<core_parallel>], iteration_bounds = array<i64: 2>, tpu.core_type = #tpu.core_type<sc_scalar_subcore>, window_params = []} {
    return
  }
}

module attributes {stable_mosaic.version = 11 : i64} {
  func.func private @main(%arg0: i32) attributes {dimension_semantics = [#tpu.dimension_semantics<core_parallel>], iteration_bounds = array<i64: 2>, tpu.core_type = #tpu.core_type<sc_scalar_subcore>, window_params = []} {
    return
  }
}

module attributes {stable_mosaic.version = 11 : i64} {
  func.func @_fused_kernel(%arg0: i32, %arg1: memref<2x5xf32, #tpu.memory_space<smem>>, %arg2: memref<1x1x128x128xf32, #tpu.memory_space<vmem>>, %arg3: memref<1x3x256x256xbf16, #tpu.memory_space<vmem>>, %arg4: memref<256x128xbf16, #tpu.memory_space<vmem>>, %arg5: memref<128x256xbf16, #tpu.memory_space<vmem>>, %arg6: memref<128x256xbf16, #tpu.memory_space<vmem>>, %arg7: memref<256x128xbf16, #tpu.memory_space<vmem>>, %arg8: memref<1x1x128x128xf32, #tpu.memory_space<vmem>>, %arg9: memref<1x1x1xf32, #tpu.memory_space<vmem>>, %arg10: memref<1x1x1xf32, #tpu.memory_space<vmem>>) attributes {dimension_semantics = [#tpu.dimension_semantics<parallel>], iteration_bounds = array<i64: 2>, scalar_prefetch = 0 : i64, scratch_operands = 0 : i64, tpu.core_type = #tpu.core_type<tc>, window_params = [{transform_indices = @transform_0, window_bounds = array<i64: 2, 5>}, {transform_indices = @transform_1, window_bounds = array<i64: 1, 1, 128, 128>}, {transform_indices = @transform_2, window_bounds = array<i64: 1, 3, 256, 256>}, {pipeline_mode = #tpu.pipeline_mode<synchronous>, transform_indices = @transform_3, window_bounds = array<i64: 256, 128>}, {pipeline_mode = #tpu.pipeline_mode<synchronous>, transform_indices = @transform_4, window_bounds = array<i64: 128, 256>}, {pipeline_mode = #tpu.pipeline_mode<synchronous>, transform_indices = @transform_5, window_bounds = array<i64: 128, 256>}, {pipeline_mode = #tpu.pipeline_mode<synchronous>, transform_indices = @transform_6, window_bounds = array<i64: 256, 128>}, {transform_indices = @transform_7, window_bounds = array<i64: 1, 1, 128, 128>}, {transform_indices = @transform_8, window_bounds = array<i64: 1, 1, 1>}, {transform_indices = @transform_9, window_bounds = array<i64: 1, 1, 1>}]} {
    %c0 = arith.constant 0 : index
    %c0_0 = arith.constant 0 : index
    %c0_1 = arith.constant 0 : index
    %c0_2 = arith.constant 0 : index
    %0 = vector.load %arg2[%c0, %c0_0, %c0_1, %c0_2] : memref<1x1x128x128xf32, #tpu.memory_space<vmem>>, vector<1x1x128x128xf32>
    %1 = vector.shape_cast %0 : vector<1x1x128x128xf32> to vector<128x128xf32>
    %2 = arith.truncf %1 : vector<128x128xf32> to vector<128x128xbf16>
    %c0_3 = arith.constant 0 : index
    %c0_4 = arith.constant 0 : index
    %3 = vector.load %arg5[%c0_3, %c0_4] : memref<128x256xbf16, #tpu.memory_space<vmem>>, vector<128x256xbf16>
    %cst = arith.constant dense<0.000000e+00> : vector<128x256xf32>
    %4 = tpu.matmul %2, %3, %cst {dimension_numbers = #tpu.dot_dimension_numbers<[1], [0], [0], [1], [0, 0, 1, 1], [], []>} : vector<128x128xbf16>, vector<128x256xbf16>, vector<128x256xf32> -> vector<128x256xf32>
    %c0_5 = arith.constant 0 : index
    %c0_6 = arith.constant 0 : index
    %5 = vector.load %arg4[%c0_5, %c0_6] : memref<256x128xbf16, #tpu.memory_space<vmem>>, vector<256x128xbf16>
    %6 = arith.truncf %4 : vector<128x256xf32> to vector<128x256xbf16>
    %cst_7 = arith.constant dense<0.000000e+00> : vector<256x256xf32>
    %7 = tpu.matmul %5, %6, %cst_7 {dimension_numbers = #tpu.dot_dimension_numbers<[1], [0], [0], [1], [0, 0, 1, 1], [], []>} : vector<256x128xbf16>, vector<128x256xbf16>, vector<256x256xf32> -> vector<256x256xf32>
    %cst_8 = arith.constant 2.000000e+00 : f32
    %8 = vector.broadcast %cst_8 : f32 to vector<256x256xf32>
    %9 = arith.mulf %8, %7 : vector<256x256xf32>
    %cst_9 = arith.constant 1.000000e+00 : f32
    %10 = vector.broadcast %cst_9 : f32 to vector<256x256xf32>
    %11 = arith.subf %9, %10 : vector<256x256xf32>
    %12 = arith.mulf %11, %11 : vector<256x256xf32>
    %13 = vector.shape_cast %12 : vector<256x256xf32> to vector<1x256x256xf32>
    %cst_10 = arith.constant dense<0.000000e+00> : vector<1xf32>
    %14 = vector.multi_reduction <add>, %13, %cst_10 [1, 2] : vector<1x256x256xf32> to vector<1xf32>
    %15 = vector.shape_cast %14 : vector<1xf32> to vector<1x1x1xf32>
    %16 = vector.extract %15[0, 0, 0] : f32 from vector<1x1x1xf32>
    %17 = vector.broadcast %16 : f32 to vector<1x1x1xf32>
    %c0_11 = arith.constant 0 : index
    %c0_12 = arith.constant 0 : index
    %c0_13 = arith.constant 0 : index
    %18 = vector.load %arg9[%c0_11, %c0_12, %c0_13] : memref<1x1x1xf32, #tpu.memory_space<vmem>>, vector<1x1x1xf32>
    tpu.vector_store %arg9[%c0_11, %c0_12, %c0_13], %17 {strides = array<i32>} : memref<1x1x1xf32, #tpu.memory_space<vmem>>, vector<1x1x1xf32>,
    %19 = arith.index_cast %arg0 : i32 to index
    %c0_14 = arith.constant 0 : index
    %20 = memref.load %arg1[%19, %c0_14] : memref<2x5xf32, #tpu.memory_space<smem>>
    %21 = vector.broadcast %20 : f32 to vector<256x256xf32>
    %22 = arith.mulf %21, %11 : vector<256x256xf32>
    %23 = arith.index_cast %arg0 : i32 to index
    %c4 = arith.constant 4 : index
    %24 = memref.load %arg1[%23, %c4] : memref<2x5xf32, #tpu.memory_space<smem>>
    %25 = vector.broadcast %24 : f32 to vector<256x256xf32>
    %26 = arith.addf %22, %25 : vector<256x256xf32>
    %27 = arith.index_cast %arg0 : i32 to index
    %c1 = arith.constant 1 : index
    %28 = memref.load %arg1[%27, %c1] : memref<2x5xf32, #tpu.memory_space<smem>>
    %c0_15 = arith.constant 0 : index
    %c0_16 = arith.constant 0 : index
    %c0_17 = arith.constant 0 : index
    %c0_18 = arith.constant 0 : index
    %29 = vector.load %arg3[%c0_15, %c0_16, %c0_17, %c0_18] : memref<1x3x256x256xbf16, #tpu.memory_space<vmem>>, vector<1x1x256x256xbf16>
    %30 = vector.shape_cast %29 : vector<1x1x256x256xbf16> to vector<256x256xbf16>
    %31 = arith.extf %30 : vector<256x256xbf16> to vector<256x256xf32>
    %32 = vector.broadcast %28 : f32 to vector<256x256xf32>
    %33 = arith.mulf %32, %31 : vector<256x256xf32>
    %34 = arith.addf %26, %33 : vector<256x256xf32>
    %35 = arith.index_cast %arg0 : i32 to index
    %c2 = arith.constant 2 : index
    %36 = memref.load %arg1[%35, %c2] : memref<2x5xf32, #tpu.memory_space<smem>>
    %c0_19 = arith.constant 0 : index
    %c1_20 = arith.constant 1 : index
    %c0_21 = arith.constant 0 : index
    %c0_22 = arith.constant 0 : index
    %37 = vector.load %arg3[%c0_19, %c1_20, %c0_21, %c0_22] : memref<1x3x256x256xbf16, #tpu.memory_space<vmem>>, vector<1x1x256x256xbf16>
    %38 = vector.shape_cast %37 : vector<1x1x256x256xbf16> to vector<256x256xbf16>
    %39 = arith.extf %38 : vector<256x256xbf16> to vector<256x256xf32>
    %40 = vector.broadcast %36 : f32 to vector<256x256xf32>
    %41 = arith.mulf %40, %39 : vector<256x256xf32>
    %42 = arith.addf %34, %41 : vector<256x256xf32>
    %43 = arith.index_cast %arg0 : i32 to index
    %c3 = arith.constant 3 : index
    %44 = memref.load %arg1[%43, %c3] : memref<2x5xf32, #tpu.memory_space<smem>>
    %c0_23 = arith.constant 0 : index
    %c2_24 = arith.constant 2 : index
    %c0_25 = arith.constant 0 : index
    %c0_26 = arith.constant 0 : index
    %45 = vector.load %arg3[%c0_23, %c2_24, %c0_25, %c0_26] : memref<1x3x256x256xbf16, #tpu.memory_space<vmem>>, vector<1x1x256x256xbf16>
    %46 = vector.shape_cast %45 : vector<1x1x256x256xbf16> to vector<256x256xbf16>
    %47 = arith.extf %46 : vector<256x256xbf16> to vector<256x256xf32>
    %48 = vector.broadcast %44 : f32 to vector<256x256xf32>
    %49 = arith.mulf %48, %47 : vector<256x256xf32>
    %50 = arith.addf %42, %49 : vector<256x256xf32>
    %51 = arith.truncf %50 : vector<256x256xf32> to vector<256x256xbf16>
    %c0_27 = arith.constant 0 : index
    %c0_28 = arith.constant 0 : index
    %52 = vector.load %arg7[%c0_27, %c0_28] : memref<256x128xbf16, #tpu.memory_space<vmem>>, vector<256x128xbf16>
    %cst_29 = arith.constant dense<0.000000e+00> : vector<256x128xf32>
    %53 = tpu.matmul %51, %52, %cst_29 {dimension_numbers = #tpu.dot_dimension_numbers<[1], [0], [0], [1], [0, 0, 1, 1], [], []>} : vector<256x256xbf16>, vector<256x128xbf16>, vector<256x128xf32> -> vector<256x128xf32>
    %c0_30 = arith.constant 0 : index
    %c0_31 = arith.constant 0 : index
    %54 = vector.load %arg6[%c0_30, %c0_31] : memref<128x256xbf16, #tpu.memory_space<vmem>>, vector<128x256xbf16>
    %55 = arith.truncf %53 : vector<256x128xf32> to vector<256x128xbf16>
    %cst_32 = arith.constant dense<0.000000e+00> : vector<128x128xf32>
    %56 = tpu.matmul %54, %55, %cst_32 {dimension_numbers = #tpu.dot_dimension_numbers<[1], [0], [0], [1], [0, 0, 1, 1], [], []>} : vector<128x256xbf16>, vector<256x128xbf16>, vector<128x128xf32> -> vector<128x128xf32>
    %c0_33 = arith.constant 0 : index
    %c0_34 = arith.constant 0 : index
    %c0_35 = arith.constant 0 : index
    %c0_36 = arith.constant 0 : index
    %57 = vector.load %arg8[%c0_33, %c0_34, %c0_35, %c0_36] : memref<1x1x128x128xf32, #tpu.memory_space<vmem>>, vector<1x1x128x128xf32>
    %58 = vector.shape_cast %57 : vector<1x1x128x128xf32> to vector<128x128xf32>
    %59 = vector.shape_cast %56 : vector<128x128xf32> to vector<1x1x128x128xf32>
    tpu.vector_store %arg8[%c0_33, %c0_34, %c0_35, %c0_36], %59 {strides = array<i32>} : memref<1x1x128x128xf32, #tpu.memory_space<vmem>>, vector<1x1x128x128xf32>,
    %c0_37 = arith.constant 0 : index
    %c0_38 = arith.constant 0 : index
    %c0_39 = arith.constant 0 : index
    %c0_40 = arith.constant 0 : index
    %60 = vector.load %arg2[%c0_37, %c0_38, %c0_39, %c0_40] : memref<1x1x128x128xf32, #tpu.memory_space<vmem>>, vector<1x1x128x128xf32>
    %61 = vector.shape_cast %60 : vector<1x1x128x128xf32> to vector<128x128xf32>
    %62 = arith.subf %56, %61 : vector<128x128xf32>
    %63 = arith.mulf %62, %62 : vector<128x128xf32>
    %64 = vector.shape_cast %63 : vector<128x128xf32> to vector<1x128x128xf32>
    %cst_41 = arith.constant dense<0.000000e+00> : vector<1xf32>
    %65 = vector.multi_reduction <add>, %64, %cst_41 [1, 2] : vector<1x128x128xf32> to vector<1xf32>
    %66 = vector.shape_cast %65 : vector<1xf32> to vector<1x1x1xf32>
    %67 = vector.extract %66[0, 0, 0] : f32 from vector<1x1x1xf32>
    %68 = vector.broadcast %67 : f32 to vector<1x1x1xf32>
    %c0_42 = arith.constant 0 : index
    %c0_43 = arith.constant 0 : index
    %c0_44 = arith.constant 0 : index
    %69 = vector.load %arg10[%c0_42, %c0_43, %c0_44] : memref<1x1x1xf32, #tpu.memory_space<vmem>>, vector<1x1x1xf32>
    tpu.vector_store %arg10[%c0_42, %c0_43, %c0_44], %68 {strides = array<i32>} : memref<1x1x1xf32, #tpu.memory_space<vmem>>, vector<1x1x1xf32>,
    return
  }
  func.func @transform_0(%arg0: i32) -> (i32, i32) {
    %c0_i32 = arith.constant 0 : i32
    %c0_i32_0 = arith.constant 0 : i32
    %c0_i32_1 = arith.constant 0 : i32
    return %c0_i32, %c0_i32_0 : i32, i32
  }
  func.func @transform_1(%arg0: i32) -> (i32, i32, i32, i32) {
    %c0_i32 = arith.constant 0 : i32
    %c0_i32_0 = arith.constant 0 : i32
    %c0_i32_1 = arith.constant 0 : i32
    %c0_i32_2 = arith.constant 0 : i32
    return %arg0, %c0_i32, %c0_i32_0, %c0_i32_1 : i32, i32, i32, i32
  }
  func.func @transform_2(%arg0: i32) -> (i32, i32, i32, i32) {
    %c0_i32 = arith.constant 0 : i32
    %c0_i32_0 = arith.constant 0 : i32
    %c0_i32_1 = arith.constant 0 : i32
    %c0_i32_2 = arith.constant 0 : i32
    return %arg0, %c0_i32, %c0_i32_0, %c0_i32_1 : i32, i32, i32, i32
  }
  func.func @transform_3(%arg0: i32) -> (i32, i32) {
    %c0_i32 = arith.constant 0 : i32
    %c0_i32_0 = arith.constant 0 : i32
    %c0_i32_1 = arith.constant 0 : i32
    return %c0_i32, %c0_i32_0 : i32, i32
  }
  func.func @transform_4(%arg0: i32) -> (i32, i32) {
    %c0_i32 = arith.constant 0 : i32
    %c0_i32_0 = arith.constant 0 : i32
    %c0_i32_1 = arith.constant 0 : i32
    return %c0_i32, %c0_i32_0 : i32, i32
  }
  func.func @transform_5(%arg0: i32) -> (i32, i32) {
    %c0_i32 = arith.constant 0 : i32
    %c0_i32_0 = arith.constant 0 : i32
    %c0_i32_1 = arith.constant 0 : i32
    return %c0_i32, %c0_i32_0 : i32, i32
  }
  func.func @transform_6(%arg0: i32) -> (i32, i32) {
    %c0_i32 = arith.constant 0 : i32
    %c0_i32_0 = arith.constant 0 : i32
    %c0_i32_1 = arith.constant 0 : i32
    return %c0_i32, %c0_i32_0 : i32, i32
  }
  func.func @transform_7(%arg0: i32) -> (i32, i32, i32, i32) {
    %c0_i32 = arith.constant 0 : i32
    %c0_i32_0 = arith.constant 0 : i32
    %c0_i32_1 = arith.constant 0 : i32
    %c0_i32_2 = arith.constant 0 : i32
    return %arg0, %c0_i32, %c0_i32_0, %c0_i32_1 : i32, i32, i32, i32
  }
  func.func @transform_8(%arg0: i32) -> (i32, i32, i32) {
    %c0_i32 = arith.constant 0 : i32
    %c0_i32_0 = arith.constant 0 : i32
    %c0_i32_1 = arith.constant 0 : i32
    return %arg0, %c0_i32, %c0_i32_0 : i32, i32, i32
  }
  func.func @transform_9(%arg0: i32) -> (i32, i32, i32) {
    %c0_i32 = arith.constant 0 : i32
    %c0_i32_0 = arith.constant 0 : i32
    %c0_i32_1 = arith.constant 0 : i32
    return %arg0, %c0_i32, %c0_i32_0 : i32, i32, i32
  }
}

</mosaic_0001>

<bundles_post_ra>
// kernel: spatial_model_forward.1
= control target key start
LH: loop header
LB: loop body
LE: loop exit
PB: predicated region body
PF: predicated region fallthrough
CT: control target
= control target key end

     0   :  { %s5001_s0 = inlined_call_operand.vmem [shape: f32[2,5], index: 0, kind: input, shape index: {}]   ;;  %s5002_s1 = inlined_call_operand.vmem [shape: f32[2,1,128,128], index: 1, kind: input, shape index: {}]   ;;  %s5003_s2 = inlined_call_operand.vmem [shape: bf16[2,3,256,256], index: 2, kind: input, shape index: {}]   ;;  %s5004_s3 = inlined_call_operand.vmem [shape: bf16[256,128], index: 3, kind: input, shape index: {}]   ;;  %s5005_s4 = inlined_call_operand.vmem [shape: bf16[128,256], index: 4, kind: input, shape index: {}]   ;;  %s5006_s5 = inlined_call_operand.vmem [shape: bf16[128,256], index: 5, kind: input, shape index: {}]   ;;  %s5007_s6 = inlined_call_operand.vmem [shape: bf16[256,128], index: 6, kind: input, shape index: {}]   ;;  %s5008_s7 = inlined_call_operand.hbm [shape: f32[2,1,128,128], index: 7, kind: output, shape index: {0}]   ;;  %s5009_s8 = inlined_call_operand.vmem [shape: f32[2,1,1], index: 8, kind: output, shape index: {1}]   ;;  %s5010_s9 = inlined_call_operand.vmem [shape: f32[2,1,1], index: 9, kind: output, shape index: {2}]  }
   0x1   :  { %5016 = sst [smem:[#allocation121_spill]] %s5001_s0 }
   0x2   :  { %5017 = sst [smem:[#allocation122_spill]] %s5002_s1 }
   0x3   :  { %5018 = sst [smem:[#allocation123_spill]] %s5005_s4 }
   0x4   :  { %5019 = sst [smem:[#allocation124_spill]] %s5007_s6 }
   0x5   :  { %15 = vsyncpa [#allocation4], 0 }
   0x6   :  { %16 = vsyncpa [#allocation3], 0 }
   0x7   :  { %18 = vsyncpa [#allocation3 + $0x1], 0  ;;  %s3468_s30 = smov 0   ;;  %s3470_s10 = smov 0  }
   0x8   :  { %s3472_s11 = smov 0   ;;  %s3474_s12 = smov 0  }
   0x9 LB: > { %s3489_s13 = sadd.s32 4294967295, %s3411_s12   ;;  %s2807_s14 = sadd.s32 4294967294, %s3411_s12   ;;  %s3411_s12 = sphi %s3474_s12, %s5257_s12   ;;  %s3407_s11 = sphi %s3472_s11, %s5256_s11   ;;  %s3403_s10 = sphi %s3470_s10, %s5255_s10   ;;  %s3399_s30 = sphi %s3468_s30, %s5254_s30  }
   0xa   : > { %s3493_s15 = sadd.s32 1, %s3411_s12   ;;  %s188_s16 = sadd.s32 1, %s3407_s11 }
   0xb   : > { %s185_s17 = ssub.s32 %s3411_s12, %s3493_s15  ;;  %p198_p0 = scmp.ne.s32.totalorder %s3407_s11, %s3403_s10 }
   0xc   : > { %p186_p1 = scmp.eq.s32.totalorder %s185_s17, 0  ;;  %p199_p2 = scmp.eq.s32.totalorder %s3489_s13, 1 }
   0xd   : > { %p204_p3 = scmp.ne.s32.totalorder %s3403_s10, %s3399_s30  ;;  %p205_p4 = scmp.eq.s32.totalorder %s2807_s14, 1 }
   0xe   : > { %s3504_s18 = scalar_select %p186_p1, %s3407_s11, %s188_s16  }
   0xf   : > { %p3506_p5 = por %p199_p2, %p198_p0  ;;  %p3510_p6 = por %p205_p4, %p204_p3 }
  0x10   : > { %5020 = sst [smem:[#allocation8_spill]] %s3504_s18  ;;  %p2808_p7 = scmp.ge.s32.totalorder %s3411_s12, 1 }
  0x11   : > { %p264_p8 = scmp.lt.s32.totalorder %s3411_s12, 3  ;;  %p3212_p9 = scmp.eq.s32.totalorder %s3489_s13, 0 }
  0x12   : > { %s5024_s0 = sld [smem:[#allocation121_spill]] }
  0x13   : > { %p3517_p10 = pnand %p2808_p7, %p264_p8 }
  0x15   : > { %p3204_p11 = pneg %p3517_p10 }
  0x17   : > { %p3205_p12 = pnand %p3212_p9, %p3204_p11 }
  0x18   : > { %s277_s24 = sshll.u32 %s5024_s0, 4  ;;  %s278_s24 = int_to_ptr.vmem [resolvable:$true] %s277_s24 }
  0x19   : > { %s3332_s25 = scalar_lea.vmem %s278_s24, 32  ;;  %p3334_p0 = pneg %p3205_p12 }
  0x1a   : > { %p3333_p13 = scmp.ne.s32.totalorder %s278_s24, %s3332_s25  ;;  %p3340_p3 = scmp.lt.s32.totalorder %s278_s24, %s278_s24 }
  0x1b   : > { %p3341_p4 = scmp.lt.s32.totalorder %s3332_s25, %s3332_s25 }
  0x1c   : > { %p3335_p1 = pnand %p3334_p0, %p3333_p13 }
  0x1d   : > { %p3342_p7 = por %p3341_p4, %p3340_p3 }
  0x1e   : > { %p3336_p2 = pneg %p3335_p1 }
  0x20   : > { %p3343_p8 = pnand %p3342_p7, %p3336_p2 }
  0x22   : > { %3346 = shalt.err (!%p3343_p8)
}
  0x23   : > { %s3413_s26 = smov [#allocation2]   ;;  %318 = sbr.rel (%p3517_p10) target bundleno = 1449 (0x5a9), region = 48 }
  0x24   : > { %3207 = dma.vmem_to_smem (!%p3205_p12), %s278_s24, 32, %s3413_s26, [#allocation4]  }
  0x28   : > { %3390 = dma.done.wait (%p3212_p9), [#allocation4], 32  }
  0x29   : > { %3392 = vsyncadd (%p3212_p9), [#allocation4], 4294967264 }
  0x2a   : > { %324 = sfence }
  0x2b   : > { %s5025_s4 = sld [smem:[#allocation123_spill]]  ;;  %v3414_v2 = vmov 0   ;;  %p366_p9 = scmp.lt.s32.totalorder %s3489_s13, 1  ;;  %vm1218_vm0 = vcmask 0  }
  0x2c   : > { %535 = vmatprep.mubr.bf16.mxu0 %v3414_v2  ;;  %792 = vmatprep.mubr.bf16.mxu1 %v3414_v2  ;;  %s5026_s1 = sld [smem:[#allocation122_spill]]  ;;  %s2913_s22 = sshll.u32 %s3489_s13, 7 }
  0x2d   : > { %s3562_s16 = scalar_select %p366_p9, %s3489_s13, 1 }
  0x2e   : > { %s5027_s6 = sld [smem:[#allocation124_spill]]  ;;  %s1354_s25 = sadd.s32 1, %s2913_s22 }
  0x2f   : > { %s3015_s26 = sshll.u32 %s3562_s16, 7  ;;  %s3193_s27 = smul.u32 768, %s3562_s16 }
  0x30   : > { %s1581_s28 = sadd.s32 2, %s2913_s22  ;;  %s1809_s29 = sadd.s32 3, %s2913_s22 }
  0x31   : > { %v3251_v0 = vld [vmem:[%s5025_s4 + $0x74] ss:$8 sps:$4 sm:$0xff]   ;;  %v3253_v1 = vld [vmem:[%s5025_s4 + $0x70] ss:$8 sps:$4 sm:$0xff]   ;;  %v3254_v3 = vld [vmem:[%s5025_s4 + $0x64] ss:$8 sps:$4 sm:$0xff]  }
  0x32   : > { %503 = vmatprep.subr.bf16.mxu0 %v3251_v0  ;;  %v3256_v4 = vld [vmem:[%s5025_s4 + $0x60] ss:$8 sps:$4 sm:$0xff]   ;;  %v3257_v5 = vld [vmem:[%s5025_s4 + $0x54] ss:$8 sps:$4 sm:$0xff]   ;;  %v3259_v6 = vld [vmem:[%s5025_s4 + $0x50] ss:$8 sps:$4 sm:$0xff]   ;;  %s3589_s0 = scalar_lea.vmem %s5026_s1, %s3015_s26 }
  0x33   : > { %504 = vmatpush1.bf16.msra.mxu0 %v3253_v1  ;;  %v3260_v7 = vld [vmem:[%s5025_s4 + $0x44] ss:$8 sps:$4 sm:$0xff]   ;;  %v3262_v8 = vld [vmem:[%s5025_s4 + $0x40] ss:$8 sps:$4 sm:$0xff]   ;;  %v3263_v9 = vld [vmem:[%s5025_s4 + $0x34] ss:$8 sps:$4 sm:$0xff]  }
  0x34   : > { %505 = vmatprep.subr.bf16.mxu0 %v3254_v3  ;;  %v3265_v10 = vld [vmem:[%s5025_s4 + $0x30] ss:$8 sps:$4 sm:$0xff]   ;;  %v3266_v11 = vld [vmem:[%s5025_s4 + $0x24] ss:$8 sps:$4 sm:$0xff]   ;;  %v3268_v12 = vld [vmem:[%s5025_s4 + $0x20] ss:$8 sps:$4 sm:$0xff]  }
  0x35   : > { %v3269_v13 = vld [vmem:[%s5025_s4 + $0x14] ss:$8 sps:$4 sm:$0xff]   ;;  %v3271_v14 = vld [vmem:[%s5025_s4 + $0x10] ss:$8 sps:$4 sm:$0xff]   ;;  %v3272_v15 = vld [vmem:[%s5025_s4 + $0x4] ss:$8 sps:$4 sm:$0xff]  }
  0x36   : > { %v3274_v16 = vld [vmem:[%s5025_s4] ss:$8 sps:$4 sm:$0xff]   ;;  %v385_v20 = vld [vmem:[%s3589_s0 + $0x10] sm:$0xff]  ;;  %v386_v21 = vld [vmem:[%s3589_s0 + $0x18] sm:$0xff]  ;;  %s1355_s26 = sld [smem:[#allocation2 + %s1354_s25]]  ;;  %s1287_s14 = sadd.s32 4, %s2913_s22 }
  0x37   : > { %506 = vmatpush1.bf16.msra.mxu0 %v3256_v4  ;;  %v383_v17 = vld [vmem:[%s3589_s0] sm:$0xff]  ;;  %v384_v18 = vld [vmem:[%s3589_s0 + $0x8] sm:$0xff]  ;;  %v400_v22 = vpack.c.bf16 %v386_v21, %v385_v20  ;;  %v389_v26 = vld [vmem:[%s3589_s0 + $0x30] sm:$0xff]  ;;  %s1582_s1 = sld [smem:[#allocation2 + %s1581_s28]]  ;;  %s3742_s4 = scalar_lea.vmem %s5003_s2, %s3193_s27 }
  0x38   : > { %507 = vmatprep.subr.bf16.mxu0 %v3257_v5  ;;  %v399_v19 = vpack.c.bf16 %v384_v18, %v383_v17  ;;  %v387_v23 = vld [vmem:[%s3589_s0 + $0x20] sm:$0xff]  ;;  %v388_v24 = vld [vmem:[%s3589_s0 + $0x28] sm:$0xff]  ;;  %v390_v27 = vld [vmem:[%s3589_s0 + $0x38] sm:$0xff]  ;;  %s1221_s23 = sld [smem:[#allocation2 + %s2913_s22]]  ;;  %s378_s22 = scalar_lea.vmem %s5009_s8, %s3562_s16 }
  0x39   : > { %v401_v25 = vpack.c.bf16 %v388_v24, %v387_v23  ;;  %v402_v28 = vpack.c.bf16 %v390_v27, %v389_v26  ;;  %v391_v29 = vld [vmem:[%s3589_s0 + $0x40] sm:$0xff]  ;;  %v392_v30 = vld [vmem:[%s3589_s0 + $0x48] sm:$0xff]  ;;  %v393_v32 = vld [vmem:[%s3589_s0 + $0x50] sm:$0xff]  ;;  %s1810_s25 = sld [smem:[#allocation2 + %s1809_s29]]  ;;  %s353_s28 = sand.u32 1, %s3403_s10  }
  0x3a   : > { %v403_v31 = vpack.c.bf16 %v392_v30, %v391_v29  ;;  %v394_v33 = vld [vmem:[%s3589_s0 + $0x58] sm:$0xff]  ;;  %v395_v35 = vld [vmem:[%s3589_s0 + $0x60] sm:$0xff]  ;;  %v396_v36 = vld [vmem:[%s3589_s0 + $0x68] sm:$0xff]  ;;  %s1288_s18 = sld [smem:[#allocation2 + %s1287_s14]]  ;;  %s3016_s14 = sshll.u32 %s3489_s13, 11 }
  0x3b   : > { %508 = vmatpush1.bf16.msra.mxu0 %v3259_v6  ;;  %v404_v34 = vpack.c.bf16 %v394_v33, %v393_v32  ;;  %v405_v37 = vpack.c.bf16 %v396_v36, %v395_v35  ;;  %v397_v38 = vld [vmem:[%s3589_s0 + $0x70] sm:$0xff]  ;;  %v398_v39 = vld [vmem:[%s3589_s0 + $0x78] sm:$0xff]  ;;  %v3275_v30 = vld [vmem:[%s5004_s3] sm:$0xff]   ;;  %s4950_s24 = scalar_lea.hbm %s5008_s7, %s3016_s14  ;;  %s3415_s13 = smov [#allocation5]  }
  0x3c   : > { %509 = vmatprep.subr.bf16.mxu0 %v3260_v7  ;;  %v406_v40 = vpack.c.bf16 %v398_v39, %v397_v38  ;;  %v3291_v26 = vld [vmem:[%s5027_s6 + $0x78] sm:$0xff]   ;;  %v3294_v29 = vld [vmem:[%s5027_s6 + $0x30] sm:$0xff]   ;;  %v3280_v35 = vld [vmem:[%s5004_s3 + $0x28] sm:$0xff]  }
  0x3d   : > { %v3292_v27 = vld [vmem:[%s5027_s6 + $0x38] sm:$0xff]   ;;  %v3277_v32 = vld [vmem:[%s5004_s3 + $0x10] sm:$0xff]   ;;  %v3283_v38 = vld [vmem:[%s5004_s3 + $0x40] sm:$0xff]  }
  0x3e   : > { %v3278_v33 = vld [vmem:[%s5004_s3 + $0x18] sm:$0xff]   ;;  %v3281_v36 = vld [vmem:[%s5004_s3 + $0x30] sm:$0xff]   ;;  %v3295_v39 = vld [vmem:[%s5027_s6 + $0x68] sm:$0xff]  }
  0x3f   : > { %510 = vmatpush1.bf16.msra.mxu0 %v3262_v8 }
  0x40   : > { %511 = vmatprep.subr.bf16.mxu0 %v3263_v9 }
  0x43   : > { %512 = vmatpush1.bf16.msra.mxu0 %v3265_v10 }
  0x44   : > { %513 = vmatprep.subr.bf16.mxu0 %v3266_v11 }
  0x47   : > { %514 = vmatpush1.bf16.msra.mxu0 %v3268_v12 }
  0x48   : > { %515 = vmatprep.subr.bf16.mxu0 %v3269_v13 }
  0x4b   : > { %516 = vmatpush1.bf16.msra.mxu0 %v3271_v14 }
  0x4c   : > { %517 = vmatprep.subr.bf16.mxu0 %v3272_v15 }
  0x4f   : > { %518 = vmatpush1.bf16.msra.mxu0 %v3274_v16 }
  0x50   : > { %3017 = vmatprep.subr.bf16.mxu0 %v3291_v26  ;;  %v1360_v26 = vld [vmem:[%s3742_s4 + $0x20] sm:$0xff] }
  0x52   : > { %536 = vmatmul.mubr.bf16.vlgmr.msra.gmra.mxu0 %v399_v19 }
  0x53   : > { %545 = vmatprep.mubr.bf16.mxu0 %v3414_v2  ;;  %3018 = vmatpush3.bf16.msra.mxu0 %v3292_v27 }
  0x5a   : > { %546 = vmatmul.mubr.bf16.gmra.mxu0 %v400_v22 }
  0x5b   : > { %555 = vmatprep.mubr.bf16.mxu0 %v3414_v2 }
  0x62   : > { %556 = vmatmul.mubr.bf16.gmra.mxu0 %v401_v25 }
  0x63   : > { %565 = vmatprep.mubr.bf16.mxu0 %v3414_v2 }
  0x6a   : > { %566 = vmatmul.mubr.bf16.gmra.mxu0 %v402_v28  ;;  %v3293_v28 = vld [vmem:[%s5027_s6 + $0x70] sm:$0xff]  }
  0x6b   : > { %575 = vmatprep.mubr.bf16.mxu0 %v3414_v2  ;;  %3019 = vmatprep.subr.bf16.mxu0 %v3293_v28  ;;  %v2916_v28 = vld [vmem:[%s3742_s4 + $0x110] sm:$0xff] }
  0x6c   : > { %3020 = vmatpush3.bf16.msra.mxu0 %v3294_v29 }
  0x6d   : > { %3021 = vmatprep.subr.bf16.mxu0 %v3295_v39 }
  0x72   : > { %576 = vmatmul.mubr.bf16.gmra.mxu0 %v403_v31  ;;  %v3276_v31 = vld [vmem:[%s5004_s3 + $0x8] sm:$0xff]  }
  0x73   : > { %585 = vmatprep.mubr.bf16.mxu0 %v3414_v2 }
  0x7a   : > { %586 = vmatmul.mubr.bf16.gmra.mxu0 %v404_v34  ;;  %v3279_v34 = vld [vmem:[%s5004_s3 + $0x20] sm:$0xff]  }
  0x7b   : > { %595 = vmatprep.mubr.bf16.mxu0 %v3414_v2 }
  0x82   : > { %596 = vmatmul.mubr.bf16.gmra.mxu0 %v405_v37  ;;  %v3282_v37 = vld [vmem:[%s5004_s3 + $0x38] sm:$0xff]  }
  0x83   : > { %605 = vmatprep.mubr.bf16.mxu0 %v3414_v2 }
  0x8a   : > { %606 = vmatmul.mubr.bf16.gmra.mxu0 %v406_v40  ;;  %v3296_v40 = vld [vmem:[%s5027_s6 + $0x28] sm:$0xff]  }
  0x8b   : > { %3022 = vmatpush3.bf16.msra.mxu0 %v3296_v40  ;;  %v1396_v40 = vunpack.c.l.bf16 %v1360_v26 }
 0x112   : > { %v3617_v41 = vpop.f32.mrf.mxu0 }
 0x114   : > { %v3619_v42 = vpop.f32.mrf.mxu0 }
 0x116   : > { %v3621_v43 = vpop.f32.mrf.mxu0 }
 0x117   : > { %v648_v44 = vpack.c.bf16 %v3621_v43, %v3617_v41  ;;  %v3297_v41 = vld [vmem:[%s5027_s6 + $0x60] sm:$0xff]  }
 0x118   : > { %v543_v45 = vpop.f32.mrf.mxu0  ;;  %v3298_v43 = vld [vmem:[%s5027_s6 + $0x20] sm:$0xff]   ;;  %3023 = vmatprep.subr.bf16.mxu0 %v3297_v41  ;;  %v1397_v41 = vunpack.c.h.bf16 %v1360_v26  ;;  %v2951_v26 = vld [vmem:[%s3742_s4 + $0x228] sm:$0xff] }
 0x119   : > { %v649_v46 = vpack.c.bf16 %v543_v45, %v3619_v42  ;;  %v3284_v42 = vld [vmem:[%s5004_s3 + $0x48] sm:$0xff]   ;;  %3024 = vmatpush3.bf16.msra.mxu0 %v3298_v43  ;;  %v3300_v45 = vld [vmem:[%s5027_s6 + $0x18] sm:$0xff]   ;;  %v2948_v43 = vld [vmem:[%s3742_s4 + $0x210] sm:$0xff] }
 0x11a   : > { %v547_v47 = vpop.f32.mrf.mxu0 }
 0x11c   : > { %v549_v48 = vpop.f32.mrf.mxu0 }
 0x11e   : > { %v551_v49 = vpop.f32.mrf.mxu0 }
 0x11f   : > { %v650_v50 = vpack.c.bf16 %v551_v49, %v547_v47  ;;  %v3301_v47 = vld [vmem:[%s5027_s6 + $0x50] sm:$0xff]   ;;  %v3303_v49 = vld [vmem:[%s5027_s6 + $0x48] sm:$0xff]  }
 0x120   : > { %v553_v51 = vpop.f32.mrf.mxu0 }
 0x121   : > { %v651_v52 = vpack.c.bf16 %v553_v51, %v549_v48  ;;  %v3302_v48 = vld [vmem:[%s5027_s6 + $0x10] sm:$0xff]   ;;  %v3286_v51 = vld [vmem:[%s5004_s3 + $0x58] sm:$0xff]  }
 0x122   : > { %v557_v53 = vpop.f32.mrf.mxu0 }
 0x124   : > { %v559_v54 = vpop.f32.mrf.mxu0 }
 0x126   : > { %v561_v55 = vpop.f32.mrf.mxu0 }
 0x127   : > { %v652_v25 = vpack.c.bf16 %v561_v55, %v557_v53  ;;  %v3306_v53 = vld [vmem:[%s5027_s6] sm:$0xff]   ;;  %v3288_v55 = vld [vmem:[%s5004_s3 + $0x68] sm:$0xff]  }
 0x128   : > { %v563_v56 = vpop.f32.mrf.mxu0 }
 0x129   : > { %v653_v24 = vpack.c.bf16 %v563_v56, %v559_v54  ;;  %v3287_v54 = vld [vmem:[%s5004_s3 + $0x60] sm:$0xff]   ;;  %v3289_v56 = vld [vmem:[%s5004_s3 + $0x70] sm:$0xff]  }
 0x12a   : > { %v567_v57 = vpop.f32.mrf.mxu0 }
 0x12c   : > { %v569_v58 = vpop.f32.mrf.mxu0 }
 0x12e   : > { %v571_v59 = vpop.f32.mrf.mxu0 }
 0x12f   : > { %v654_v23 = vpack.c.bf16 %v571_v59, %v567_v57  ;;  %v1356_v57 = vld [vmem:[%s3742_s4] sm:$0xff] }
 0x130   : > { %v573_v60 = vpop.f32.mrf.mxu0  ;;  %v2946_v59 = vld [vmem:[%s3742_s4 + $0x200] sm:$0xff] }
 0x131   : > { %v655_v22 = vpack.c.bf16 %v573_v60, %v569_v58  ;;  %v2914_v58 = vld [vmem:[%s3742_s4 + $0x100] sm:$0xff]  ;;  %v1357_v60 = vld [vmem:[%s3742_s4 + $0x8] sm:$0xff] }
 0x132   : > { %v577_v61 = vpop.f32.mrf.mxu0 }
 0x134   : > { %v579_v62 = vpop.f32.mrf.mxu0 }
 0x136   : > { %v581_v63 = vpop.f32.mrf.mxu0 }
 0x137   : > { %v656_v21 = vpack.c.bf16 %v581_v63, %v577_v61  ;;  %v2915_v61 = vld [vmem:[%s3742_s4 + $0x108] sm:$0xff] }
 0x138   : > { %v583_v0 = vpop.f32.mrf.mxu0  ;;  %v2947_v63 = vld [vmem:[%s3742_s4 + $0x208] sm:$0xff] }
 0x139   : > { %v657_v20 = vpack.c.bf16 %v583_v0, %v579_v62  ;;  %v1388_v62 = vunpack.c.l.bf16 %v1356_v57  ;;  %v3753_v0 = vstv %s1355_s26  ;;  %s2813_s26 = sshll.u32 %s353_s28, 7 }
 0x13a   : > { %v587_v1 = vpop.f32.mrf.mxu0  ;;  %s4911_s29 = scalar_lea.vmem [#allocation5], %s2813_s26 }
 0x13b   : > { %s2677_s17 = sshll.u32 %s4911_s29, 4  ;;  %s4952_s17 = int_to_ptr.vmem [resolvable:$true] %s2677_s17 }
 0x13c   : > { %v589_v3 = vpop.f32.mrf.mxu0 }
 0x13e   : > { %v591_v4 = vpop.f32.mrf.mxu0 }
 0x13f   : > { %v658_v19 = vpack.c.bf16 %v591_v4, %v587_v1  ;;  %v1616_v1 = vunpack.c.l.bf16 %v2914_v58  ;;  %v1389_v4 = vunpack.c.h.bf16 %v1356_v57  ;;  %v1848_v57 = vunpack.c.l.bf16 %v2948_v43 }
 0x140   : > { %v593_v5 = vpop.f32.mrf.mxu0 }
 0x141   : > { %v659_v18 = vpack.c.bf16 %v593_v5, %v589_v3  ;;  %v3755_v3 = vstv %s1582_s1  ;;  %v1358_v5 = vld [vmem:[%s3742_s4 + $0x10] sm:$0xff]  ;;  %s3351_s1 = sshll.u32 %s3415_s13, 4  ;;  %s3352_s1 = int_to_ptr.vmem [resolvable:$false] %s3351_s1 }
 0x142   : > { %v597_v6 = vpop.f32.mrf.mxu0  ;;  %5028 = vst [vmem:[#allocation9_spill] sm:$0xff] %v3755_v3  ;;  %p3354_p13 = scmp.lt.s32.totalorder %s4952_s17, %s3352_s1 }
 0x144   : > { %v599_v7 = vpop.f32.mrf.mxu0 }
 0x146   : > { %v601_v8 = vpop.f32.mrf.mxu0 }
 0x147   : > { %v660_v17 = vpack.c.bf16 %v601_v8, %v597_v6  ;;  %v1844_v6 = vunpack.c.l.bf16 %v2946_v59  ;;  %v1618_v8 = vunpack.c.l.bf16 %v2915_v61 }
 0x148   : > { %v603_v9 = vpop.f32.mrf.mxu0 }
 0x149   : > { %v661_v16 = vpack.c.bf16 %v603_v9, %v599_v7  ;;  %v1390_v7 = vunpack.c.l.bf16 %v1357_v60  ;;  %v1617_v9 = vunpack.c.h.bf16 %v2914_v58  ;;  %v3822_v58 = vmul.f32 %v3753_v0, %v1396_v40 }
 0x14a   : > { %v607_v10 = vpop.f32.mrf.mxu0 }
 0x14b   : > { %v3785_v27 = vmul.f32 %v3755_v3, %v1617_v9 }
 0x14c   : > { %v609_v11 = vpop.f32.mrf.mxu0 }
 0x14e   : > { %v611_v12 = vpop.f32.mrf.mxu0 }
 0x14f   : > { %v662_v15 = vpack.c.bf16 %v611_v12, %v607_v10  ;;  %v3758_v10 = vstv %s1221_s23  ;;  %v1846_v12 = vunpack.c.l.bf16 %v2947_v63 }
 0x150   : > { %v613_v13 = vpop.f32.mrf.mxu0 }
 0x151   : > { %v663_v14 = vpack.c.bf16 %v613_v13, %v609_v11  ;;  %v3760_v11 = vstv %s1810_s25  ;;  %v1391_v13 = vunpack.c.h.bf16 %v1357_v60  ;;  %s3347_s25 = scalar_lea.vmem %s4952_s17, 2048 }
 0x152   : > { %5029 = vst [vmem:[#allocation10_spill] sm:$0xff] %v3760_v11  ;;  %v3789_v29 = vmul.f32 %v3760_v11, %v1846_v12  ;;  %p3348_p10 = scmp.ne.s32.totalorder %s4952_s17, %s3347_s25 }
 0x153   : > { %760 = vmatprep.subr.bf16.mxu1 %v663_v14  ;;  %v3762_v14 = vstv %s1288_s18 }
 0x154   : > { %761 = vmatpush1.bf16.msra.mxu1 %v662_v15  ;;  %v1392_v15 = vunpack.c.l.bf16 %v1358_v5  ;;  %p3349_p11 = pnand %p3348_p10, %p3506_p5 }
 0x155   : > { %762 = vmatprep.subr.bf16.mxu1 %v661_v16  ;;  %v1359_v16 = vld [vmem:[%s3742_s4 + $0x18] sm:$0xff] }
 0x156   : > { %p3350_p12 = pneg %p3349_p11 }
 0x158   : > { %763 = vmatpush1.bf16.msra.mxu1 %v660_v17  ;;  %v1619_v17 = vunpack.c.h.bf16 %v2915_v61 }
 0x159   : > { %764 = vmatprep.subr.bf16.mxu1 %v659_v18  ;;  %v1845_v18 = vunpack.c.h.bf16 %v2946_v59  ;;  %v3825_v59 = vmul.f32 %v3753_v0, %v1397_v41 }
 0x15c   : > { %765 = vmatpush1.bf16.msra.mxu1 %v658_v19  ;;  %v3766_v19 = vmul.f32 %v3753_v0, %v1388_v62 }
 0x15d   : > { %766 = vmatprep.subr.bf16.mxu1 %v657_v20  ;;  %v3769_v20 = vmul.f32 %v3755_v3, %v1616_v1 }
 0x160   : > { %767 = vmatpush1.bf16.msra.mxu1 %v656_v21  ;;  %v3772_v21 = vmul.f32 %v3753_v0, %v1389_v4  ;;  %v1364_v4 = vld [vmem:[%s3742_s4 + $0x40] sm:$0xff] }
 0x161   : > { %768 = vmatprep.subr.bf16.mxu1 %v655_v22  ;;  %v1393_v22 = vunpack.c.h.bf16 %v1358_v5 }
 0x163   : > { %v3806_v39 = vmul.f32 %v3753_v0, %v1393_v22  ;;  %v3859_v22 = vmul.f32 %v3760_v11, %v1848_v57 }
 0x164   : > { %769 = vmatpush1.bf16.msra.mxu1 %v654_v23  ;;  %v3775_v23 = vmul.f32 %v3760_v11, %v1844_v6  ;;  %v2918_v6 = vld [vmem:[%s3742_s4 + $0x120] sm:$0xff] }
 0x165   : > { %770 = vmatprep.subr.bf16.mxu1 %v653_v24  ;;  %v3778_v24 = vmul.f32 %v3753_v0, %v1390_v7 }
 0x168   : > { %771 = vmatpush1.bf16.msra.mxu1 %v652_v25  ;;  %v3781_v25 = vmul.f32 %v3755_v3, %v1618_v8 }
 0x169   : > { %772 = vmatprep.subr.bf16.mxu1 %v651_v52  ;;  %v3305_v52 = vld [vmem:[%s5027_s6 + $0x40] sm:$0xff]  }
 0x16c   : > { %773 = vmatpush1.bf16.msra.mxu1 %v650_v50  ;;  %v3304_v50 = vld [vmem:[%s5027_s6 + $0x8] sm:$0xff]  }
 0x16d   : > { %774 = vmatprep.subr.bf16.mxu1 %v649_v46  ;;  %v3285_v46 = vld [vmem:[%s5004_s3 + $0x50] sm:$0xff]  }
 0x170   : > { %775 = vmatpush1.bf16.msra.mxu1 %v648_v44  ;;  %v3299_v44 = vld [vmem:[%s5027_s6 + $0x58] sm:$0xff]  }
 0x171   : > { %3025 = vmatprep.subr.bf16.mxu0 %v3299_v44  ;;  %v1620_v44 = vunpack.c.l.bf16 %v2916_v28 }
 0x172   : > { %3026 = vmatpush3.bf16.msra.mxu0 %v3300_v45 }
 0x173   : > { %793 = vmatmul.mubr.bf16.vlgmr.msra.gmra.mxu1 %v3275_v30  ;;  %3027 = vmatprep.subr.bf16.mxu0 %v3301_v47  ;;  %v3792_v30 = vmul.f32 %v3753_v0, %v1391_v13  ;;  %v1849_v47 = vunpack.c.h.bf16 %v2948_v43  ;;  %v3828_v61 = vmul.f32 %v3755_v3, %v1620_v44  ;;  %v2919_v13 = vld [vmem:[%s3742_s4 + $0x128] sm:$0xff]  ;;  %v2920_v43 = vld [vmem:[%s3742_s4 + $0x130] sm:$0xff] }
 0x174   : > { %802 = vmatprep.mubr.bf16.mxu1 %v3414_v2  ;;  %v1626_v41 = vunpack.c.l.bf16 %v2919_v13 }
 0x175   : > { %v3837_v1 = vmul.f32 %v3760_v11, %v1849_v47  ;;  %v1854_v47 = vunpack.c.l.bf16 %v2951_v26 }
 0x176   : > { %3028 = vmatpush3.bf16.msra.mxu0 %v3302_v48 }
 0x177   : > { %3029 = vmatprep.subr.bf16.mxu0 %v3303_v49 }
 0x17a   : > { %3030 = vmatpush3.bf16.msra.mxu0 %v3304_v50 }
 0x17b   : > { %803 = vmatmul.mubr.bf16.gmra.mxu1 %v3276_v31  ;;  %3031 = vmatprep.subr.bf16.mxu0 %v3305_v52  ;;  %v1394_v31 = vunpack.c.l.bf16 %v1359_v16 }
 0x17c   : > { %812 = vmatprep.mubr.bf16.mxu1 %v3414_v2 }
 0x17d   : > { %v3811_v49 = vmul.f32 %v3753_v0, %v1394_v31  ;;  %v1404_v31 = vunpack.c.l.bf16 %v1364_v4 }
 0x17e   : > { %3032 = vmatpush3.bf16.msra.mxu0 %v3306_v53  ;;  %v2949_v53 = vld [vmem:[%s3742_s4 + $0x218] sm:$0xff] }
 0x17f   : > { %v1850_v12 = vunpack.c.l.bf16 %v2949_v53 }
 0x183   : > { %813 = vmatmul.mubr.bf16.gmra.mxu1 %v3277_v32  ;;  %v1361_v32 = vld [vmem:[%s3742_s4 + $0x28] sm:$0xff] }
 0x184   : > { %822 = vmatprep.mubr.bf16.mxu1 %v3414_v2  ;;  %v1398_v45 = vunpack.c.l.bf16 %v1361_v32  ;;  %v1399_v50 = vunpack.c.h.bf16 %v1361_v32  ;;  %v1365_v32 = vld [vmem:[%s3742_s4 + $0x48] sm:$0xff] }
 0x186   : > { %v3831_v62 = vmul.f32 %v3753_v0, %v1398_v45  ;;  %v3845_v7 = vmul.f32 %v3753_v0, %v1399_v50  ;;  %v3871_v45 = vmul.f32 %v3760_v11, %v1850_v12  ;;  %v1406_v50 = vunpack.c.l.bf16 %v1365_v32 }
 0x18b   : > { %823 = vmatmul.mubr.bf16.gmra.mxu1 %v3278_v33  ;;  %v1847_v33 = vunpack.c.h.bf16 %v2947_v63 }
 0x18c   : > { %832 = vmatprep.mubr.bf16.mxu1 %v3414_v2 }
 0x193   : > { %833 = vmatmul.mubr.bf16.gmra.mxu1 %v3279_v34  ;;  %v2917_v34 = vld [vmem:[%s3742_s4 + $0x118] sm:$0xff] }
 0x194   : > { %842 = vmatprep.mubr.bf16.mxu1 %v3414_v2  ;;  %v1622_v48 = vunpack.c.l.bf16 %v2917_v34  ;;  %v1623_v52 = vunpack.c.h.bf16 %v2917_v34  ;;  %v1624_v34 = vunpack.c.l.bf16 %v2918_v6 }
 0x196   : > { %v3841_v5 = vmul.f32 %v3755_v3, %v1622_v48  ;;  %v3848_v9 = vmul.f32 %v3755_v3, %v1623_v52  ;;  %v1407_v52 = vunpack.c.h.bf16 %v1365_v32  ;;  %v3884_v57 = vmul.f32 %v3755_v3, %v1624_v34  ;;  %v1367_v32 = vld [vmem:[%s3742_s4 + $0x58] sm:$0xff] }
 0x197   : > { %v2953_v34 = vld [vmem:[%s3742_s4 + $0x238] sm:$0xff] }
 0x198   : > { %5030 = vst [vmem:[#allocation11_spill] sm:$0xff] %v3884_v57 }
 0x19b   : > { %843 = vmatmul.mubr.bf16.gmra.mxu1 %v3280_v35  ;;  %v3797_v35 = vmul.f32 %v3753_v0, %v1392_v15  ;;  %v2950_v15 = vld [vmem:[%s3742_s4 + $0x220] sm:$0xff] }
 0x19c   : > { %852 = vmatprep.mubr.bf16.mxu1 %v3414_v2  ;;  %v1853_v40 = vunpack.c.h.bf16 %v2950_v15 }
 0x1a3   : > { %853 = vmatmul.mubr.bf16.gmra.mxu1 %v3281_v36  ;;  %v1395_v36 = vunpack.c.h.bf16 %v1359_v16 }
 0x1a4   : > { %862 = vmatprep.mubr.bf16.mxu1 %v3414_v2 }
 0x1ab   : > { %863 = vmatmul.mubr.bf16.gmra.mxu1 %v3282_v37  ;;  %v3800_v37 = vmul.f32 %v3755_v3, %v1619_v17 }
 0x1ac   : > { %872 = vmatprep.mubr.bf16.mxu1 %v3414_v2 }
 0x1b3   : > { %873 = vmatmul.mubr.bf16.gmra.mxu1 %v3283_v38  ;;  %v3803_v38 = vmul.f32 %v3760_v11, %v1845_v18 }
 0x1b4   : > { %882 = vmatprep.mubr.bf16.mxu1 %v3414_v2 }
 0x1bb   : > { %883 = vmatmul.mubr.bf16.gmra.mxu1 %v3284_v42  ;;  %v1362_v42 = vld [vmem:[%s3742_s4 + $0x30] sm:$0xff] }
 0x1bc   : > { %892 = vmatprep.mubr.bf16.mxu1 %v3414_v2  ;;  %v1401_v60 = vunpack.c.h.bf16 %v1362_v42 }
 0x1c3   : > { %893 = vmatmul.mubr.bf16.gmra.mxu1 %v3285_v46  ;;  %v1621_v46 = vunpack.c.h.bf16 %v2916_v28  ;;  %v3863_v28 = vmul.f32 %v3753_v0, %v1401_v60  ;;  %v1628_v60 = vunpack.c.l.bf16 %v2920_v43 }
 0x1c4   : > { %902 = vmatprep.mubr.bf16.mxu1 %v3414_v2 }
 0x1c5   : > { %v3834_v63 = vmul.f32 %v3755_v3, %v1621_v46  ;;  %v1627_v46 = vunpack.c.h.bf16 %v2919_v13  ;;  %v2921_v13 = vld [vmem:[%s3742_s4 + $0x138] sm:$0xff] }
 0x1c6   : > { %v1631_v57 = vunpack.c.h.bf16 %v2921_v13 }
 0x1cb   : > { %903 = vmatmul.mubr.bf16.gmra.mxu1 %v3286_v51  ;;  %v3814_v51 = vmul.f32 %v3760_v11, %v1847_v33  ;;  %v1625_v33 = vunpack.c.h.bf16 %v2918_v6  ;;  %v3890_v6 = vmul.f32 %v3760_v11, %v1853_v40  ;;  %v3912_v40 = vmul.f32 %v3753_v0, %v1407_v52 }
 0x1cc   : > { %912 = vmatprep.mubr.bf16.mxu1 %v3414_v2 }
 0x1cd   : > { %5032 = vst [vmem:[#allocation13_spill] sm:$0xff] %v3890_v6  ;;  %5037 = vst [vmem:[#allocation18_spill] sm:$0xff] %v3912_v40  ;;  %v2923_v6 = vld [vmem:[%s3742_s4 + $0x148] sm:$0xff] }
 0x1d3   : > { %913 = vmatmul.mubr.bf16.gmra.mxu1 %v3287_v54  ;;  %v3818_v54 = vmul.f32 %v3753_v0, %v1395_v36  ;;  %v1405_v36 = vunpack.c.h.bf16 %v1364_v4 }
 0x1d4   : > { %922 = vmatprep.mubr.bf16.mxu1 %v3414_v2 }
 0x1d5   : > { %v3887_v4 = vmul.f32 %v3753_v0, %v1405_v36  ;;  %v3909_v36 = vmul.f32 %v3753_v0, %v1406_v50  ;;  %v1859_v50 = vunpack.c.h.bf16 %v2953_v34 }
 0x1d7   : > { %5031 = vst [vmem:[#allocation12_spill] sm:$0xff] %v3887_v4  ;;  %5036 = vst [vmem:[#allocation17_spill] sm:$0xff] %v3909_v36  ;;  %v1368_v4 = vld [vmem:[%s3742_s4 + $0x60] sm:$0xff]  ;;  %v1858_v36 = vunpack.c.l.bf16 %v2953_v34 }
 0x1db   : > { %923 = vmatmul.mubr.bf16.gmra.mxu1 %v3288_v55  ;;  %v1400_v55 = vunpack.c.l.bf16 %v1362_v42  ;;  %v1852_v42 = vunpack.c.l.bf16 %v2950_v15  ;;  %v2952_v15 = vld [vmem:[%s3742_s4 + $0x230] sm:$0xff] }
 0x1dc   : > { %932 = vmatprep.mubr.bf16.mxu1 %v3414_v2 }
 0x1dd   : > { %v3853_v16 = vmul.f32 %v3753_v0, %v1400_v55  ;;  %v1366_v55 = vld [vmem:[%s3742_s4 + $0x50] sm:$0xff]  ;;  %v3896_v12 = vmul.f32 %v3760_v11, %v1852_v42  ;;  %v1857_v42 = vunpack.c.h.bf16 %v2952_v15 }
 0x1df   : > { %5034 = vst [vmem:[#allocation15_spill] sm:$0xff] %v3896_v12  ;;  %v1409_v12 = vunpack.c.h.bf16 %v1366_v55 }
 0x1e1   : > { %v3934_v34 = vmul.f32 %v3753_v0, %v1409_v12  ;;  %v3952_v12 = vmul.f32 %v3760_v11, %v1858_v36 }
 0x1e3   : > { %933 = vmatmul.mubr.bf16.gmra.mxu1 %v3289_v56  ;;  %v1363_v56 = vld [vmem:[%s3742_s4 + $0x38] sm:$0xff]  ;;  %5043 = vst [vmem:[#allocation24_spill] sm:$0xff] %v3934_v34  ;;  %5049 = vst [vmem:[#allocation30_spill] sm:$0xff] %v3952_v12  ;;  %v1369_v34 = vld [vmem:[%s3742_s4 + $0x68] sm:$0xff] }
 0x1e4   : > { %942 = vmatprep.mubr.bf16.mxu1 %v3414_v2  ;;  %v3290_v2 = vld [vmem:[%s5004_s3 + $0x78] sm:$0xff]   ;;  %v1402_v8 = vunpack.c.l.bf16 %v1363_v56  ;;  %v1403_v17 = vunpack.c.h.bf16 %v1363_v56  ;;  %v3878_v56 = vmul.f32 %v3753_v0, %v1404_v31  ;;  %v3904_v31 = vmul.f32 %v3760_v11, %v1854_v47 }
 0x1e5   : > { %v1630_v47 = vunpack.c.l.bf16 %v2921_v13 }
 0x1e6   : > { %v3868_v44 = vmul.f32 %v3753_v0, %v1402_v8  ;;  %v3874_v48 = vmul.f32 %v3753_v0, %v1403_v17  ;;  %v3893_v8 = vmul.f32 %v3755_v3, %v1626_v41  ;;  %v3901_v17 = vmul.f32 %v3755_v3, %v1627_v46  ;;  %5035 = vst [vmem:[#allocation16_spill] sm:$0xff] %v3904_v31  ;;  %v2922_v46 = vld [vmem:[%s3742_s4 + $0x140] sm:$0xff] }
 0x1e7   : > { %v3920_v31 = vmul.f32 %v3755_v3, %v1628_v60  ;;  %v3931_v60 = vmul.f32 %v3760_v11, %v1857_v42  ;;  %v1633_v13 = vunpack.c.h.bf16 %v2922_v46  ;;  %v3946_v42 = vmul.f32 %v3755_v3, %v1631_v57 }
 0x1e8   : > { %5033 = vst [vmem:[#allocation14_spill] sm:$0xff] %v3893_v8  ;;  %v1410_v8 = vunpack.c.l.bf16 %v1367_v32 }
 0x1e9   : > { %5039 = vst [vmem:[#allocation20_spill] sm:$0xff] %v3920_v31  ;;  %5042 = vst [vmem:[#allocation23_spill] sm:$0xff] %v3931_v60  ;;  %v3968_v36 = vmul.f32 %v3755_v3, %v1633_v13  ;;  %v1415_v60 = vunpack.c.h.bf16 %v1369_v34 }
 0x1ea   : > { %5047 = vst [vmem:[#allocation28_spill] sm:$0xff] %v3946_v42 }
 0x1eb   : > { %943 = vmatmul.mubr.bf16.gmra.mxu1 %v3290_v2  ;;  %v1851_v2 = vunpack.c.h.bf16 %v2949_v53  ;;  %v1855_v53 = vunpack.c.h.bf16 %v2951_v26  ;;  %v1408_v26 = vunpack.c.l.bf16 %v1366_v55  ;;  %v2954_v55 = vld [vmem:[%s3742_s4 + $0x240] sm:$0xff]  ;;  %5053 = vst [vmem:[#allocation34_spill] sm:$0xff] %v3968_v36 }
 0x1ec   : > { %v1861_v31 = vunpack.c.h.bf16 %v2954_v55  ;;  %v1860_v57 = vunpack.c.l.bf16 %v2954_v55  ;;  %v2925_v55 = vld [vmem:[%s3742_s4 + $0x158] sm:$0xff] }
 0x1ed   : > { %v3856_v18 = vmul.f32 %v3760_v11, %v1851_v2  ;;  %v3881_v2 = vmul.f32 %v3755_v3, %v1625_v33  ;;  %v1629_v33 = vunpack.c.h.bf16 %v2920_v43  ;;  %v3915_v41 = vmul.f32 %v3760_v11, %v1855_v53 }
 0x1ee   : > { %v1856_v43 = vunpack.c.l.bf16 %v2952_v15  ;;  %v3924_v52 = vmul.f32 %v3753_v0, %v1408_v26  ;;  %v1411_v53 = vunpack.c.h.bf16 %v1367_v32  ;;  %v1412_v15 = vunpack.c.l.bf16 %v1368_v4 }
 0x1ef   : > { %5038 = vst [vmem:[#allocation19_spill] sm:$0xff] %v3915_v41  ;;  %v3927_v40 = vmul.f32 %v3755_v3, %v1629_v33  ;;  %v1632_v41 = vunpack.c.l.bf16 %v2922_v46  ;;  %v3937_v26 = vmul.f32 %v3755_v3, %v1630_v47  ;;  %v1634_v33 = vunpack.c.l.bf16 %v2923_v6  ;;  %v2955_v47 = vld [vmem:[%s3742_s4 + $0x248] sm:$0xff] }
 0x1f0   : > { %5040 = vst [vmem:[#allocation21_spill] sm:$0xff] %v3924_v52  ;;  %v3940_v32 = vmul.f32 %v3760_v11, %v1856_v43  ;;  %v3943_v52 = vmul.f32 %v3753_v0, %v1410_v8  ;;  %v3949_v46 = vmul.f32 %v3760_v11, %v1859_v50  ;;  %v3957_v43 = vmul.f32 %v3753_v0, %v1411_v53  ;;  %v2956_v53 = vld [vmem:[%s3742_s4 + $0x250] sm:$0xff] }
 0x1f1   : > { %5041 = vst [vmem:[#allocation22_spill] sm:$0xff] %v3927_v40  ;;  %5044 = vst [vmem:[#allocation25_spill] sm:$0xff] %v3937_v26  ;;  %v1370_v26 = vld [vmem:[%s3742_s4 + $0x70] sm:$0xff]  ;;  %v3961_v8 = vmul.f32 %v3755_v3, %v1632_v41  ;;  %v3965_v50 = vmul.f32 %v3753_v0, %v1412_v15  ;;  %v3971_v12 = vmul.f32 %v3760_v11, %v1861_v31  ;;  %v1864_v36 = vunpack.c.l.bf16 %v2956_v53 }
 0x1f2   : > { %5045 = vst [vmem:[#allocation26_spill] sm:$0xff] %v3940_v32  ;;  %5046 = vst [vmem:[#allocation27_spill] sm:$0xff] %v3943_v52  ;;  %v1413_v32 = vunpack.c.h.bf16 %v1368_v4  ;;  %v2924_v52 = vld [vmem:[%s3742_s4 + $0x150] sm:$0xff]  ;;  %v1863_v4 = vunpack.c.h.bf16 %v2955_v47  ;;  %v3975_v41 = vmul.f32 %v3755_v3, %v1634_v33  ;;  %v1416_v42 = vunpack.c.l.bf16 %v1370_v26 }
 0x1f3   : > { %5048 = vst [vmem:[#allocation29_spill] sm:$0xff] %v3949_v46  ;;  %5050 = vst [vmem:[#allocation31_spill] sm:$0xff] %v3957_v43  ;;  %v1635_v46 = vunpack.c.h.bf16 %v2923_v6  ;;  %v1414_v43 = vunpack.c.l.bf16 %v1369_v34  ;;  %v1637_v15 = vunpack.c.h.bf16 %v2924_v52  ;;  %v1636_v6 = vunpack.c.l.bf16 %v2924_v52 }
 0x1f4   : > { %5051 = vst [vmem:[#allocation32_spill] sm:$0xff] %v3961_v8  ;;  %5052 = vst [vmem:[#allocation33_spill] sm:$0xff] %v3965_v50  ;;  %v1862_v8 = vunpack.c.l.bf16 %v2955_v47  ;;  %v2957_v50 = vld [vmem:[%s3742_s4 + $0x258] sm:$0xff]  ;;  %v3980_v13 = vmul.f32 %v3753_v0, %v1413_v32  ;;  %v3983_v31 = vmul.f32 %v3760_v11, %v1860_v57  ;;  %v1417_v47 = vunpack.c.h.bf16 %v1370_v26 }
 0x1f5   : > { %5054 = vst [vmem:[#allocation35_spill] sm:$0xff] %v3971_v12  ;;  %5055 = vst [vmem:[#allocation36_spill] sm:$0xff] %v3975_v41  ;;  %v1865_v12 = vunpack.c.h.bf16 %v2956_v53  ;;  %v3986_v33 = vmul.f32 %v3755_v3, %v1635_v46  ;;  %v1371_v41 = vld [vmem:[%s3742_s4 + $0x78] sm:$0xff]  ;;  %v1639_v34 = vunpack.c.h.bf16 %v2925_v55  ;;  %v1638_v40 = vunpack.c.l.bf16 %v2925_v55  ;;  %v1372_v55 = vld [vmem:[%s3742_s4 + $0x80] sm:$0xff] }
 0x1f6   : > { %5056 = vst [vmem:[#allocation37_spill] sm:$0xff] %v3980_v13  ;;  %5057 = vst [vmem:[#allocation38_spill] sm:$0xff] %v3983_v31  ;;  %v3990_v52 = vmul.f32 %v3753_v0, %v1414_v43  ;;  %v3993_v32 = vmul.f32 %v3760_v11, %v1863_v4  ;;  %v3996_v57 = vmul.f32 %v3760_v11, %v1862_v8  ;;  %v1866_v31 = vunpack.c.l.bf16 %v2957_v50  ;;  %v2926_v4 = vld [vmem:[%s3742_s4 + $0x160] sm:$0xff] }
 0x1f7   : > { %5058 = vst [vmem:[#allocation39_spill] sm:$0xff] %v3986_v33  ;;  %v3999_v53 = vmul.f32 %v3753_v0, %v1415_v60  ;;  %v4002_v26 = vmul.f32 %v3753_v0, %v1416_v42  ;;  %v4005_v46 = vmul.f32 %v3755_v3, %v1637_v15  ;;  %v4009_v43 = vmul.f32 %v3755_v3, %v1636_v6  ;;  %v2958_v42 = vld [vmem:[%s3742_s4 + $0x260] sm:$0xff] }
 0x1f8   : > { %5059 = vst [vmem:[#allocation40_spill] sm:$0xff] %v3990_v52  ;;  %5060 = vst [vmem:[#allocation41_spill] sm:$0xff] %v3993_v32  ;;  %v1418_v52 = vunpack.c.l.bf16 %v1371_v41  ;;  %v1867_v8 = vunpack.c.h.bf16 %v2957_v50  ;;  %v4016_v60 = vmul.f32 %v3760_v11, %v1864_v36  ;;  %v4021_v15 = vmul.f32 %v3753_v0, %v1417_v47  ;;  %v1373_v50 = vld [vmem:[%s3742_s4 + $0x88] sm:$0xff] }
 0x1f9   : > { %5061 = vst [vmem:[#allocation42_spill] sm:$0xff] %v3996_v57  ;;  %5062 = vst [vmem:[#allocation43_spill] sm:$0xff] %v3999_v53  ;;  %v4013_v57 = vmul.f32 %v3760_v11, %v1865_v12  ;;  %v2927_v53 = vld [vmem:[%s3742_s4 + $0x168] sm:$0xff]  ;;  %v4024_v6 = vmul.f32 %v3755_v3, %v1639_v34  ;;  %v4031_v12 = vmul.f32 %v3760_v11, %v1866_v31  ;;  %v1641_v36 = vunpack.c.h.bf16 %v2926_v4 }
 0x1fa   : > { %5063 = vst [vmem:[#allocation44_spill] sm:$0xff] %v4002_v26  ;;  %5064 = vst [vmem:[#allocation45_spill] sm:$0xff] %v4005_v46  ;;  %v1419_v26 = vunpack.c.h.bf16 %v1371_v41  ;;  %v1420_v46 = vunpack.c.l.bf16 %v1372_v55  ;;  %v1421_v13 = vunpack.c.h.bf16 %v1372_v55  ;;  %v1869_v32 = vunpack.c.h.bf16 %v2958_v42  ;;  %v1374_v55 = vld [vmem:[%s3742_s4 + $0x90] sm:$0xff] }
 0x1fb   : > { %5065 = vst [vmem:[#allocation46_spill] sm:$0xff] %v4009_v43  ;;  %5066 = vst [vmem:[#allocation47_spill] sm:$0xff] %v4013_v57  ;;  %v4027_v43 = vmul.f32 %v3755_v3, %v1638_v40  ;;  %v1640_v57 = vunpack.c.l.bf16 %v2926_v4  ;;  %v1642_v47 = vunpack.c.l.bf16 %v2927_v53  ;;  %v1868_v41 = vunpack.c.l.bf16 %v2958_v42 }
 0x1fc   : > { %5067 = vst [vmem:[#allocation48_spill] sm:$0xff] %v4016_v60  ;;  %5068 = vst [vmem:[#allocation49_spill] sm:$0xff] %v4021_v15  ;;  %v2959_v60 = vld [vmem:[%s3742_s4 + $0x268] sm:$0xff]  ;;  %v2928_v15 = vld [vmem:[%s3742_s4 + $0x170] sm:$0xff]  ;;  %v4036_v34 = vmul.f32 %v3753_v0, %v1418_v52  ;;  %v4039_v40 = vmul.f32 %v3760_v11, %v1867_v8  ;;  %v1643_v31 = vunpack.c.h.bf16 %v2927_v53  ;;  %v4046_v42 = vmul.f32 %v3753_v0, %v1420_v46 }
 0x1fd   : > { %5069 = vst [vmem:[#allocation50_spill] sm:$0xff] %v4024_v6  ;;  %5070 = vst [vmem:[#allocation51_spill] sm:$0xff] %v4027_v43  ;;  %v1422_v43 = vunpack.c.l.bf16 %v1373_v50  ;;  %v1423_v6 = vunpack.c.h.bf16 %v1373_v50  ;;  %v1871_v4 = vunpack.c.h.bf16 %v2959_v60  ;;  %v1870_v33 = vunpack.c.l.bf16 %v2959_v60 }
 0x1fe   : > { %5071 = vst [vmem:[#allocation52_spill] sm:$0xff] %v4031_v12  ;;  %5072 = vst [vmem:[#allocation53_spill] sm:$0xff] %v4036_v34  ;;  %v4042_v12 = vmul.f32 %v3753_v0, %v1419_v26  ;;  %v4049_v52 = vmul.f32 %v3755_v3, %v1641_v36  ;;  %v4052_v8 = vmul.f32 %v3755_v3, %v1640_v57  ;;  %v2960_v34 = vld [vmem:[%s3742_s4 + $0x270] sm:$0xff]  ;;  %v1644_v53 = vunpack.c.l.bf16 %v2928_v15  ;;  %v2929_v36 = vld [vmem:[%s3742_s4 + $0x178] sm:$0xff] }
 0x1ff   : > { %5073 = vst [vmem:[#allocation54_spill] sm:$0xff] %v4039_v40  ;;  %5075 = vst [vmem:[#allocation56_spill] sm:$0xff] %v4046_v42  ;;  %v4056_v26 = vmul.f32 %v3753_v0, %v1421_v13  ;;  %v4059_v50 = vmul.f32 %v3760_v11, %v1869_v32  ;;  %v4062_v60 = vmul.f32 %v3755_v3, %v1642_v47  ;;  %v1424_v42 = vunpack.c.l.bf16 %v1374_v55  ;;  %v1375_v13 = vld [vmem:[%s3742_s4 + $0x98] sm:$0xff]  ;;  %v2931_v40 = vld [vmem:[%s3742_s4 + $0x188] sm:$0xff] }
 0x200   : > { %5074 = vst [vmem:[#allocation55_spill] sm:$0xff] %v4042_v12  ;;  %5076 = vst [vmem:[#allocation57_spill] sm:$0xff] %v4049_v52  ;;  %v4065_v46 = vmul.f32 %v3760_v11, %v1868_v41  ;;  %v4069_v57 = vmul.f32 %v3753_v0, %v1422_v43  ;;  %v2961_v32 = vld [vmem:[%s3742_s4 + $0x278] sm:$0xff]  ;;  %v4080_v47 = vmul.f32 %v3760_v11, %v1871_v4  ;;  %v1872_v43 = vunpack.c.l.bf16 %v2960_v34 }
 0x201   : > { %5077 = vst [vmem:[#allocation58_spill] sm:$0xff] %v4052_v8  ;;  %5078 = vst [vmem:[#allocation59_spill] sm:$0xff] %v4056_v26  ;;  %v4072_v8 = vmul.f32 %v3755_v3, %v1643_v31  ;;  %v1645_v26 = vunpack.c.h.bf16 %v2928_v15  ;;  %v4083_v41 = vmul.f32 %v3760_v11, %v1870_v33  ;;  %v1873_v31 = vunpack.c.h.bf16 %v2960_v34  ;;  %v2962_v34 = vld [vmem:[%s3742_s4 + $0x280] sm:$0xff] }
 0x202   : > { %5079 = vst [vmem:[#allocation60_spill] sm:$0xff] %v4059_v50  ;;  %5080 = vst [vmem:[#allocation61_spill] sm:$0xff] %v4062_v60  ;;  %v4077_v50 = vmul.f32 %v3753_v0, %v1423_v6  ;;  %v1376_v60 = vld [vmem:[%s3742_s4 + $0xa0] sm:$0xff]  ;;  %v4088_v15 = vmul.f32 %v3755_v3, %v1644_v53  ;;  %v1426_v52 = vunpack.c.l.bf16 %v1375_v13  ;;  %v1647_v12 = vunpack.c.h.bf16 %v2929_v36 }
 0x203   : > { %5081 = vst [vmem:[#allocation62_spill] sm:$0xff] %v4065_v46  ;;  %5082 = vst [vmem:[#allocation63_spill] sm:$0xff] %v4069_v57  ;;  %v2930_v46 = vld [vmem:[%s3742_s4 + $0x180] sm:$0xff]  ;;  %v1425_v57 = vunpack.c.h.bf16 %v1374_v55  ;;  %v1875_v6 = vunpack.c.h.bf16 %v2961_v32  ;;  %v4092_v4 = vmul.f32 %v3753_v0, %v1424_v42  ;;  %v1427_v33 = vunpack.c.h.bf16 %v1375_v13 }
 0x204   : > { %5083 = vst [vmem:[#allocation64_spill] sm:$0xff] %v4072_v8  ;;  %5084 = vst [vmem:[#allocation65_spill] sm:$0xff] %v4077_v50  ;;  %v1646_v8 = vunpack.c.l.bf16 %v2929_v36  ;;  %v1874_v50 = vunpack.c.l.bf16 %v2961_v32  ;;  %v1648_v55 = vunpack.c.l.bf16 %v2930_v46  ;;  %v4099_v53 = vmul.f32 %v3760_v11, %v1872_v43 }
 0x205   : > { %5085 = vst [vmem:[#allocation66_spill] sm:$0xff] %v4080_v47  ;;  %5086 = vst [vmem:[#allocation67_spill] sm:$0xff] %v4083_v41  ;;  %v4095_v41 = vmul.f32 %v3755_v3, %v1645_v26  ;;  %v1428_v47 = vunpack.c.l.bf16 %v1376_v60  ;;  %v1649_v36 = vunpack.c.h.bf16 %v2930_v46  ;;  %v4102_v32 = vmul.f32 %v3753_v0, %v1425_v57 }
 0x206   : > { %5087 = vst [vmem:[#allocation68_spill] sm:$0xff] %v4088_v15  ;;  %5088 = vst [vmem:[#allocation69_spill] sm:$0xff] %v4092_v4  ;;  %v1877_v15 = vunpack.c.h.bf16 %v2962_v34  ;;  %v4105_v42 = vmul.f32 %v3760_v11, %v1873_v31  ;;  %v4108_v26 = vmul.f32 %v3755_v3, %v1646_v8  ;;  %v1650_v13 = vunpack.c.l.bf16 %v2931_v40  ;;  %v2963_v31 = vld [vmem:[%s3742_s4 + $0x288] sm:$0xff] }
 0x207   : > { %5089 = vst [vmem:[#allocation70_spill] sm:$0xff] %v4095_v41  ;;  %5090 = vst [vmem:[#allocation71_spill] sm:$0xff] %v4099_v53  ;;  %v4111_v4 = vmul.f32 %v3753_v0, %v1426_v52  ;;  %v4114_v43 = vmul.f32 %v3755_v3, %v1647_v12  ;;  %v4117_v46 = vmul.f32 %v3760_v11, %v1875_v6  ;;  %v1377_v53 = vld [vmem:[%s3742_s4 + $0xa8] sm:$0xff]  ;;  %v1876_v12 = vunpack.c.l.bf16 %v2962_v34  ;;  %v2933_v34 = vld [vmem:[%s3742_s4 + $0x198] sm:$0xff] }
 0x208   : > { %5091 = vst [vmem:[#allocation72_spill] sm:$0xff] %v4102_v32  ;;  %5092 = vst [vmem:[#allocation73_spill] sm:$0xff] %v4105_v42  ;;  %v4120_v57 = vmul.f32 %v3760_v11, %v1874_v50  ;;  %v4125_v8 = vmul.f32 %v3753_v0, %v1427_v33  ;;  %v1429_v32 = vunpack.c.h.bf16 %v1376_v60  ;;  %v4129_v52 = vmul.f32 %v3755_v3, %v1648_v55  ;;  %v2964_v33 = vld [vmem:[%s3742_s4 + $0x290] sm:$0xff] }
 0x209   : > { %5093 = vst [vmem:[#allocation74_spill] sm:$0xff] %v4108_v26  ;;  %5094 = vst [vmem:[#allocation75_spill] sm:$0xff] %v4111_v4  ;;  %v1378_v26 = vld [vmem:[%s3742_s4 + $0xb0] sm:$0xff]  ;;  %v4133_v6 = vmul.f32 %v3753_v0, %v1428_v47  ;;  %v4136_v50 = vmul.f32 %v3755_v3, %v1649_v36  ;;  %v1879_v60 = vunpack.c.h.bf16 %v2963_v31  ;;  %v4143_v55 = vmul.f32 %v3755_v3, %v1650_v13 }
 0x20a   : > { %5095 = vst [vmem:[#allocation76_spill] sm:$0xff] %v4114_v43  ;;  %5096 = vst [vmem:[#allocation77_spill] sm:$0xff] %v4117_v46  ;;  %v2932_v4 = vld [vmem:[%s3742_s4 + $0x190] sm:$0xff]  ;;  %v1651_v46 = vunpack.c.h.bf16 %v2931_v40  ;;  %v1431_v42 = vunpack.c.h.bf16 %v1377_v53  ;;  %v1432_v43 = vunpack.c.l.bf16 %v1378_v26  ;;  %v4148_v36 = vmul.f32 %v3753_v0, %v1429_v32 }
 0x20b   : > { %5097 = vst [vmem:[#allocation78_spill] sm:$0xff] %v4120_v57  ;;  %5098 = vst [vmem:[#allocation79_spill] sm:$0xff] %v4125_v8  ;;  %v4139_v57 = vmul.f32 %v3760_v11, %v1877_v15  ;;  %v1430_v8 = vunpack.c.l.bf16 %v1377_v53  ;;  %v1653_v47 = vunpack.c.h.bf16 %v2932_v4  ;;  %v1652_v40 = vunpack.c.l.bf16 %v2932_v4 }
 0x20c   : > { %5099 = vst [vmem:[#allocation80_spill] sm:$0xff] %v4129_v52  ;;  %5100 = vst [vmem:[#allocation81_spill] sm:$0xff] %v4133_v6  ;;  %v1878_v52 = vunpack.c.l.bf16 %v2963_v31  ;;  %v2965_v6 = vld [vmem:[%s3742_s4 + $0x298] sm:$0xff]  ;;  %v4151_v15 = vmul.f32 %v3760_v11, %v1876_v12  ;;  %v4154_v13 = vmul.f32 %v3755_v3, %v1651_v46  ;;  %v1433_v31 = vunpack.c.h.bf16 %v1378_v26 }
 0x20d   : > { %5101 = vst [vmem:[#allocation82_spill] sm:$0xff] %v4136_v50  ;;  %5102 = vst [vmem:[#allocation83_spill] sm:$0xff] %v4139_v57  ;;  %v1881_v57 = vunpack.c.h.bf16 %v2964_v33  ;;  %v1880_v50 = vunpack.c.l.bf16 %v2964_v33  ;;  %v1655_v53 = vunpack.c.h.bf16 %v2933_v34  ;;  %v1654_v41 = vunpack.c.l.bf16 %v2933_v34  ;;  %v1380_v34 = vld [vmem:[%s3742_s4 + $0xc0] sm:$0xff] }
 0x20e   : > { %5103 = vst [vmem:[#allocation84_spill] sm:$0xff] %v4143_v55  ;;  %5104 = vst [vmem:[#allocation85_spill] sm:$0xff] %v4148_v36  ;;  %v1379_v55 = vld [vmem:[%s3742_s4 + $0xb8] sm:$0xff]  ;;  %v4158_v4 = vmul.f32 %v3753_v0, %v1430_v8  ;;  %v4161_v32 = vmul.f32 %v3760_v11, %v1879_v60  ;;  %v4164_v12 = vmul.f32 %v3760_v11, %v1878_v52  ;;  %v2934_v60 = vld [vmem:[%s3742_s4 + $0x1a0] sm:$0xff]  ;;  %v1883_v52 = vunpack.c.h.bf16 %v2965_v6 }
 0x20f   : > { %5105 = vst [vmem:[#allocation86_spill] sm:$0xff] %v4151_v15  ;;  %5106 = vst [vmem:[#allocation87_spill] sm:$0xff] %v4154_v13  ;;  %v1882_v15 = vunpack.c.l.bf16 %v2965_v6  ;;  %v4167_v33 = vmul.f32 %v3753_v0, %v1431_v42  ;;  %v4170_v26 = vmul.f32 %v3753_v0, %v1432_v43  ;;  %v4173_v46 = vmul.f32 %v3755_v3, %v1653_v47  ;;  %v2935_v43 = vld [vmem:[%s3742_s4 + $0x1a8] sm:$0xff] }
 0x210   : > { %5107 = vst [vmem:[#allocation88_spill] sm:$0xff] %v4158_v4  ;;  %5108 = vst [vmem:[#allocation89_spill] sm:$0xff] %v4161_v32  ;;  %v4177_v8 = vmul.f32 %v3755_v3, %v1652_v40  ;;  %v1434_v4 = vunpack.c.l.bf16 %v1379_v55  ;;  %v4184_v42 = vmul.f32 %v3760_v11, %v1880_v50  ;;  %v4189_v47 = vmul.f32 %v3753_v0, %v1433_v31  ;;  %v2967_v50 = vld [vmem:[%s3742_s4 + $0x2a8] sm:$0xff] }
 0x211   : > { %5109 = vst [vmem:[#allocation90_spill] sm:$0xff] %v4164_v12  ;;  %5110 = vst [vmem:[#allocation91_spill] sm:$0xff] %v4167_v33  ;;  %v4181_v12 = vmul.f32 %v3760_v11, %v1881_v57  ;;  %v4192_v33 = vmul.f32 %v3755_v3, %v1655_v53  ;;  %v4195_v40 = vmul.f32 %v3755_v3, %v1654_v41  ;;  %v1657_v57 = vunpack.c.h.bf16 %v2934_v60  ;;  %v1381_v36 = vld [vmem:[%s3742_s4 + $0xc8] sm:$0xff] }
 0x212   : > { %5111 = vst [vmem:[#allocation92_spill] sm:$0xff] %v4170_v26  ;;  %5112 = vst [vmem:[#allocation93_spill] sm:$0xff] %v4173_v46  ;;  %v2966_v26 = vld [vmem:[%s3742_s4 + $0x2a0] sm:$0xff]  ;;  %v1435_v46 = vunpack.c.h.bf16 %v1379_v55  ;;  %v4198_v6 = vmul.f32 %v3760_v11, %v1882_v15  ;;  %v1658_v31 = vunpack.c.l.bf16 %v2935_v43  ;;  %v4203_v55 = vmul.f32 %v3753_v0, %v1434_v4 }
 0x213   : > { %5113 = vst [vmem:[#allocation94_spill] sm:$0xff] %v4177_v8  ;;  %5114 = vst [vmem:[#allocation95_spill] sm:$0xff] %v4181_v12  ;;  %v1436_v8 = vunpack.c.l.bf16 %v1380_v34  ;;  %v1437_v12 = vunpack.c.h.bf16 %v1380_v34  ;;  %v1885_v32 = vunpack.c.h.bf16 %v2966_v26  ;;  %v4206_v41 = vmul.f32 %v3760_v11, %v1883_v52  ;;  %v2936_v34 = vld [vmem:[%s3742_s4 + $0x1b0] sm:$0xff] }
 0x214   : > { %5115 = vst [vmem:[#allocation96_spill] sm:$0xff] %v4184_v42  ;;  %5116 = vst [vmem:[#allocation97_spill] sm:$0xff] %v4189_v47  ;;  %v1656_v42 = vunpack.c.l.bf16 %v2934_v60  ;;  %v1884_v47 = vunpack.c.l.bf16 %v2966_v26  ;;  %v1438_v53 = vunpack.c.l.bf16 %v1381_v36  ;;  %v4209_v15 = vmul.f32 %v3753_v0, %v1435_v46  ;;  %v1382_v46 = vld [vmem:[%s3742_s4 + $0xd0] sm:$0xff] }
 0x215   : > { %5117 = vst [vmem:[#allocation98_spill] sm:$0xff] %v4192_v33  ;;  %5118 = vst [vmem:[#allocation99_spill] sm:$0xff] %v4195_v40  ;;  %v1659_v40 = vunpack.c.h.bf16 %v2935_v43  ;;  %v1887_v33 = vunpack.c.h.bf16 %v2967_v50  ;;  %v1886_v60 = vunpack.c.l.bf16 %v2967_v50  ;;  %v4213_v13 = vmul.f32 %v3753_v0, %v1436_v8 }
 0x216   : > { %5119 = vst [vmem:[#allocation100_spill] sm:$0xff] %v4198_v6  ;;  %v1439_v6 = vunpack.c.h.bf16 %v1381_v36  ;;  %v4216_v26 = vmul.f32 %v3755_v3, %v1657_v57  ;;  %v4219_v4 = vmul.f32 %v3755_v3, %v1656_v42  ;;  %v1660_v52 = vunpack.c.l.bf16 %v2936_v34 }
 0x217   : > { %5120 = vst [vmem:[#allocation101_spill] sm:$0xff] %v4213_v13  ;;  %v4222_v43 = vmul.f32 %v3753_v0, %v1437_v12  ;;  %v4225_v36 = vmul.f32 %v3760_v11, %v1885_v32  ;;  %v4229_v50 = vmul.f32 %v3755_v3, %v1658_v31  ;;  %v4232_v8 = vmul.f32 %v3760_v11, %v1884_v47  ;;  %v2937_v47 = vld [vmem:[%s3742_s4 + $0x1b8] sm:$0xff] }
 0x218   : > { %5121 = vst [vmem:[#allocation102_spill] sm:$0xff] %v4216_v26  ;;  %5122 = vst [vmem:[#allocation103_spill] sm:$0xff] %v4219_v4  ;;  %v4235_v42 = vmul.f32 %v3753_v0, %v1438_v53  ;;  %v4238_v4 = vmul.f32 %v3755_v3, %v1659_v40  ;;  %v1440_v13 = vunpack.c.l.bf16 %v1382_v46  ;;  %v1661_v12 = vunpack.c.h.bf16 %v2936_v34 }
 0x219   : > { %5123 = vst [vmem:[#allocation104_spill] sm:$0xff] %v4222_v43  ;;  %5124 = vst [vmem:[#allocation105_spill] sm:$0xff] %v4225_v36  ;;  %v4241_v32 = vmul.f32 %v3753_v0, %v1439_v6  ;;  %v4244_v36 = vmul.f32 %v3760_v11, %v1887_v33  ;;  %v4247_v31 = vmul.f32 %v3760_v11, %v1886_v60  ;;  %v1662_v34 = vunpack.c.l.bf16 %v2937_v47 }
 0x21a   : > { %5125 = vst [vmem:[#allocation106_spill] sm:$0xff] %v4229_v50  ;;  %5126 = vst [vmem:[#allocation107_spill] sm:$0xff] %v4232_v8  ;;  %v4251_v8 = vld [vmem:[%s3742_s4 + $0x2b0] sm:$0xff]  ;;  %v4258_v6 = vmul.f32 %v3755_v3, %v1660_v52  ;;  %v4261_v60 = vmul.f32 %v3755_v3, %v1661_v12  ;;  %v1663_v50 = vunpack.c.h.bf16 %v2937_v47 }
 0x21b   : > { %5127 = vst [vmem:[#allocation108_spill] sm:$0xff] %v4235_v42  ;;  %5128 = vst [vmem:[#allocation109_spill] sm:$0xff] %v4238_v4  ;;  %v4254_v42 = vmul.f32 %v3753_v0, %v1440_v13  ;;  %v1889_v40 = vunpack.c.h.bf16 %v4251_v8  ;;  %v4267_v13 = vmul.f32 %v3755_v3, %v1662_v34 }
 0x21c   : > { %5129 = vst [vmem:[#allocation110_spill] sm:$0xff] %v4241_v32  ;;  %5130 = vst [vmem:[#allocation111_spill] sm:$0xff] %v4244_v36  ;;  %v1441_v32 = vunpack.c.h.bf16 %v1382_v46  ;;  %v2969_v46 = vld [vmem:[%s3742_s4 + $0x2b8] sm:$0xff] }
 0x21d   : > { %5131 = vst [vmem:[#allocation112_spill] sm:$0xff] %v4247_v31  ;;  %5132 = vst [vmem:[#allocation113_spill] sm:$0xff] %v4251_v8  ;;  %v4264_v36 = vmul.f32 %v3760_v11, %v1889_v40  ;;  %v4277_v40 = vmul.f32 %v3755_v3, %v1663_v50 }
 0x21e   : > { %5133 = vst [vmem:[#allocation114_spill] sm:$0xff] %v4254_v42  ;;  %5134 = vst [vmem:[#allocation115_spill] sm:$0xff] %v4258_v6  ;;  %v4274_v12 = vmul.f32 %v3753_v0, %v1441_v32 }
 0x21f   : > { %5135 = vst [vmem:[#allocation116_spill] sm:$0xff] %v4261_v60  ;;  %5136 = vst [vmem:[#allocation117_spill] sm:$0xff] %v4264_v36  ;;  %v1891_v36 = vunpack.c.h.bf16 %v2969_v46 }
 0x220   : > { %5137 = vst [vmem:[#allocation118_spill] sm:$0xff] %v4267_v13  ;;  %5138 = vst [vmem:[#allocation119_spill] sm:$0xff] %v4274_v12 }
 0x221   : > { %5139 = vst [vmem:[#allocation120_spill] sm:$0xff] %v4277_v40  ;;  %v4285_v32 = vmul.f32 %v3760_v11, %v1891_v36 }
 0x233   : > { %v794_v57 = vpop.f32.mrf.mxu1 }
 0x234   : > { %v953_v43 = vmul.f32 2.0, %v794_v57 }
 0x235   : > { %v796_v53 = vpop.f32.mrf.mxu1 }
 0x236   : > { %v2849_v33 = vadd.f32 -1.0, %v953_v43  ;;  %v954_v57 = vmul.f32 2.0, %v796_v53  ;;  %v1383_v53 = vld [vmem:[%s3742_s4 + $0xd8] sm:$0xff] }
 0x237   : > { %v798_v31 = vpop.f32.mrf.mxu1  ;;  %v1442_v47 = vunpack.c.l.bf16 %v1383_v53  ;;  %v1443_v60 = vunpack.c.h.bf16 %v1383_v53 }
 0x238   : > { %v1081_v4 = vmul.f32 %v2849_v33, %v2849_v33  ;;  %v1223_v52 = vmul.f32 %v2849_v33, %v3758_v10  ;;  %v2850_v6 = vadd.f32 -1.0, %v954_v57  ;;  %v955_v43 = vmul.f32 2.0, %v798_v31 }
 0x239   : > { %v800_v26 = vpop.f32.mrf.mxu1  ;;  %v4282_v31 = vmul.f32 %v3753_v0, %v1442_v47 }
 0x23a   : > { %v1290_v34 = vadd.f32 %v3762_v14, %v1223_v52  ;;  %v1082_v13 = vmul.f32 %v2850_v6, %v2850_v6  ;;  %v1224_v42 = vmul.f32 %v2850_v6, %v3758_v10  ;;  %v2851_v8 = vadd.f32 -1.0, %v955_v43 }
 0x23b   : > { %v956_v33 = vmul.f32 2.0, %v800_v26  ;;  %v804_v57 = vpop.f32.mrf.mxu1  ;;  %v4291_v26 = vmul.f32 %v3753_v0, %v1443_v60 }
 0x23c   : > { %v1517_v12 = vadd.f32 %v3766_v19, %v1290_v34  ;;  %v1145_v50 = vadd.f32 %v1082_v13, %v1081_v4  ;;  %v1291_v46 = vadd.f32 %v3762_v14, %v1224_v42  ;;  %v1083_v3 = vmul.f32 %v2851_v8, %v2851_v8 }
 0x23d   : > { %v1225_v52 = vmul.f32 %v2851_v8, %v3758_v10  ;;  %v2852_v40 = vadd.f32 -1.0, %v956_v33  ;;  %v957_v6 = vmul.f32 2.0, %v804_v57  ;;  %v806_v43 = vpop.f32.mrf.mxu1 }
 0x23e   : > { %v1745_v47 = vadd.f32 %v3769_v20, %v1517_v12  ;;  %v1518_v53 = vadd.f32 %v3772_v21, %v1291_v46  ;;  %v1146_v36 = vadd.f32 %v1145_v50, %v1083_v3  ;;  %v958_v11 = vmul.f32 2.0, %v806_v43 }
 0x23f   : > { %v1292_v19 = vadd.f32 %v3762_v14, %v1225_v52  ;;  %v1084_v4 = vmul.f32 %v2852_v40, %v2852_v40  ;;  %v1226_v42 = vmul.f32 %v2852_v40, %v3758_v10  ;;  %v2853_v13 = vadd.f32 -1.0, %v957_v6  ;;  %v808_v34 = vpop.f32.mrf.mxu1 }
 0x240   : > { %v4298_v8 = vadd.f32 %v3775_v23, %v1745_v47  ;;  %v2854_v33 = vadd.f32 -1.0, %v958_v11  ;;  %v959_v57 = vmul.f32 2.0, %v808_v34  ;;  %v1746_v60 = vadd.f32 %v3785_v27, %v1518_v53 }
 0x241   : > { %v1519_v20 = vadd.f32 %v3778_v24, %v1292_v19  ;;  %v1147_v12 = vadd.f32 %v1146_v36, %v1084_v4  ;;  %v1293_v3 = vadd.f32 %v3762_v14, %v1226_v42  ;;  %v1085_v21 = vmul.f32 %v2853_v13, %v2853_v13  ;;  %v810_v50 = vpop.f32.mrf.mxu1 }
 0x242   : > { %v1227_v46 = vmul.f32 %v2853_v13, %v3758_v10  ;;  %v1086_v52 = vmul.f32 %v2854_v33, %v2854_v33  ;;  %v1228_v40 = vmul.f32 %v2854_v33, %v3758_v10  ;;  %v2855_v6 = vadd.f32 -1.0, %v959_v57 }
 0x243   : > { %v1747_v23 = vadd.f32 %v3781_v25, %v1519_v20  ;;  %v1520_v11 = vadd.f32 %v3792_v30, %v1293_v3  ;;  %v1148_v43 = vadd.f32 %v1147_v12, %v1085_v21  ;;  %v960_v47 = vmul.f32 2.0, %v810_v50  ;;  %v814_v27 = vpop.f32.mrf.mxu1 }
 0x244   : > { %v1294_v24 = vadd.f32 %v3762_v14, %v1227_v46  ;;  %v1295_v53 = vadd.f32 %v3762_v14, %v1228_v40  ;;  %v1087_v36 = vmul.f32 %v2855_v6, %v2855_v6  ;;  %v1229_v19 = vmul.f32 %v2855_v6, %v3758_v10 }
 0x245   : > { %v1975_v4 = vadd.f32 %v3789_v29, %v1747_v23  ;;  %v1149_v42 = vadd.f32 %v1148_v43, %v1086_v52  ;;  %v2856_v13 = vadd.f32 -1.0, %v960_v47  ;;  %v961_v34 = vmul.f32 2.0, %v814_v27  ;;  %v816_v33 = vpop.f32.mrf.mxu1 }
 0x246   : > { %v4312_v25 = vadd.f32 %v3797_v35, %v1294_v24  ;;  %v1522_v30 = vadd.f32 %v3806_v39, %v1295_v53  ;;  %v1296_v57 = vadd.f32 %v3762_v14, %v1229_v19  ;;  %v962_v20 = vmul.f32 2.0, %v816_v33 }
 0x247   : > { %v1150_v12 = vadd.f32 %v1149_v42, %v1087_v36  ;;  %v1088_v3 = vmul.f32 %v2856_v13, %v2856_v13  ;;  %v1230_v21 = vmul.f32 %v2856_v13, %v3758_v10  ;;  %v2857_v50 = vadd.f32 -1.0, %v961_v34  ;;  %v818_v46 = vpop.f32.mrf.mxu1 }
 0x248   : > { %v4318_v29 = vadd.f32 %v3811_v49, %v1296_v57  ;;  %v2858_v52 = vadd.f32 -1.0, %v962_v20  ;;  %v963_v40 = vmul.f32 2.0, %v818_v46  ;;  %v1748_v6 = vadd.f32 %v3800_v37, %v1520_v11 }
 0x249   : > { %v1151_v35 = vadd.f32 %v1150_v12, %v1088_v3  ;;  %v1297_v23 = vadd.f32 %v3762_v14, %v1230_v21  ;;  %v1089_v39 = vmul.f32 %v2857_v50, %v2857_v50  ;;  %v1231_v43 = vmul.f32 %v2857_v50, %v3758_v10  ;;  %v820_v47 = vpop.f32.mrf.mxu1 }
 0x24a   : > { %v1090_v27 = vmul.f32 %v2858_v52, %v2858_v52  ;;  %v1232_v24 = vmul.f32 %v2858_v52, %v3758_v10  ;;  %v2859_v53 = vadd.f32 -1.0, %v963_v40  ;;  %v964_v36 = vmul.f32 2.0, %v820_v47 }
 0x24b   : > { %v1524_v19 = vadd.f32 %v3818_v54, %v1297_v23  ;;  %v1152_v49 = vadd.f32 %v1151_v35, %v1089_v39  ;;  %v1298_v42 = vadd.f32 %v3762_v14, %v1231_v43  ;;  %v1974_v13 = vadd.f32 %v3803_v38, %v1746_v60  ;;  %v824_v37 = vpop.f32.mrf.mxu1 }
 0x24c   : > { %v1299_v11 = vadd.f32 %v3762_v14, %v1232_v24  ;;  %v1091_v34 = vmul.f32 %v2859_v53, %v2859_v53  ;;  %v1233_v33 = vmul.f32 %v2859_v53, %v3758_v10  ;;  %v2860_v57 = vadd.f32 -1.0, %v964_v36 }
 0x24d   : > { %v4330_v20 = vadd.f32 %v3822_v58, %v1298_v42  ;;  %v1153_v12 = vadd.f32 %v1152_v49, %v1090_v27  ;;  %v1976_v3 = vadd.f32 %v3814_v51, %v1748_v6  ;;  %v965_v21 = vmul.f32 2.0, %v824_v37  ;;  %v826_v54 = vpop.f32.mrf.mxu1 }
 0x24e   : > { %v4334_v50 = vadd.f32 %v3825_v59, %v1299_v11  ;;  %v1300_v38 = vadd.f32 %v3762_v14, %v1233_v33  ;;  %v1092_v60 = vmul.f32 %v2860_v57, %v2860_v57  ;;  %v1234_v46 = vmul.f32 %v2860_v57, %v3758_v10 }
 0x24f   : > { %v1154_v52 = vadd.f32 %v1153_v12, %v1091_v34  ;;  %v2038_v40 = vpack.c.bf16 %v1976_v3, %v1974_v13  ;;  %v2861_v35 = vadd.f32 -1.0, %v965_v21  ;;  %v2037_v23 = vpack.c.bf16 %v1975_v4, %v4298_v8  ;;  %v828_v58 = vpop.f32.mrf.mxu1 }
 0x250   : > { %v4340_v39 = vadd.f32 %v3831_v62, %v1300_v38  ;;  %v1301_v51 = vadd.f32 %v3762_v14, %v1234_v46  ;;  %v966_v6 = vmul.f32 2.0, %v826_v54  ;;  %v967_v43 = vmul.f32 2.0, %v828_v58 }
 0x251   : > { %v1155_v59 = vadd.f32 %v1154_v52, %v1092_v60  ;;  %2229 = vmatprep.mubr.bf16.mxu0 %v2038_v40  ;;  %v1093_v47 = vmul.f32 %v2861_v35, %v2861_v35  ;;  %v1235_v27 = vmul.f32 %v2861_v35, %v3758_v10  ;;  %v830_v24 = vpop.f32.mrf.mxu1  ;;  %v1750_v53 = vadd.f32 %v3834_v63, %v1522_v30 }
 0x252   : > { %v1528_v36 = vadd.f32 %v3845_v7, %v1301_v51  ;;  %2230 = vmatmul.mubr.bf16.vlgmr.msra.gmra.mxu0 %v2037_v23  ;;  %v2862_v8 = vadd.f32 -1.0, %v966_v6  ;;  %v2863_v4 = vadd.f32 -1.0, %v967_v43  ;;  %v968_v49 = vmul.f32 2.0, %v830_v24 }
 0x253   : > { %v1156_v62 = vadd.f32 %v1155_v59, %v1093_v47  ;;  %v1302_v42 = vadd.f32 %v3762_v14, %v1235_v27  ;;  %v1752_v13 = vadd.f32 %v3848_v9, %v1524_v19  ;;  %v1978_v37 = vadd.f32 %v3837_v1, %v1750_v53  ;;  %v834_v11 = vpop.f32.mrf.mxu1 }
 0x254   : > { %v1094_v34 = vmul.f32 %v2862_v8, %v2862_v8  ;;  %v1236_v33 = vmul.f32 %v2862_v8, %v3758_v10  ;;  %v1095_v57 = vmul.f32 %v2863_v4, %v2863_v4  ;;  %v1237_v63 = vmul.f32 %v2863_v4, %v3758_v10 }
 0x255   : > { %v4352_v7 = vadd.f32 %v3853_v16, %v1302_v42  ;;  %v2864_v30 = vadd.f32 -1.0, %v968_v49  ;;  %v1980_v12 = vadd.f32 %v3856_v18, %v1752_v13  ;;  %v969_v3 = vmul.f32 2.0, %v834_v11  ;;  %v836_v21 = vpop.f32.mrf.mxu1  ;;  %v5140_v42 = vld [vmem:[#allocation13_spill] sm:$0xff] }
 0x256   : > { %v1157_v54 = vadd.f32 %v1156_v62, %v1094_v34  ;;  %v1303_v9 = vadd.f32 %v3762_v14, %v1236_v33  ;;  %v1304_v1 = vadd.f32 %v3762_v14, %v1237_v63  ;;  %v1749_v19 = vadd.f32 %v3828_v61, %v4312_v25 }
 0x257   : > { %v1096_v38 = vmul.f32 %v2864_v30, %v2864_v30  ;;  %v1238_v60 = vmul.f32 %v2864_v30, %v3758_v10  ;;  %v2040_v46 = vpack.c.bf16 %v1980_v12, %v1978_v37  ;;  %v2865_v52 = vadd.f32 -1.0, %v969_v3  ;;  %v838_v16 = vpop.f32.mrf.mxu1  ;;  %v5142_v3 = vld [vmem:[#allocation11_spill] sm:$0xff] }
 0x258   : > { %v4361_v40 = vadd.f32 %v3863_v28, %v1303_v9  ;;  %v1158_v18 = vadd.f32 %v1157_v54, %v1095_v57  ;;  %v4364_v35 = vadd.f32 %v3868_v44, %v1304_v1  ;;  %v1751_v23 = vadd.f32 %v3841_v5, %v4318_v29  ;;  %v5141_v57 = vld [vmem:[#allocation19_spill] sm:$0xff] }
 0x259   : > { %v1305_v58 = vadd.f32 %v3762_v14, %v1238_v60  ;;  %2237 = vmatprep.mubr.bf16.mxu0 %v2040_v46  ;;  %v1097_v61 = vmul.f32 %v2865_v52, %v2865_v52  ;;  %v1239_v25 = vmul.f32 %v2865_v52, %v3758_v10  ;;  %v1977_v51 = vadd.f32 %v3859_v22, %v1749_v19  ;;  %v840_v6 = vpop.f32.mrf.mxu1  ;;  %v5143_v19 = vld [vmem:[#allocation14_spill] sm:$0xff]  ;;  %v5144_v46 = vld [vmem:[#allocation12_spill] sm:$0xff] }
 0x25a   : > { %v1159_v43 = vadd.f32 %v1158_v18, %v1096_v38  ;;  %v1979_v28 = vadd.f32 %v3871_v45, %v1751_v23  ;;  %v970_v59 = vmul.f32 2.0, %v836_v21  ;;  %v971_v47 = vmul.f32 2.0, %v838_v16  ;;  %v5145_v18 = vld [vmem:[#allocation17_spill] sm:$0xff] }
 0x25b   : > { %v1532_v44 = vadd.f32 %v3874_v48, %v1305_v58  ;;  %v1306_v27 = vadd.f32 %v3762_v14, %v1239_v25  ;;  %v972_v24 = vmul.f32 2.0, %v840_v6  ;;  %v1754_v5 = vadd.f32 %v3881_v2, %v4334_v50  ;;  %v844_v29 = vpop.f32.mrf.mxu1  ;;  %v5146_v58 = vld [vmem:[#allocation15_spill] sm:$0xff]  ;;  %v5147_v25 = vld [vmem:[#allocation18_spill] sm:$0xff] }
 0x25c   : > { %v1160_v53 = vadd.f32 %v1159_v43, %v1097_v61  ;;  %v2039_v8 = vpack.c.bf16 %v1979_v28, %v1977_v51  ;;  %v2866_v4 = vadd.f32 -1.0, %v970_v59  ;;  %v2867_v49 = vadd.f32 -1.0, %v971_v47  ;;  %v5148_v43 = vld [vmem:[#allocation16_spill] sm:$0xff] }
 0x25d   : > { %v4377_v22 = vadd.f32 %v3878_v56, %v1306_v27  ;;  %v2868_v62 = vadd.f32 -1.0, %v972_v24  ;;  %v1756_v45 = vadd.f32 %v3901_v17, %v1528_v36  ;;  %v1982_v13 = vadd.f32 %v5140_v42, %v1754_v5  ;;  %v846_v48 = vpop.f32.mrf.mxu1 }
 0x25e   : > { %2238 = vmatmul.mubr.bf16.gmra.mxu0 %v2039_v8  ;;  %v1098_v37 = vmul.f32 %v2866_v4, %v2866_v4  ;;  %v1240_v11 = vmul.f32 %v2866_v4, %v3758_v10  ;;  %v1099_v34 = vmul.f32 %v2867_v49, %v2867_v49  ;;  %v1241_v2 = vmul.f32 %v2867_v49, %v3758_v10  ;;  %v5150_v4 = vld [vmem:[#allocation28_spill] sm:$0xff] }
 0x25f   : > { %v1100_v50 = vmul.f32 %v2868_v62, %v2868_v62  ;;  %v1242_v33 = vmul.f32 %v2868_v62, %v3758_v10  ;;  %v1984_v63 = vadd.f32 %v5141_v57, %v1756_v45  ;;  %v973_v56 = vmul.f32 2.0, %v844_v29  ;;  %v848_v30 = vpop.f32.mrf.mxu1 }
 0x260   : > { %v1161_v12 = vadd.f32 %v1160_v53, %v1098_v37  ;;  %v1307_v17 = vadd.f32 %v3762_v14, %v1240_v11  ;;  %v1308_v36 = vadd.f32 %v3762_v14, %v1241_v2  ;;  %v1753_v21 = vadd.f32 %v5142_v3, %v4330_v20  ;;  %v5149_v53 = vld [vmem:[#allocation22_spill] sm:$0xff]  ;;  %v5151_v11 = vld [vmem:[#allocation21_spill] sm:$0xff] }
 0x261   : > { %v1309_v54 = vadd.f32 %v3762_v14, %v1242_v33  ;;  %v2042_v9 = vpack.c.bf16 %v1984_v63, %v1982_v13  ;;  %v2869_v1 = vadd.f32 -1.0, %v973_v56  ;;  %v1755_v38 = vadd.f32 %v5143_v19, %v4340_v39  ;;  %v850_v60 = vpop.f32.mrf.mxu1  ;;  %v5154_v19 = vld [vmem:[#allocation20_spill] sm:$0xff] }
 0x262   : > { %v1534_v52 = vadd.f32 %v5144_v46, %v1307_v17  ;;  %v1162_v16 = vadd.f32 %v1161_v12, %v1099_v34  ;;  %v4394_v23 = vadd.f32 %v5145_v18, %v1308_v36  ;;  %v1981_v61 = vadd.f32 %v5146_v58, %v1753_v21  ;;  %v5155_v18 = vld [vmem:[#allocation25_spill] sm:$0xff] }
 0x263   : > { %v1536_v51 = vadd.f32 %v5147_v25, %v1309_v54  ;;  %2245 = vmatprep.mubr.bf16.mxu0 %v2042_v9  ;;  %v1101_v20 = vmul.f32 %v2869_v1, %v2869_v1  ;;  %v1243_v6 = vmul.f32 %v2869_v1, %v3758_v10  ;;  %v1983_v28 = vadd.f32 %v5148_v43, %v1755_v38  ;;  %v854_v59 = vpop.f32.mrf.mxu1  ;;  %v5156_v25 = vld [vmem:[#allocation24_spill] sm:$0xff]  ;;  %v5157_v43 = vld [vmem:[#allocation27_spill] sm:$0xff] }
 0x264   : > { %v1163_v47 = vadd.f32 %v1162_v16, %v1100_v50  ;;  %v974_v39 = vmul.f32 2.0, %v846_v48  ;;  %v975_v27 = vmul.f32 2.0, %v848_v30  ;;  %v976_v24 = vmul.f32 2.0, %v850_v60  ;;  %v5152_v48 = vld [vmem:[#allocation23_spill] sm:$0xff]  ;;  %v5153_v50 = vld [vmem:[#allocation29_spill] sm:$0xff] }
 0x265   : > { %v1310_v5 = vadd.f32 %v3762_v14, %v1243_v6  ;;  %v2041_v29 = vpack.c.bf16 %v1983_v28, %v1981_v61  ;;  %v1758_v8 = vadd.f32 %v5149_v53, %v4361_v40  ;;  %v1760_v49 = vadd.f32 %v5150_v4, %v1532_v44  ;;  %v856_v62 = vpop.f32.mrf.mxu1 }
 0x266   : > { %v1164_v45 = vadd.f32 %v1163_v47, %v1101_v20  ;;  %v2870_v42 = vadd.f32 -1.0, %v974_v39  ;;  %v2871_v13 = vadd.f32 -1.0, %v975_v27  ;;  %v2872_v37 = vadd.f32 -1.0, %v976_v24  ;;  %v5159_v39 = vld [vmem:[#allocation31_spill] sm:$0xff]  ;;  %v5160_v24 = vld [vmem:[#allocation30_spill] sm:$0xff] }
 0x267   : > { %v4405_v34 = vadd.f32 %v5151_v11, %v1310_v5  ;;  %2246 = vmatmul.mubr.bf16.gmra.mxu0 %v2041_v29  ;;  %v1986_v2 = vadd.f32 %v5152_v48, %v1758_v8  ;;  %v1988_v33 = vadd.f32 %v5153_v50, %v1760_v49  ;;  %v977_v57 = vmul.f32 2.0, %v854_v59  ;;  %v858_v63 = vpop.f32.mrf.mxu1  ;;  %v5158_v59 = vld [vmem:[#allocation26_spill] sm:$0xff]  ;;  %v5163_v48 = vld [vmem:[#allocation39_spill] sm:$0xff] }
 0x268   : > { %v1102_v56 = vmul.f32 %v2870_v42, %v2870_v42  ;;  %v1244_v40 = vmul.f32 %v2870_v42, %v3758_v10  ;;  %v1103_v30 = vmul.f32 %v2871_v13, %v2871_v13  ;;  %v1245_v44 = vmul.f32 %v2871_v13, %v3758_v10  ;;  %v5161_v49 = vld [vmem:[#allocation34_spill] sm:$0xff]  ;;  %v5162_v42 = vld [vmem:[#allocation33_spill] sm:$0xff] }
 0x269   : > { %v1104_v12 = vmul.f32 %v2872_v37, %v2872_v37  ;;  %v1246_v17 = vmul.f32 %v2872_v37, %v3758_v10  ;;  %v2044_v36 = vpack.c.bf16 %v1988_v33, %v1986_v2  ;;  %v2873_v3 = vadd.f32 -1.0, %v977_v57  ;;  %v860_v21 = vpop.f32.mrf.mxu1 }
 0x26a   : > { %v1165_v54 = vadd.f32 %v1164_v45, %v1102_v56  ;;  %v1311_v9 = vadd.f32 %v3762_v14, %v1244_v40  ;;  %v1312_v1 = vadd.f32 %v3762_v14, %v1245_v44  ;;  %v1757_v38 = vadd.f32 %v5154_v19, %v4352_v7  ;;  %v5164_v40 = vld [vmem:[#allocation35_spill] sm:$0xff]  ;;  %v5165_v44 = vld [vmem:[#allocation41_spill] sm:$0xff] }
 0x26b   : > { %v1313_v60 = vadd.f32 %v3762_v14, %v1246_v17  ;;  %2253 = vmatprep.mubr.bf16.mxu0 %v2044_v36  ;;  %v1105_v46 = vmul.f32 %v2873_v3, %v2873_v3  ;;  %v1247_v16 = vmul.f32 %v2873_v3, %v3758_v10  ;;  %v1759_v58 = vadd.f32 %v5155_v18, %v4364_v35  ;;  %v864_v61 = vpop.f32.mrf.mxu1 }
 0x26c   : > { %v1538_v20 = vadd.f32 %v5156_v25, %v1311_v9  ;;  %v1166_v6 = vadd.f32 %v1165_v54, %v1103_v30  ;;  %v4422_v28 = vadd.f32 %v5157_v43, %v1312_v1  ;;  %v1985_v47 = vadd.f32 %v5158_v59, %v1757_v38  ;;  %v5168_v25 = vld [vmem:[#allocation37_spill] sm:$0xff] }
 0x26d   : > { %v1540_v7 = vadd.f32 %v5159_v39, %v1313_v60  ;;  %v1314_v27 = vadd.f32 %v3762_v14, %v1247_v16  ;;  %v1987_v5 = vadd.f32 %v5160_v24, %v1759_v58  ;;  %v978_v29 = vmul.f32 2.0, %v856_v62  ;;  %v866_v53 = vpop.f32.mrf.mxu1  ;;  %v5166_v16 = vld [vmem:[#allocation32_spill] sm:$0xff] }
 0x26e   : > { %v1167_v8 = vadd.f32 %v1166_v6, %v1104_v12  ;;  %v979_v4 = vmul.f32 2.0, %v858_v63  ;;  %v980_v35 = vmul.f32 2.0, %v860_v21  ;;  %v1762_v45 = vadd.f32 %v5161_v49, %v1534_v52  ;;  %v5167_v58 = vld [vmem:[#allocation36_spill] sm:$0xff] }
 0x26f   : > { %v4430_v13 = vadd.f32 %v5162_v42, %v1314_v27  ;;  %v2043_v37 = vpack.c.bf16 %v1987_v5, %v1985_v47  ;;  %v2874_v11 = vadd.f32 -1.0, %v978_v29  ;;  %v1764_v2 = vadd.f32 %v5163_v48, %v1536_v51  ;;  %v868_v50 = vpop.f32.mrf.mxu1  ;;  %v5169_v27 = vld [vmem:[#allocation40_spill] sm:$0xff]  ;;  %v5170_v5 = vld [vmem:[#allocation43_spill] sm:$0xff] }
 0x270   : > { %v1168_v33 = vadd.f32 %v1167_v8, %v1105_v46  ;;  %v2875_v57 = vadd.f32 -1.0, %v979_v4  ;;  %v2876_v56 = vadd.f32 -1.0, %v980_v35  ;;  %v1990_v30 = vadd.f32 %v5164_v40, %v1762_v45  ;;  %v5171_v8 = vld [vmem:[#allocation38_spill] sm:$0xff] }
 0x271   : > { %2254 = vmatmul.mubr.bf16.gmra.mxu0 %v2043_v37  ;;  %v1106_v62 = vmul.f32 %v2874_v11, %v2874_v11  ;;  %v1248_v63 = vmul.f32 %v2874_v11, %v3758_v10  ;;  %v1992_v12 = vadd.f32 %v5165_v44, %v1764_v2  ;;  %v981_v52 = vmul.f32 2.0, %v864_v61  ;;  %v870_v17 = vpop.f32.mrf.mxu1  ;;  %v5172_v35 = vld [vmem:[#allocation42_spill] sm:$0xff]  ;;  %v5173_v2 = vld [vmem:[#allocation45_spill] sm:$0xff] }
 0x272   : > { %v1107_v36 = vmul.f32 %v2875_v57, %v2875_v57  ;;  %v1249_v3 = vmul.f32 %v2875_v57, %v3758_v10  ;;  %v1108_v21 = vmul.f32 %v2876_v56, %v2876_v56  ;;  %v1250_v51 = vmul.f32 %v2876_v56, %v3758_v10  ;;  %v5174_v57 = vld [vmem:[#allocation50_spill] sm:$0xff] }
 0x273   : > { %v1169_v54 = vadd.f32 %v1168_v33, %v1106_v62  ;;  %v1315_v9 = vadd.f32 %v3762_v14, %v1248_v63  ;;  %v2046_v1 = vpack.c.bf16 %v1992_v12, %v1990_v30  ;;  %v2877_v19 = vadd.f32 -1.0, %v981_v52  ;;  %v874_v38 = vpop.f32.mrf.mxu1  ;;  %v5175_v30 = vld [vmem:[#allocation44_spill] sm:$0xff] }
 0x274   : > { %v1316_v60 = vadd.f32 %v3762_v14, %v1249_v3  ;;  %v1317_v46 = vadd.f32 %v3762_v14, %v1250_v51  ;;  %v1761_v18 = vadd.f32 %v5166_v16, %v4377_v22  ;;  %v1763_v61 = vadd.f32 %v5167_v58, %v4394_v23  ;;  %v5178_v58 = vld [vmem:[#allocation46_spill] sm:$0xff] }
 0x275   : > { %v1542_v6 = vadd.f32 %v5168_v25, %v1315_v9  ;;  %v1170_v43 = vadd.f32 %v1169_v54, %v1107_v36  ;;  %2261 = vmatprep.mubr.bf16.mxu0 %v2046_v1  ;;  %v1109_v59 = vmul.f32 %v2877_v19, %v2877_v19  ;;  %v1251_v47 = vmul.f32 %v2877_v19, %v3758_v10  ;;  %v876_v39 = vpop.f32.mrf.mxu1  ;;  %v5176_v36 = vld [vmem:[#allocation47_spill] sm:$0xff] }
 0x276   : > { %v4448_v24 = vadd.f32 %v5169_v27, %v1316_v60  ;;  %v1544_v29 = vadd.f32 %v5170_v5, %v1317_v46  ;;  %v1989_v4 = vadd.f32 %v5171_v8, %v1761_v18  ;;  %v1991_v22 = vadd.f32 %v5172_v35, %v1763_v61  ;;  %v5180_v5 = vld [vmem:[#allocation49_spill] sm:$0xff] }
 0x277   : > { %v1171_v49 = vadd.f32 %v1170_v43, %v1108_v21  ;;  %v1318_v23 = vadd.f32 %v3762_v14, %v1251_v47  ;;  %v982_v45 = vmul.f32 2.0, %v866_v53  ;;  %v983_v42 = vmul.f32 2.0, %v868_v50  ;;  %v878_v37 = vpop.f32.mrf.mxu1  ;;  %v5177_v53 = vld [vmem:[#allocation54_spill] sm:$0xff]  ;;  %v5179_v47 = vld [vmem:[#allocation51_spill] sm:$0xff]  ;;  %v5181_v35 = vld [vmem:[#allocation53_spill] sm:$0xff] }
 0x278   : > { %v2045_v11 = vpack.c.bf16 %v1991_v22, %v1989_v4  ;;  %v984_v48 = vmul.f32 2.0, %v870_v17  ;;  %v1766_v33 = vadd.f32 %v5173_v2, %v1538_v20  ;;  %v1768_v56 = vadd.f32 %v5174_v57, %v1540_v7 }
 0x279   : > { %v1172_v40 = vadd.f32 %v1171_v49, %v1109_v59  ;;  %v4457_v62 = vadd.f32 %v5175_v30, %v1318_v23  ;;  %v2878_v63 = vadd.f32 -1.0, %v982_v45  ;;  %v2879_v44 = vadd.f32 -1.0, %v983_v42  ;;  %v880_v12 = vpop.f32.mrf.mxu1  ;;  %v5182_v49 = vld [vmem:[#allocation48_spill] sm:$0xff] }
 0x27a   : > { %2262 = vmatmul.mubr.bf16.gmra.mxu0 %v2045_v11  ;;  %v2880_v52 = vadd.f32 -1.0, %v984_v48  ;;  %v1994_v3 = vadd.f32 %v5176_v36, %v1766_v33  ;;  %v1996_v50 = vadd.f32 %v5177_v53, %v1768_v56  ;;  %v985_v21 = vmul.f32 2.0, %v874_v38  ;;  %v5184_v48 = vld [vmem:[#allocation52_spill] sm:$0xff] }
 0x27b   : > { %v1110_v51 = vmul.f32 %v2878_v63, %v2878_v63  ;;  %v1252_v17 = vmul.f32 %v2878_v63, %v3758_v10  ;;  %v1111_v20 = vmul.f32 %v2879_v44, %v2879_v44  ;;  %v1253_v7 = vmul.f32 %v2879_v44, %v3758_v10  ;;  %v884_v54 = vpop.f32.mrf.mxu1  ;;  %v5186_v44 = vld [vmem:[#allocation56_spill] sm:$0xff] }
 0x27c   : > { %v1112_v9 = vmul.f32 %v2880_v52, %v2880_v52  ;;  %v1254_v1 = vmul.f32 %v2880_v52, %v3758_v10  ;;  %v2048_v19 = vpack.c.bf16 %v1996_v50, %v1994_v3  ;;  %v2881_v60 = vadd.f32 -1.0, %v985_v21  ;;  %v5187_v53 = vld [vmem:[#allocation64_spill] sm:$0xff] }
 0x27d   : > { %v1173_v46 = vadd.f32 %v1172_v40, %v1110_v51  ;;  %v1319_v16 = vadd.f32 %v3762_v14, %v1252_v17  ;;  %v1320_v18 = vadd.f32 %v3762_v14, %v1253_v7  ;;  %v1765_v38 = vadd.f32 %v5178_v58, %v4405_v34  ;;  %v886_v61 = vpop.f32.mrf.mxu1  ;;  %v5183_v34 = vld [vmem:[#allocation55_spill] sm:$0xff] }
 0x27e   : > { %v1321_v25 = vadd.f32 %v3762_v14, %v1254_v1  ;;  %2269 = vmatprep.mubr.bf16.mxu0 %v2048_v19  ;;  %v1113_v43 = vmul.f32 %v2881_v60, %v2881_v60  ;;  %v1255_v59 = vmul.f32 %v2881_v60, %v3758_v10  ;;  %v1767_v27 = vadd.f32 %v5179_v47, %v4422_v28  ;;  %v5185_v28 = vld [vmem:[#allocation57_spill] sm:$0xff]  ;;  %v5190_v47 = vld [vmem:[#allocation58_spill] sm:$0xff] }
 0x27f   : > { %v1546_v8 = vadd.f32 %v5180_v5, %v1319_v16  ;;  %v1174_v4 = vadd.f32 %v1173_v46, %v1111_v20  ;;  %v4474_v22 = vadd.f32 %v5181_v35, %v1320_v18  ;;  %v1993_v23 = vadd.f32 %v5182_v49, %v1765_v38  ;;  %v888_v45 = vpop.f32.mrf.mxu1  ;;  %v5188_v20 = vld [vmem:[#allocation60_spill] sm:$0xff]  ;;  %v5192_v35 = vld [vmem:[#allocation59_spill] sm:$0xff] }
 0x280   : > { %v1548_v42 = vadd.f32 %v5183_v34, %v1321_v25  ;;  %v1322_v11 = vadd.f32 %v3762_v14, %v1255_v59  ;;  %v1995_v2 = vadd.f32 %v5184_v48, %v1767_v27  ;;  %v986_v33 = vmul.f32 2.0, %v876_v39  ;;  %v5191_v27 = vld [vmem:[#allocation61_spill] sm:$0xff]  ;;  %v5193_v48 = vld [vmem:[#allocation63_spill] sm:$0xff] }
 0x281   : > { %v1175_v57 = vadd.f32 %v1174_v4, %v1112_v9  ;;  %v987_v56 = vmul.f32 2.0, %v878_v37  ;;  %v988_v40 = vmul.f32 2.0, %v880_v12  ;;  %v1770_v30 = vadd.f32 %v5185_v28, %v1542_v6  ;;  %v890_v63 = vpop.f32.mrf.mxu1  ;;  %v5189_v12 = vld [vmem:[#allocation66_spill] sm:$0xff]  ;;  %v5196_v28 = vld [vmem:[#allocation67_spill] sm:$0xff] }
 0x282   : > { %v4482_v52 = vadd.f32 %v5186_v44, %v1322_v11  ;;  %v2047_v36 = vpack.c.bf16 %v1995_v2, %v1993_v23  ;;  %v2882_v3 = vadd.f32 -1.0, %v986_v33  ;;  %v1772_v50 = vadd.f32 %v5187_v53, %v1544_v29  ;;  %v5194_v33 = vld [vmem:[#allocation65_spill] sm:$0xff] }
 0x283   : > { %v1176_v21 = vadd.f32 %v1175_v57, %v1113_v43  ;;  %v2883_v51 = vadd.f32 -1.0, %v987_v56  ;;  %v2884_v17 = vadd.f32 -1.0, %v988_v40  ;;  %v1998_v7 = vadd.f32 %v5188_v20, %v1770_v30  ;;  %v894_v1 = vpop.f32.mrf.mxu1  ;;  %v5195_v56 = vld [vmem:[#allocation62_spill] sm:$0xff] }
 0x284   : > { %2270 = vmatmul.mubr.bf16.gmra.mxu0 %v2047_v36  ;;  %v1114_v39 = vmul.f32 %v2882_v3, %v2882_v3  ;;  %v1256_v37 = vmul.f32 %v2882_v3, %v3758_v10  ;;  %v2000_v6 = vadd.f32 %v5189_v12, %v1772_v50  ;;  %v989_v9 = vmul.f32 2.0, %v884_v54 }
 0x285   : > { %v1115_v19 = vmul.f32 %v2883_v51, %v2883_v51  ;;  %v1257_v60 = vmul.f32 %v2883_v51, %v3758_v10  ;;  %v1116_v46 = vmul.f32 %v2884_v17, %v2884_v17  ;;  %v1258_v16 = vmul.f32 %v2884_v17, %v3758_v10  ;;  %v4490_v29 = vpop.f32.mrf.mxu1  ;;  %v5198_v17 = vld [vmem:[#allocation76_spill] sm:$0xff] }
 0x286   : > { %v1177_v18 = vadd.f32 %v1176_v21, %v1114_v39  ;;  %v1323_v58 = vadd.f32 %v3762_v14, %v1256_v37  ;;  %v2050_v38 = vpack.c.bf16 %v2000_v6, %v1998_v7  ;;  %v2885_v25 = vadd.f32 -1.0, %v989_v9  ;;  %v5197_v21 = vld [vmem:[#allocation70_spill] sm:$0xff]  ;;  %v5199_v37 = vld [vmem:[#allocation69_spill] sm:$0xff] }
 0x287   : > { %v1324_v43 = vadd.f32 %v3762_v14, %v1257_v60  ;;  %v1325_v59 = vadd.f32 %v3762_v14, %v1258_v16  ;;  %v1769_v54 = vadd.f32 %v5190_v47, %v4430_v13  ;;  %v1771_v5 = vadd.f32 %v5191_v27, %v4448_v24  ;;  %v898_v4 = vpop.f32.mrf.mxu1  ;;  %v5200_v60 = vld [vmem:[#allocation73_spill] sm:$0xff] }
 0x288   : > { %v1550_v49 = vadd.f32 %v5192_v35, %v1323_v58  ;;  %v1178_v23 = vadd.f32 %v1177_v18, %v1115_v19  ;;  %2277 = vmatprep.mubr.bf16.mxu0 %v2050_v38  ;;  %v1117_v34 = vmul.f32 %v2885_v25, %v2885_v25  ;;  %v1259_v11 = vmul.f32 %v2885_v25, %v3758_v10  ;;  %v5201_v16 = vld [vmem:[#allocation77_spill] sm:$0xff] }
 0x289   : > { %v4502_v2 = vadd.f32 %v5193_v48, %v1324_v43  ;;  %v1552_v57 = vadd.f32 %v5194_v33, %v1325_v59  ;;  %v1997_v40 = vadd.f32 %v5195_v56, %v1769_v54  ;;  %v1999_v13 = vadd.f32 %v5196_v28, %v1771_v5  ;;  %v900_v30 = vpop.f32.mrf.mxu1  ;;  %v5202_v5 = vld [vmem:[#allocation68_spill] sm:$0xff]  ;;  %v5203_v48 = vld [vmem:[#allocation74_spill] sm:$0xff] }
 0x28a   : > { %v1179_v44 = vadd.f32 %v1178_v23, %v1116_v46  ;;  %v1326_v24 = vadd.f32 %v3762_v14, %v1259_v11  ;;  %v990_v36 = vmul.f32 2.0, %v886_v61  ;;  %v991_v3 = vmul.f32 2.0, %v888_v45 }
 0x28b   : > { %v2049_v53 = vpack.c.bf16 %v1999_v13, %v1997_v40  ;;  %v992_v50 = vmul.f32 2.0, %v890_v63  ;;  %v1774_v51 = vadd.f32 %v5197_v21, %v1546_v8  ;;  %v1776_v20 = vadd.f32 %v5198_v17, %v1548_v42  ;;  %v904_v7 = vpop.f32.mrf.mxu1  ;;  %v5204_v40 = vld [vmem:[#allocation72_spill] sm:$0xff]  ;;  %v5208_v21 = vld [vmem:[#allocation78_spill] sm:$0xff] }
 0x28c   : > { %v1180_v39 = vadd.f32 %v1179_v44, %v1117_v34  ;;  %v4511_v12 = vadd.f32 %v5199_v37, %v1326_v24  ;;  %v2886_v6 = vadd.f32 -1.0, %v990_v36  ;;  %v2887_v9 = vadd.f32 -1.0, %v991_v3  ;;  %v5205_v44 = vld [vmem:[#allocation75_spill] sm:$0xff] }
 0x28d   : > { %2278 = vmatmul.mubr.bf16.gmra.mxu0 %v2049_v53  ;;  %v2888_v19 = vadd.f32 -1.0, %v992_v50  ;;  %v2002_v46 = vadd.f32 %v5200_v60, %v1774_v51  ;;  %v2004_v61 = vadd.f32 %v5201_v16, %v1776_v20  ;;  %v993_v45 = vmul.f32 2.0, %v894_v1  ;;  %v4515_v18 = vpop.f32.mrf.mxu1  ;;  %v5206_v36 = vld [vmem:[#allocation71_spill] sm:$0xff] }
 0x28e   : > { %v1118_v63 = vmul.f32 %v2886_v6, %v2886_v6  ;;  %v1260_v8 = vmul.f32 %v2886_v6, %v3758_v10  ;;  %v1119_v42 = vmul.f32 %v2887_v9, %v2887_v9  ;;  %v1261_v58 = vmul.f32 %v2887_v9, %v3758_v10  ;;  %v5207_v53 = vld [vmem:[#allocation79_spill] sm:$0xff]  ;;  %v5209_v6 = vld [vmem:[#allocation82_spill] sm:$0xff] }
 0x28f   : > { %v1120_v38 = vmul.f32 %v2888_v19, %v2888_v19  ;;  %v1262_v25 = vmul.f32 %v2888_v19, %v3758_v10  ;;  %v2052_v43 = vpack.c.bf16 %v2004_v61, %v2002_v46  ;;  %v2889_v59 = vadd.f32 -1.0, %v993_v45  ;;  %v4520_v47 = vpop.f32.mrf.mxu1  ;;  %v5210_v19 = vld [vmem:[#allocation81_spill] sm:$0xff]  ;;  %v5211_v61 = vld [vmem:[#allocation87_spill] sm:$0xff] }
 0x290   : > { %v1181_v54 = vadd.f32 %v1180_v39, %v1118_v63  ;;  %v1327_v27 = vadd.f32 %v3762_v14, %v1260_v8  ;;  %v1328_v1 = vadd.f32 %v3762_v14, %v1261_v58  ;;  %v1773_v35 = vadd.f32 %v5202_v5, %v4457_v62 }
 0x291   : > { %v1329_v23 = vadd.f32 %v3762_v14, %v1262_v25  ;;  %2285 = vmatprep.mubr.bf16.mxu0 %v2052_v43  ;;  %v1121_v34 = vmul.f32 %v2889_v59, %v2889_v59  ;;  %v1263_v11 = vmul.f32 %v2889_v59, %v3758_v10  ;;  %v1775_v33 = vadd.f32 %v5203_v48, %v4474_v22  ;;  %v910_v56 = vpop.f32.mrf.mxu1  ;;  %v5212_v25 = vld [vmem:[#allocation83_spill] sm:$0xff] }
 0x292   : > { %v1554_v28 = vadd.f32 %v5204_v40, %v1327_v27  ;;  %v1182_v13 = vadd.f32 %v1181_v54, %v1119_v42  ;;  %v4532_v24 = vadd.f32 %v5205_v44, %v1328_v1  ;;  %v2001_v3 = vadd.f32 %v5206_v36, %v1773_v35  ;;  %v5216_v36 = vld [vmem:[#allocation85_spill] sm:$0xff] }
 0x293   : > { %v1556_v62 = vadd.f32 %v5207_v53, %v1329_v23  ;;  %v1330_v50 = vadd.f32 %v3762_v14, %v1263_v11  ;;  %v2003_v51 = vadd.f32 %v5208_v21, %v1775_v33  ;;  %v994_v17 = vmul.f32 2.0, %v4490_v29  ;;  %v914_v20 = vpop.f32.mrf.mxu1 }
 0x294   : > { %v1183_v39 = vadd.f32 %v1182_v13, %v1120_v38  ;;  %v995_v22 = vmul.f32 2.0, %v898_v4  ;;  %v996_v37 = vmul.f32 2.0, %v900_v30  ;;  %v1778_v9 = vadd.f32 %v5209_v6, %v1550_v49  ;;  %v5213_v30 = vld [vmem:[#allocation89_spill] sm:$0xff]  ;;  %v5215_v13 = vld [vmem:[#allocation84_spill] sm:$0xff] }
 0x295   : > { %v4541_v60 = vadd.f32 %v5210_v19, %v1330_v50  ;;  %v2051_v46 = vpack.c.bf16 %v2003_v51, %v2001_v3  ;;  %v2890_v16 = vadd.f32 -1.0, %v994_v17  ;;  %v1780_v45 = vadd.f32 %v5211_v61, %v1552_v57  ;;  %v4544_v63 = vpop.f32.mrf.mxu1  ;;  %v5217_v51 = vld [vmem:[#allocation88_spill] sm:$0xff] }
 0x296   : > { %v1184_v8 = vadd.f32 %v1183_v39, %v1121_v34  ;;  %v2891_v42 = vadd.f32 -1.0, %v995_v22  ;;  %v2892_v58 = vadd.f32 -1.0, %v996_v37  ;;  %v2006_v29 = vadd.f32 %v5212_v25, %v1778_v9  ;;  %v5218_v39 = vld [vmem:[#allocation91_spill] sm:$0xff]  ;;  %v5219_v37 = vld [vmem:[#allocation86_spill] sm:$0xff] }
 0x297   : > { %2286 = vmatmul.mubr.bf16.gmra.mxu0 %v2051_v46  ;;  %v1122_v38 = vmul.f32 %v2890_v16, %v2890_v16  ;;  %v1264_v4 = vmul.f32 %v2890_v16, %v3758_v10  ;;  %v2008_v49 = vadd.f32 %v5213_v30, %v1780_v45  ;;  %v997_v43 = vmul.f32 2.0, %v904_v7  ;;  %v4549_v59 = vpop.f32.mrf.mxu1  ;;  %v5214_v7 = vld [vmem:[#allocation80_spill] sm:$0xff]  ;;  %v5220_v9 = vld [vmem:[#allocation90_spill] sm:$0xff] }
 0x298   : > { %v1123_v54 = vmul.f32 %v2891_v42, %v2891_v42  ;;  %v1265_v27 = vmul.f32 %v2891_v42, %v3758_v10  ;;  %v1124_v57 = vmul.f32 %v2892_v58, %v2892_v58  ;;  %v1266_v1 = vmul.f32 %v2892_v58, %v3758_v10  ;;  %v5221_v42 = vld [vmem:[#allocation93_spill] sm:$0xff]  ;;  %v5222_v25 = vld [vmem:[#allocation98_spill] sm:$0xff] }
 0x299   : > { %v1185_v5 = vadd.f32 %v1184_v8, %v1122_v38  ;;  %v1331_v35 = vadd.f32 %v3762_v14, %v1264_v4  ;;  %v2054_v23 = vpack.c.bf16 %v2008_v49, %v2006_v29  ;;  %v2893_v34 = vadd.f32 -1.0, %v997_v43  ;;  %v920_v11 = vpop.f32.mrf.mxu1  ;;  %v5223_v4 = vld [vmem:[#allocation92_spill] sm:$0xff] }
 0x29a   : > { %v1332_v48 = vadd.f32 %v3762_v14, %v1265_v27  ;;  %v1333_v33 = vadd.f32 %v3762_v14, %v1266_v1  ;;  %v1777_v40 = vadd.f32 %v5214_v7, %v4482_v52  ;;  %v1779_v44 = vadd.f32 %v5215_v13, %v4502_v2  ;;  %v5224_v27 = vld [vmem:[#allocation95_spill] sm:$0xff] }
 0x29b   : > { %v1558_v3 = vadd.f32 %v5216_v36, %v1331_v35  ;;  %v1186_v53 = vadd.f32 %v1185_v5, %v1123_v54  ;;  %2293 = vmatprep.mubr.bf16.mxu0 %v2054_v23  ;;  %v1125_v50 = vmul.f32 %v2893_v34, %v2893_v34  ;;  %v1267_v21 = vmul.f32 %v2893_v34, %v3758_v10  ;;  %v924_v61 = vpop.f32.mrf.mxu1 }
 0x29c   : > { %v4563_v17 = vadd.f32 %v5217_v51, %v1332_v48  ;;  %v1560_v22 = vadd.f32 %v5218_v39, %v1333_v33  ;;  %v2005_v6 = vadd.f32 %v5219_v37, %v1777_v40  ;;  %v2007_v19 = vadd.f32 %v5220_v9, %v1779_v44 }
 0x29d   : > { %v1187_v52 = vadd.f32 %v1186_v53, %v1124_v57  ;;  %v1334_v46 = vadd.f32 %v3762_v14, %v1267_v21  ;;  %v998_v2 = vmul.f32 2.0, %v4515_v18  ;;  %v999_v16 = vmul.f32 2.0, %v4520_v47  ;;  %v5226_v53 = vld [vmem:[#allocation99_spill] sm:$0xff]  ;;  %v5227_v21 = vld [vmem:[#allocation97_spill] sm:$0xff] }
 0x29e   : > { %v2053_v45 = vpack.c.bf16 %v2007_v19, %v2005_v6  ;;  %v1000_v8 = vmul.f32 2.0, %v910_v56  ;;  %v1782_v58 = vadd.f32 %v5221_v42, %v1554_v28  ;;  %v1784_v29 = vadd.f32 %v5222_v25, %v1556_v62  ;;  %v4580_v62 = vpop.f32.mrf.mxu1  ;;  %v5228_v6 = vld [vmem:[#allocation96_spill] sm:$0xff]  ;;  %v5230_v42 = vld [vmem:[#allocation102_spill] sm:$0xff]  ;;  %v5231_v25 = vld [vmem:[#allocation101_spill] sm:$0xff] }
 0x29f   : > { %v1188_v38 = vadd.f32 %v1187_v52, %v1125_v50  ;;  %v4574_v30 = vadd.f32 %v5223_v4, %v1334_v46  ;;  %v2894_v49 = vadd.f32 -1.0, %v998_v2  ;;  %v2895_v43 = vadd.f32 -1.0, %v999_v16  ;;  %v5229_v46 = vld [vmem:[#allocation100_spill] sm:$0xff]  ;;  %v5232_v4 = vld [vmem:[#allocation109_spill] sm:$0xff] }
 0x2a0   : > { %2294 = vmatmul.mubr.bf16.gmra.mxu0 %v2053_v45  ;;  %v2896_v54 = vadd.f32 -1.0, %v1000_v8  ;;  %v2010_v57 = vadd.f32 %v5224_v27, %v1782_v58  ;;  %v2012_v18 = vadd.f32 %v4206_v41, %v1784_v29  ;;  %v1001_v47 = vmul.f32 2.0, %v914_v20  ;;  %v5225_v41 = vld [vmem:[#allocation94_spill] sm:$0xff]  ;;  %v928_v19 = vpop.f32.mrf.mxu1  ;;  %v5233_v27 = vld [vmem:[#allocation105_spill] sm:$0xff] }
 0x2a1   : > { %v1126_v1 = vmul.f32 %v2894_v49, %v2894_v49  ;;  %v1268_v56 = vmul.f32 %v2894_v49, %v3758_v10  ;;  %v1127_v5 = vmul.f32 %v2895_v43, %v2895_v43  ;;  %v1269_v28 = vmul.f32 %v2895_v43, %v3758_v10 }
 0x2a2   : > { %v1128_v35 = vmul.f32 %v2896_v54, %v2896_v54  ;;  %v1270_v23 = vmul.f32 %v2896_v54, %v3758_v10  ;;  %v2056_v34 = vpack.c.bf16 %v2012_v18, %v2010_v57  ;;  %v2897_v48 = vadd.f32 -1.0, %v1001_v47  ;;  %v930_v18 = vpop.f32.mrf.mxu1 }
 0x2a3   : > { %v1189_v33 = vadd.f32 %v1188_v38, %v1126_v1  ;;  %v1335_v7 = vadd.f32 %v3762_v14, %v1268_v56  ;;  %v1336_v40 = vadd.f32 %v3762_v14, %v1269_v28  ;;  %v1781_v20 = vadd.f32 %v5225_v41, %v4511_v12 }
 0x2a4   : > { %v1337_v13 = vadd.f32 %v3762_v14, %v1270_v23  ;;  %2301 = vmatprep.mubr.bf16.mxu0 %v2056_v34  ;;  %v1129_v44 = vmul.f32 %v2897_v48, %v2897_v48  ;;  %v1271_v36 = vmul.f32 %v2897_v48, %v3758_v10  ;;  %v1783_v50 = vadd.f32 %v5226_v53, %v4532_v24 }
 0x2a5   : > { %v1562_v51 = vadd.f32 %v5227_v21, %v1335_v7  ;;  %v1190_v39 = vadd.f32 %v1189_v33, %v1127_v5  ;;  %v4593_v37 = vadd.f32 %v4203_v55, %v1336_v40  ;;  %v2009_v9 = vadd.f32 %v5228_v6, %v1781_v20  ;;  %v5235_v7 = vld [vmem:[#allocation103_spill] sm:$0xff]  ;;  %v934_v20 = vpop.f32.mrf.mxu1  ;;  %v5238_v21 = vld [vmem:[#allocation108_spill] sm:$0xff]  ;;  %v5239_v6 = vld [vmem:[#allocation110_spill] sm:$0xff] }
 0x2a6   : > { %v1564_v12 = vadd.f32 %v4209_v15, %v1337_v13  ;;  %v1338_v52 = vadd.f32 %v3762_v14, %v1271_v36  ;;  %v2011_v2 = vadd.f32 %v5229_v46, %v1783_v50  ;;  %v1002_v16 = vmul.f32 2.0, %v4544_v63  ;;  %v5237_v13 = vld [vmem:[#allocation104_spill] sm:$0xff] }
 0x2a7   : > { %v1191_v45 = vadd.f32 %v1190_v39, %v1128_v35  ;;  %v1003_v24 = vmul.f32 2.0, %v4549_v59  ;;  %v1004_v8 = vmul.f32 2.0, %v920_v11  ;;  %v1786_v58 = vadd.f32 %v5230_v42, %v1558_v3  ;;  %v5234_v11 = vld [vmem:[#allocation111_spill] sm:$0xff]  ;;  %v5241_v46 = vld [vmem:[#allocation112_spill] sm:$0xff] }
 0x2a8   : > { %v4603_v55 = vadd.f32 %v5231_v25, %v1338_v52  ;;  %v2055_v29 = vpack.c.bf16 %v2011_v2, %v2009_v9  ;;  %v2898_v38 = vadd.f32 -1.0, %v1002_v16  ;;  %v1788_v49 = vadd.f32 %v5232_v4, %v1560_v22  ;;  %v5240_v52 = vld [vmem:[#allocation107_spill] sm:$0xff]  ;;  %v936_v4 = vpop.f32.mrf.mxu1 }
 0x2a9   : > { %v1192_v15 = vadd.f32 %v1191_v45, %v1129_v44  ;;  %v2899_v43 = vadd.f32 -1.0, %v1003_v24  ;;  %v2900_v54 = vadd.f32 -1.0, %v1004_v8  ;;  %v2014_v57 = vadd.f32 %v5233_v27, %v1786_v58  ;;  %v5242_v58 = vld [vmem:[#allocation116_spill] sm:$0xff] }
 0x2aa   : > { %2302 = vmatmul.mubr.bf16.gmra.mxu0 %v2055_v29  ;;  %v1130_v63 = vmul.f32 %v2898_v38, %v2898_v38  ;;  %v1272_v59 = vmul.f32 %v2898_v38, %v3758_v10  ;;  %v2016_v47 = vadd.f32 %v5234_v11, %v1788_v49  ;;  %v1005_v3 = vmul.f32 2.0, %v924_v61  ;;  %v5236_v61 = vld [vmem:[#allocation106_spill] sm:$0xff]  ;;  %v5243_v29 = vld [vmem:[#allocation120_spill] sm:$0xff]  ;;  %v1384_v11 = vld [vmem:[%s3742_s4 + $0xe0] sm:$0xff] }
 0x2ab   : > { %v1131_v1 = vmul.f32 %v2899_v43, %v2899_v43  ;;  %v1273_v56 = vmul.f32 %v2899_v43, %v3758_v10  ;;  %v1132_v5 = vmul.f32 %v2900_v54, %v2900_v54  ;;  %v1274_v28 = vmul.f32 %v2900_v54, %v3758_v10 }
 0x2ac   : > { %v1193_v22 = vadd.f32 %v1192_v15, %v1130_v63  ;;  %v1339_v35 = vadd.f32 %v3762_v14, %v1272_v59  ;;  %v2058_v23 = vpack.c.bf16 %v2016_v47, %v2014_v57  ;;  %v2901_v34 = vadd.f32 -1.0, %v1005_v3  ;;  %v5244_v15 = vld [vmem:[#allocation114_spill] sm:$0xff]  ;;  %v5245_v63 = vld [vmem:[#allocation117_spill] sm:$0xff] }
 0x2ad   : > { %v1340_v48 = vadd.f32 %v3762_v14, %v1273_v56  ;;  %v1341_v33 = vadd.f32 %v3762_v14, %v1274_v28  ;;  %v1785_v40 = vadd.f32 %v5235_v7, %v4541_v60  ;;  %v1787_v41 = vadd.f32 %v5236_v61, %v4563_v17  ;;  %v938_v28 = vpop.f32.mrf.mxu1  ;;  %v5246_v7 = vld [vmem:[#allocation115_spill] sm:$0xff] }
 0x2ae   : > { %v4619_v44 = vadd.f32 %v5237_v13, %v1339_v35  ;;  %v1194_v36 = vadd.f32 %v1193_v22, %v1131_v1  ;;  %2309 = vmatprep.mubr.bf16.mxu0 %v2058_v23  ;;  %v1133_v53 = vmul.f32 %v2901_v34, %v2901_v34  ;;  %v1275_v50 = vmul.f32 %v2901_v34, %v3758_v10  ;;  %v5247_v61 = vld [vmem:[#allocation119_spill] sm:$0xff] }
 0x2af   : > { %v4623_v39 = vadd.f32 %v5238_v21, %v1340_v48  ;;  %v4626_v9 = vadd.f32 %v5239_v6, %v1341_v33  ;;  %v2013_v60 = vadd.f32 %v5240_v52, %v1785_v40  ;;  %v2015_v2 = vadd.f32 %v5241_v46, %v1787_v41  ;;  %v5248_v6 = vld [vmem:[#allocation118_spill] sm:$0xff]  ;;  %v940_v46 = vpop.f32.mrf.mxu1 }
 0x2b0   : > { %v1195_v17 = vadd.f32 %v1194_v36, %v1132_v5  ;;  %v1342_v16 = vadd.f32 %v3762_v14, %v1275_v50  ;;  %v1006_v45 = vmul.f32 2.0, %v4580_v62  ;;  %v1007_v24 = vmul.f32 2.0, %v928_v19 }
 0x2b1   : > { %v2057_v8 = vpack.c.bf16 %v2015_v2, %v2013_v60  ;;  %v1008_v42 = vmul.f32 2.0, %v930_v18  ;;  %v1790_v25 = vadd.f32 %v5242_v58, %v1562_v51  ;;  %v1792_v38 = vadd.f32 %v5243_v29, %v1564_v12  ;;  %v3331_v60 = vld [vmem:[%s3742_s4 + $0x2b8] sm:$0xff] }
 0x2b2   : > { %v1196_v49 = vadd.f32 %v1195_v17, %v1133_v53  ;;  %v4635_v43 = vadd.f32 %v5244_v15, %v1342_v16  ;;  %v2902_v54 = vadd.f32 -1.0, %v1006_v45  ;;  %v2903_v27 = vadd.f32 -1.0, %v1007_v24  ;;  %v1385_v53 = vld [vmem:[%s3742_s4 + $0xe8] sm:$0xff]  ;;  %v5249_v17 = vld [vmem:[#allocation113_spill] sm:$0xff] }
 0x2b3   : > { %2310 = vmatmul.mubr.bf16.gmra.mxu0 %v2057_v8  ;;  %v2904_v57 = vadd.f32 -1.0, %v1008_v42  ;;  %v2018_v59 = vadd.f32 %v5245_v63, %v1790_v25  ;;  %v2020_v62 = vadd.f32 %v4285_v32, %v1792_v38  ;;  %v1009_v19 = vmul.f32 2.0, %v934_v20  ;;  %v5251_v45 = vld [vmem:[#allocation10_spill] sm:$0xff]  ;;  %v2938_v63 = vld [vmem:[%s3742_s4 + $0x1c0] sm:$0xff] }
 0x2b4   : > { %v1134_v18 = vmul.f32 %v2902_v54, %v2902_v54  ;;  %v1276_v51 = vmul.f32 %v2902_v54, %v3758_v10  ;;  %v1135_v47 = vmul.f32 %v2903_v27, %v2903_v27  ;;  %v1277_v12 = vmul.f32 %v2903_v27, %v3758_v10 }
 0x2b5   : > { %v1136_v3 = vmul.f32 %v2904_v57, %v2904_v57  ;;  %v1278_v1 = vmul.f32 %v2904_v57, %v3758_v10  ;;  %v2060_v56 = vpack.c.bf16 %v2020_v62, %v2018_v59  ;;  %v2905_v5 = vadd.f32 -1.0, %v1009_v19 }
 0x2b6   : > { %v1197_v22 = vadd.f32 %v1196_v49, %v1134_v18  ;;  %v1343_v35 = vadd.f32 %v3762_v14, %v1276_v51  ;;  %v1344_v32 = vadd.f32 %v3762_v14, %v1277_v12  ;;  %v1444_v23 = vunpack.c.l.bf16 %v1384_v11 }
 0x2b7   : > { %v1345_v34 = vadd.f32 %v3762_v14, %v1278_v1  ;;  %2317 = vmatprep.mubr.bf16.mxu0 %v2060_v56  ;;  %v1137_v48 = vmul.f32 %v2905_v5, %v2905_v5  ;;  %v1279_v33 = vmul.f32 %v2905_v5, %v3758_v10  ;;  %v1789_v40 = vadd.f32 %v5246_v7, %v4574_v30 }
 0x2b8   : > { %v4650_v41 = vadd.f32 %v5247_v61, %v1343_v35  ;;  %v1198_v20 = vadd.f32 %v1197_v22, %v1135_v47  ;;  %v4653_v13 = vadd.f32 %v4282_v31, %v1344_v32  ;;  %v1509_v36 = vmul.f32 %v3753_v0, %v1444_v23  ;;  %v5252_v23 = vld [vmem:[#allocation9_spill] sm:$0xff] }
 0x2b9   : > { %v4658_v50 = vadd.f32 %v4291_v26, %v1345_v34  ;;  %v1346_v21 = vadd.f32 %v3762_v14, %v1279_v33  ;;  %v1791_v52 = vadd.f32 %v5248_v6, %v4593_v37  ;;  %v1890_v30 = vunpack.c.l.bf16 %v3331_v60 }
 0x2ba   : > { %v1199_v2 = vadd.f32 %v1198_v20, %v1136_v3  ;;  %v5250_v16 = vunpack.c.l.bf16 %v5249_v17  ;;  %v1010_v24 = vmul.f32 2.0, %v936_v4  ;;  %v1445_v8 = vunpack.c.h.bf16 %v1384_v11  ;;  %v944_v4 = vpop.f32.mrf.mxu1  ;;  %v2939_v3 = vld [vmem:[%s3742_s4 + $0x1c8] sm:$0xff] }
 0x2bb   : > { %v4667_v42 = vadd.f32 %v1509_v36, %v1346_v21  ;;  %v1955_v26 = vmul.f32 %v5251_v45, %v1890_v30  ;;  %v1011_v58 = vmul.f32 2.0, %v938_v28  ;;  %v1446_v25 = vunpack.c.l.bf16 %v1385_v53  ;;  %v2971_v20 = vld [vmem:[%s3742_s4 + $0x2c8] sm:$0xff] }
 0x2bc   : > { %v1953_v31 = vmul.f32 %v5251_v45, %v5250_v16  ;;  %v1200_v29 = vadd.f32 %v1199_v2, %v1137_v48  ;;  %v2906_v37 = vadd.f32 -1.0, %v1010_v24  ;;  %v1510_v49 = vmul.f32 %v3753_v0, %v1445_v8  ;;  %v2970_v48 = vld [vmem:[%s3742_s4 + $0x2c0] sm:$0xff]  ;;  %v946_v33 = vpop.f32.mrf.mxu1 }
 0x2bd   : > { %v2019_v15 = vadd.f32 %v1955_v26, %v1791_v52  ;;  %v2907_v54 = vadd.f32 -1.0, %v1011_v58  ;;  %v1511_v27 = vmul.f32 %v3753_v0, %v1446_v25  ;;  %v1012_v57 = vmul.f32 2.0, %v940_v46 }
 0x2be   : > { %v2017_v38 = vadd.f32 %v1953_v31, %v1789_v40  ;;  %v1138_v59 = vmul.f32 %v2906_v37, %v2906_v37  ;;  %v1280_v62 = vmul.f32 %v2906_v37, %v3758_v10  ;;  %v1447_v19 = vunpack.c.h.bf16 %v1385_v53  ;;  %v1386_v53 = vld [vmem:[%s3742_s4 + $0xf0] sm:$0xff]  ;;  %v948_v26 = vpop.f32.mrf.mxu1 }
 0x2bf   : > { %v1665_v11 = vunpack.c.h.bf16 %v2938_v63  ;;  %v1139_v51 = vmul.f32 %v2907_v54, %v2907_v54  ;;  %v1281_v47 = vmul.f32 %v2907_v54, %v3758_v10  ;;  %v2908_v12 = vadd.f32 -1.0, %v1012_v57 }
 0x2c0   : > { %v2059_v18 = vpack.c.bf16 %v2019_v15, %v2017_v38  ;;  %v1201_v1 = vadd.f32 %v1200_v29, %v1138_v59  ;;  %v1347_v56 = vadd.f32 %v3762_v14, %v1280_v62  ;;  %v1512_v5 = vmul.f32 %v3753_v0, %v1447_v19 }
 0x2c1   : > { %v1667_v28 = vunpack.c.h.bf16 %v2939_v3  ;;  %v1348_v22 = vadd.f32 %v3762_v14, %v1281_v47  ;;  %v1140_v35 = vmul.f32 %v2908_v12, %v2908_v12  ;;  %v1282_v32 = vmul.f32 %v2908_v12, %v3758_v10 }
 0x2c2   : > { %2318 = vmatmul.mubr.bf16.gmra.mxu0 %v2059_v18  ;;  %v1730_v34 = vmul.f32 %v5252_v23, %v1665_v11  ;;  %v4682_v7 = vadd.f32 %v1510_v49, %v1347_v56  ;;  %v1202_v40 = vadd.f32 %v1201_v1, %v1139_v51  ;;  %v1893_v36 = vunpack.c.h.bf16 %v2970_v48  ;;  %v950_v11 = vpop.f32.mrf.mxu1 }
 0x2c3   : > { %v1732_v61 = vmul.f32 %v5252_v23, %v1667_v28  ;;  %v4687_v21 = vadd.f32 %v1511_v27, %v1348_v22  ;;  %v1349_v6 = vadd.f32 %v3762_v14, %v1282_v32  ;;  %v1895_v60 = vunpack.c.h.bf16 %v2971_v20 }
 0x2c4   : > { %v1794_v52 = vadd.f32 %v1730_v34, %v4619_v44  ;;  %v1203_v30 = vadd.f32 %v1202_v40, %v1140_v35  ;;  %v1958_v2 = vmul.f32 %v5251_v45, %v1893_v36  ;;  %v1013_v17 = vmul.f32 2.0, %v944_v4  ;;  %v1387_v4 = vld [vmem:[%s3742_s4 + $0xf8] sm:$0xff] }
 0x2c5   : > { %v1796_v46 = vadd.f32 %v1732_v61, %v4626_v9  ;;  %v4693_v16 = vadd.f32 %v1512_v5, %v1349_v6  ;;  %v1960_v31 = vmul.f32 %v5251_v45, %v1895_v60  ;;  %v1448_v24 = vunpack.c.l.bf16 %v1386_v53  ;;  %v2941_v36 = vld [vmem:[%s3742_s4 + $0x1d8] sm:$0xff] }
 0x2c6   : > { %v1664_v8 = vunpack.c.l.bf16 %v2938_v63  ;;  %v2022_v58 = vadd.f32 %v1958_v2, %v1794_v52  ;;  %v2909_v25 = vadd.f32 -1.0, %v1013_v17  ;;  %v1666_v29 = vunpack.c.l.bf16 %v2939_v3 }
 0x2c7   : > { %v1892_v38 = vunpack.c.l.bf16 %v2970_v48  ;;  %v2024_v44 = vadd.f32 %v1960_v31, %v1796_v46  ;;  %v1513_v37 = vmul.f32 %v3753_v0, %v1448_v24  ;;  %v1894_v49 = vunpack.c.l.bf16 %v2971_v20  ;;  %v2972_v46 = vld [vmem:[%s3742_s4 + $0x2d0] sm:$0xff]  ;;  %v2973_v24 = vld [vmem:[%s3742_s4 + $0x2d8] sm:$0xff] }
 0x2c8   : > { %v1729_v9 = vmul.f32 %v5252_v23, %v1664_v8  ;;  %v1141_v15 = vmul.f32 %v2909_v25, %v2909_v25  ;;  %v1283_v54 = vmul.f32 %v2909_v25, %v3758_v10  ;;  %v1731_v27 = vmul.f32 %v5252_v23, %v1666_v29 }
 0x2c9   : > { %v1957_v57 = vmul.f32 %v5251_v45, %v1892_v38  ;;  %v2062_v63 = vpack.c.bf16 %v2024_v44, %v2022_v58  ;;  %v1959_v62 = vmul.f32 %v5251_v45, %v1894_v49  ;;  %v1014_v19 = vmul.f32 2.0, %v946_v33  ;;  %v2940_v33 = vld [vmem:[%s3742_s4 + $0x1d0] sm:$0xff] }
 0x2ca   : > { %v1793_v59 = vadd.f32 %v1729_v9, %v4603_v55  ;;  %v4704_v18 = vadd.f32 %v1203_v30, %v1141_v15  ;;  %v1350_v51 = vadd.f32 %v3762_v14, %v1283_v54  ;;  %v1795_v47 = vadd.f32 %v1731_v27, %v4623_v39 }
 0x2cb   : > { %v1449_v12 = vunpack.c.h.bf16 %v1386_v53  ;;  %2325 = vmatprep.mubr.bf16.mxu0 %v2062_v63  ;;  %v2910_v1 = vadd.f32 -1.0, %v1014_v19  ;;  %v1015_v56 = vmul.f32 2.0, %v948_v26  ;;  %v1450_v5 = vunpack.c.l.bf16 %v1387_v4 }
 0x2cc   : > { %v2021_v3 = vadd.f32 %v1957_v57, %v1793_v59  ;;  %v4708_v28 = vadd.f32 %v1513_v37, %v1350_v51  ;;  %v2023_v55 = vadd.f32 %v1959_v62, %v1795_v47  ;;  %v1016_v35 = vmul.f32 2.0, %v950_v11  ;;  %v2943_v62 = vld [vmem:[%s3742_s4 + $0x1e8] sm:$0xff]  ;;  %v2974_v11 = vld [vmem:[%s3742_s4 + $0x2e0] sm:$0xff] }
 0x2cd   : > { %v1514_v22 = vmul.f32 %v3753_v0, %v1449_v12  ;;  %v1142_v32 = vmul.f32 %v2910_v1, %v2910_v1  ;;  %v1284_v34 = vmul.f32 %v2910_v1, %v3758_v10  ;;  %v2911_v48 = vadd.f32 -1.0, %v1015_v56 }
 0x2ce   : > { %v1515_v39 = vmul.f32 %v3753_v0, %v1450_v5  ;;  %v2061_v40 = vpack.c.bf16 %v2023_v55, %v2021_v3  ;;  %v2912_v61 = vadd.f32 -1.0, %v1016_v35  ;;  %v1451_v20 = vunpack.c.h.bf16 %v1387_v4  ;;  %v2942_v4 = vld [vmem:[%s3742_s4 + $0x1e0] sm:$0xff]  ;;  %v2975_v55 = vld [vmem:[%s3742_s4 + $0x2e8] sm:$0xff] }
 0x2cf   : > { %v1669_v53 = vunpack.c.h.bf16 %v2940_v33  ;;  %v1351_v6 = vadd.f32 %v3762_v14, %v1284_v34  ;;  %v1143_v52 = vmul.f32 %v2911_v48, %v2911_v48  ;;  %v1285_v60 = vmul.f32 %v2911_v48, %v3758_v10 }
 0x2d0   : > { %v1671_v30 = vunpack.c.h.bf16 %v2941_v36  ;;  %2326 = vmatmul.mubr.bf16.gmra.mxu0 %v2061_v40  ;;  %v1286_v2 = vmul.f32 %v2912_v61, %v3758_v10  ;;  %v1516_v17 = vmul.f32 %v3753_v0, %v1451_v20  ;;  %v1897_v8 = vunpack.c.h.bf16 %v2972_v46 }
 0x2d1   : > { %v1734_v31 = vmul.f32 %v5252_v23, %v1669_v53  ;;  %v4722_v26 = vadd.f32 %v1514_v22, %v1351_v6  ;;  %v1352_v58 = vadd.f32 %v3762_v14, %v1285_v60  ;;  %v1899_v29 = vunpack.c.h.bf16 %v2973_v24 }
 0x2d2   : > { %v1736_v25 = vmul.f32 %v5252_v23, %v1671_v30  ;;  %v1353_v38 = vadd.f32 %v3762_v14, %v1286_v2  ;;  %v1962_v10 = vmul.f32 %v5251_v45, %v1897_v8  ;;  %v1668_v0 = vunpack.c.l.bf16 %v2940_v33 }
 0x2d3   : > { %v1798_v44 = vadd.f32 %v1734_v31, %v4650_v41  ;;  %v4729_v37 = vadd.f32 %v1515_v39, %v1352_v58  ;;  %v1964_v49 = vmul.f32 %v5251_v45, %v1899_v29  ;;  %v1670_v15 = vunpack.c.l.bf16 %v2941_v36  ;;  %v2944_v31 = vld [vmem:[%s3742_s4 + $0x1f0] sm:$0xff] }
 0x2d4   : > { %v1800_v9 = vadd.f32 %v1736_v25, %v4658_v50  ;;  %v4733_v54 = vadd.f32 %v1516_v17, %v1353_v38  ;;  %v1733_v57 = vmul.f32 %v5252_v23, %v1668_v0  ;;  %v1896_v14 = vunpack.c.l.bf16 %v2972_v46  ;;  %v2976_v38 = vld [vmem:[%s3742_s4 + $0x2f0] sm:$0xff] }
 0x2d5   : > { %v2026_v27 = vadd.f32 %v1962_v10, %v1798_v44  ;;  %v1735_v63 = vmul.f32 %v5252_v23, %v1670_v15  ;;  %v1898_v59 = vunpack.c.l.bf16 %v2973_v24  ;;  %v1673_v19 = vunpack.c.h.bf16 %v2942_v4  ;;  %v2977_v44 = vld [vmem:[%s3742_s4 + $0x2f8] sm:$0xff] }
 0x2d6   : > { %v2028_v41 = vadd.f32 %v1964_v49, %v1800_v9  ;;  %v1797_v50 = vadd.f32 %v1733_v57, %v4635_v43  ;;  %v1961_v51 = vmul.f32 %v5251_v45, %v1896_v14  ;;  %v1675_v47 = vunpack.c.h.bf16 %v2943_v62 }
 0x2d7   : > { %v1901_v12 = vunpack.c.h.bf16 %v2974_v11  ;;  %v1799_v1 = vadd.f32 %v1735_v63, %v4653_v13  ;;  %v1963_v56 = vmul.f32 %v5251_v45, %v1898_v59  ;;  %v1738_v5 = vmul.f32 %v5252_v23, %v1673_v19 }
 0x2d8   : > { %v2064_v3 = vpack.c.bf16 %v2028_v41, %v2026_v27  ;;  %v2025_v22 = vadd.f32 %v1961_v51, %v1797_v50  ;;  %v1740_v35 = vmul.f32 %v5252_v23, %v1675_v47  ;;  %v1903_v34 = vunpack.c.h.bf16 %v2975_v55 }
 0x2d9   : > { %v1966_v48 = vmul.f32 %v5251_v45, %v1901_v12  ;;  %v2027_v43 = vadd.f32 %v1963_v56, %v1799_v1  ;;  %v1802_v39 = vadd.f32 %v1738_v5, %v4682_v7  ;;  %v1144_v33 = vmul.f32 %v2912_v61, %v2912_v61 }
 0x2da   : > { %2333 = vmatprep.mubr.bf16.mxu0 %v2064_v3  ;;  %v1205_v13 = vadd.f32 %v4704_v18, %v1142_v32  ;;  %v1804_v40 = vadd.f32 %v1740_v35, %v4693_v16  ;;  %v1968_v20 = vmul.f32 %v5251_v45, %v1903_v34  ;;  %v1672_v36 = vunpack.c.l.bf16 %v2942_v4  ;;  %v2945_v18 = vld [vmem:[%s3742_s4 + $0x1f8] sm:$0xff]  ;;  %s3353_s4 = scalar_lea.vmem %s3352_s1, 4096 }
 0x2db   : > { %v1674_v53 = vunpack.c.l.bf16 %v2943_v62  ;;  %v2063_v6 = vpack.c.bf16 %v2027_v43, %v2025_v22  ;;  %v2030_v60 = vadd.f32 %v1966_v48, %v1802_v39  ;;  %v1900_v46 = vunpack.c.l.bf16 %v2974_v11  ;;  %p3355_p0 = scmp.lt.s32.totalorder %s3353_s4, %s3347_s25 }
 0x2dc   : > { %v1206_v30 = vadd.f32 %v1205_v13, %v1143_v52  ;;  %v2032_v2 = vadd.f32 %v1968_v20, %v1804_v40  ;;  %v1737_v17 = vmul.f32 %v5252_v23, %v1672_v36  ;;  %v1902_v61 = vunpack.c.l.bf16 %v2975_v55 }
 0x2dd   : > { %v1739_v7 = vmul.f32 %v5252_v23, %v1674_v53  ;;  %2334 = vmatmul.mubr.bf16.gmra.mxu0 %v2063_v6  ;;  %v1965_v32 = vmul.f32 %v5251_v45, %v1900_v46  ;;  %v1677_v24 = vunpack.c.h.bf16 %v2944_v31  ;;  %v1679_v8 = vunpack.c.h.bf16 %v2945_v18  ;;  %p3356_p1 = por %p3355_p0, %p3354_p13 }
 0x2de   : > { %v1207_v16 = vadd.f32 %v1206_v30, %v1144_v33  ;;  %v2066_v58 = vpack.c.bf16 %v2032_v2, %v2030_v60  ;;  %v1801_v52 = vadd.f32 %v1737_v17, %v4667_v42  ;;  %v1967_v29 = vmul.f32 %v5251_v45, %v1902_v61 }
 0x2df   : > { %v1803_v25 = vadd.f32 %v1739_v7, %v4687_v21  ;;  %v1742_v10 = vmul.f32 %v5252_v23, %v1677_v24  ;;  %v1744_v0 = vmul.f32 %v5252_v23, %v1679_v8  ;;  %v1905_v9 = vunpack.c.h.bf16 %v2976_v38  ;;  %p3357_p2 = pnand %p3356_p1, %p3350_p12 }
 0x2e0   : > { %1208 = vadd.xlane.f32.xlu0 %v1207_v16  ;;  %v1907_v49 = vunpack.c.h.bf16 %v2977_v44  ;;  %2341 = vmatprep.mubr.bf16.mxu0 %v2066_v58  ;;  %v2029_v15 = vadd.f32 %v1965_v32, %v1801_v52  ;;  %v1676_v57 = vunpack.c.l.bf16 %v2944_v31  ;;  %v1678_v14 = vunpack.c.l.bf16 %v2945_v18 }
 0x2e1   : > { %v2031_v27 = vadd.f32 %v1967_v29, %v1803_v25  ;;  %v1806_v42 = vadd.f32 %v1742_v10, %v4722_v26  ;;  %v1808_v21 = vadd.f32 %v1744_v0, %v4733_v54  ;;  %v1970_v4 = vmul.f32 %v5251_v45, %v1905_v9 }
 0x2e2   : > { %v1972_v41 = vmul.f32 %v5251_v45, %v1907_v49  ;;  %v1741_v63 = vmul.f32 %v5252_v23, %v1676_v57  ;;  %v1743_v59 = vmul.f32 %v5252_v23, %v1678_v14  ;;  %v1904_v62 = vunpack.c.l.bf16 %v2976_v38 }
 0x2e3   : > { %v2065_v19 = vpack.c.bf16 %v2031_v27, %v2029_v15  ;;  %v2034_v11 = vadd.f32 %v1970_v4, %v1806_v42  ;;  %v1906_v51 = vunpack.c.l.bf16 %v2977_v44 }
 0x2e4   : > { %v2036_v50 = vadd.f32 %v1972_v41, %v1808_v21  ;;  %v1807_v47 = vadd.f32 %v1743_v59, %v4729_v37  ;;  %v1805_v26 = vadd.f32 %v1741_v63, %v4708_v28  ;;  %v1969_v54 = vmul.f32 %v5251_v45, %v1904_v62  ;;  %v3309_v41 = vld [vmem:[%s5006_s5 + $0x4] ss:$8 sps:$4 sm:$0xff]  }
 0x2e5   : > { %2342 = vmatmul.mubr.bf16.gmra.mxu0 %v2065_v19  ;;  %v1971_v3 = vmul.f32 %v5251_v45, %v1906_v51  ;;  %2502 = vmatprep.mubr.bf16.mxu1 %v3309_v41 }
 0x2e6   : > { %v2068_v12 = vpack.c.bf16 %v2036_v50, %v2034_v11  ;;  %v2033_v56 = vadd.f32 %v1969_v54, %v1805_v26 }
 0x2e7   : > { %v2035_v1 = vadd.f32 %v1971_v3, %v1807_v47 }
 0x2e8   : > { %2349 = vmatprep.mubr.bf16.mxu0 %v2068_v12 }
 0x2e9   : > { %v2067_v5 = vpack.c.bf16 %v2035_v1, %v2033_v56 }
 0x2ed   : > { %2350 = vmatmul.mubr.bf16.gmra.mxu0 %v2067_v5 }
 0x312   : > { %v3033_v23 = vpop.f32.mrf.mxu0 }
 0x314   : > { %v3034_v55 = vpop.f32.mrf.mxu0 }
 0x315   : > { %v4774_v22 = vadd.f32 %v3034_v55, %v3033_v23 }
 0x316   : > { %v3036_v35 = vpop.f32.mrf.mxu0 }
 0x318   : > { %v3037_v34 = vpop.f32.mrf.mxu0 }
 0x319   : > { %v4776_v37 = vadd.f32 %v3037_v34, %v3036_v35 }
 0x31b   : > { %v2374_v28 = vpack.c.bf16 %v4776_v37, %v4774_v22  ;;  %v3315_v22 = vld [vmem:[%s5006_s5 + $0x20] ss:$8 sps:$4 sm:$0xff]   ;;  %v3316_v37 = vld [vmem:[%s5006_s5 + $0x34] ss:$8 sps:$4 sm:$0xff]  }
 0x31e   : > { %v3039_v48 = vpop.f32.mrf.mxu0 }
 0x320   : > { %v3040_v43 = vpop.f32.mrf.mxu0 }
 0x321   : > { %v4780_v39 = vadd.f32 %v3040_v43, %v3039_v48 }
 0x322   : > { %v3042_v45 = vpop.f32.mrf.mxu0 }
 0x324   : > { %v3043_v33 = vpop.f32.mrf.mxu0 }
 0x325   : > { %v4782_v13 = vadd.f32 %v3043_v33, %v3042_v45 }
 0x327   : > { %v2375_v40 = vpack.c.bf16 %v4782_v13, %v4780_v39  ;;  %v3045_v20 = vpop.f32.mrf.mxu0  ;;  %v3312_v39 = vld [vmem:[%s5006_s5 + $0x10] ss:$8 sps:$4 sm:$0xff]   ;;  %v3313_v13 = vld [vmem:[%s5006_s5 + $0x24] ss:$8 sps:$4 sm:$0xff]  }
 0x329   : > { %v3046_v36 = vpop.f32.mrf.mxu0 }
 0x32a   : > { %v4786_v53 = vadd.f32 %v3046_v36, %v3045_v20 }
 0x32b   : > { %v3048_v6 = vpop.f32.mrf.mxu0 }
 0x32d   : > { %v3049_v60 = vpop.f32.mrf.mxu0 }
 0x32e   : > { %v4788_v30 = vadd.f32 %v3049_v60, %v3048_v6 }
 0x330   : > { %v2376_v46 = vpack.c.bf16 %v4788_v30, %v4786_v53  ;;  %v3310_v53 = vld [vmem:[%s5006_s5 + $0x14] ss:$8 sps:$4 sm:$0xff]   ;;  %v3321_v30 = vld [vmem:[%s5006_s5 + $0x40] ss:$8 sps:$4 sm:$0xff]  }
 0x331   : > { %v3051_v2 = vpop.f32.mrf.mxu0 }
 0x333   : > { %v3052_v17 = vpop.f32.mrf.mxu0 }
 0x334   : > { %v4792_v7 = vadd.f32 %v3052_v17, %v3051_v2 }
 0x335   : > { %v3054_v61 = vpop.f32.mrf.mxu0 }
 0x337   : > { %v3055_v31 = vpop.f32.mrf.mxu0 }
 0x338   : > { %v4794_v18 = vadd.f32 %v3055_v31, %v3054_v61 }
 0x33a   : > { %v2377_v16 = vpack.c.bf16 %v4794_v18, %v4792_v7  ;;  %v3057_v32 = vpop.f32.mrf.mxu0  ;;  %v3324_v7 = vld [vmem:[%s5006_s5 + $0x50] ss:$8 sps:$4 sm:$0xff]   ;;  %v3325_v18 = vld [vmem:[%s5006_s5 + $0x64] ss:$8 sps:$4 sm:$0xff]  }
 0x33c   : > { %v3058_v24 = vpop.f32.mrf.mxu0 }
 0x33d   : > { %v4798_v8 = vadd.f32 %v3058_v24, %v3057_v32 }
 0x33e   : > { %v3060_v58 = vpop.f32.mrf.mxu0 }
 0x340   : > { %v3061_v52 = vpop.f32.mrf.mxu0 }
 0x341   : > { %v4800_v25 = vadd.f32 %v3061_v52, %v3060_v58 }
 0x343   : > { %v2378_v29 = vpack.c.bf16 %v4800_v25, %v4798_v8  ;;  %v3307_v8 = vld [vmem:[%s5006_s5] ss:$8 sps:$4 sm:$0xff]   ;;  %v3328_v25 = vld [vmem:[%s5006_s5 + $0x74] ss:$8 sps:$4 sm:$0xff]  }
 0x344   : > { %v3063_v38 = vpop.f32.mrf.mxu0 }
 0x346   : > { %v3064_v44 = vpop.f32.mrf.mxu0 }
 0x347   : > { %v4804_v10 = vadd.f32 %v3064_v44, %v3063_v38 }
 0x348   : > { %v3066_v0 = vpop.f32.mrf.mxu0 }
 0x34a   : > { %v3067_v9 = vpop.f32.mrf.mxu0 }
 0x34b   : > { %v4806_v49 = vadd.f32 %v3067_v9, %v3066_v0 }
 0x34d   : > { %v2379_v15 = vpack.c.bf16 %v4806_v49, %v4804_v10  ;;  %v3069_v27 = vpop.f32.mrf.mxu0 }
 0x34f   : > { %v3070_v57 = vpop.f32.mrf.mxu0 }
 0x350   : > { %v4810_v14 = vadd.f32 %v3070_v57, %v3069_v27 }
 0x351   : > { %v3072_v42 = vpop.f32.mrf.mxu0 }
 0x353   : > { %v3073_v21 = vpop.f32.mrf.mxu0 }
 0x354   : > { %v4812_v4 = vadd.f32 %v3073_v21, %v3072_v42 }
 0x356   : > { %v2380_v63 = vpack.c.bf16 %v4812_v4, %v4810_v14 }
 0x357   : > { %v3075_v59 = vpop.f32.mrf.mxu0 }
 0x359   : > { %v3076_v62 = vpop.f32.mrf.mxu0 }
 0x35a   : > { %v4819_v19 = vadd.f32 %v3076_v62, %v3075_v59 }
 0x35b   : > { %v3078_v11 = vpop.f32.mrf.mxu0 }
 0x35d   : > { %v3079_v50 = vpop.f32.mrf.mxu0 }
 0x35e   : > { %v3080_v51 = vadd.f32 %v3079_v50, %v3078_v11 }
 0x360   : > { %v2381_v47 = vpack.c.bf16 %v3080_v51, %v4819_v19  ;;  %v3081_v12 = vpop.f32.mrf.mxu0 }
 0x362   : > { %v3082_v26 = vpop.f32.mrf.mxu0 }
 0x363   : > { %v4822_v54 = vadd.f32 %v3082_v26, %v3081_v12 }
 0x364   : > { %v3084_v3 = vpop.f32.mrf.mxu0 }
 0x366   : > { %v3085_v1 = vpop.f32.mrf.mxu0 }
 0x367   : > { %v4824_v56 = vadd.f32 %v3085_v1, %v3084_v3 }
 0x369   : > { %v1209_v5 = vpop.xlane.xlu0 %1208  ;;  %v2382_v55 = vpack.c.bf16 %v4824_v56, %v4822_v54 }
 0x36a   : > { %v1210_v23 = vrot.slane %v1209_v5, 4  ;;  %v3087_v35 = vpop.f32.mrf.mxu0 }
 0x36c   : > { %v1211_v34 = vadd.f32 %v1210_v23, %v1209_v5  ;;  %v3088_v48 = vpop.f32.mrf.mxu0 }
 0x36d   : > { %v4828_v45 = vadd.f32 %v3088_v48, %v3087_v35 }
 0x36e   : > { %v1212_v43 = vrot.slane %v1211_v34, 2  ;;  %v3090_v33 = vpop.f32.mrf.mxu0 }
 0x370   : > { %v1213_v20 = vadd.f32 %v1212_v43, %v1211_v34  ;;  %v3091_v36 = vpop.f32.mrf.mxu0 }
 0x371   : > { %v4830_v60 = vadd.f32 %v3091_v36, %v3090_v33 }
 0x372   : > { %v1214_v6 = vrot.slane %v1213_v20, 1 }
 0x373   : > { %v2383_v17 = vpack.c.bf16 %v4830_v60, %v4828_v45  ;;  %v3093_v61 = vpop.f32.mrf.mxu0 }
 0x374   : > { %v1215_v2 = vadd.f32 %v1214_v6, %v1213_v20 }
 0x375   : > { %v3094_v31 = vpop.f32.mrf.mxu0 }
 0x376   : > { %3194 = vpush %v1215_v2 }
 0x377   : > { %v3096_v32 = vpop.f32.mrf.mxu0 }
 0x379   : > { %v3097_v24 = vpop.f32.mrf.mxu0 }
 0x382   : > { %v3099_v58 = vpop.f32.mrf.mxu0 }
 0x384   : > { %v3100_v52 = vpop.f32.mrf.mxu0 }
 0x386   : > { %v3102_v38 = vpop.f32.mrf.mxu0 }
 0x388   : > { %v3103_v44 = vpop.f32.mrf.mxu0 }
 0x389   : > { %v3104_v60 = vadd.f32 %v3103_v44, %v3102_v38 }
 0x390   : > { %v3105_v0 = vpop.f32.mrf.mxu0 }
 0x392   : > { %v3106_v9 = vpop.f32.mrf.mxu0 }
 0x393   : > { %v3107_v6 = vadd.f32 %v3106_v9, %v3105_v0 }
 0x394   : > { %v3108_v27 = vpop.f32.mrf.mxu0 }
 0x396   : > { %v3109_v57 = vpop.f32.mrf.mxu0 }
 0x397   : > { %v3110_v20 = vadd.f32 %v3109_v57, %v3108_v27  ;;  %v3095_v27 = vadd.f32 %v3094_v31, %v3093_v61 }
 0x399   : > { %v2386_v2 = vpack.c.bf16 %v3110_v20, %v3107_v6 }
 0x39d   : > { %v3111_v42 = vpop.f32.mrf.mxu0 }
 0x39f   : > { %v3112_v21 = vpop.f32.mrf.mxu0 }
 0x3a0   : > { %v3113_v33 = vadd.f32 %v3112_v21, %v3111_v42 }
 0x3a1   : > { %v3114_v41 = vpop.f32.mrf.mxu0 }
 0x3a3   : > { %v3115_v59 = vpop.f32.mrf.mxu0 }
 0x3a4   : > { %v3116_v43 = vadd.f32 %v3115_v59, %v3114_v41  ;;  %v3101_v41 = vadd.f32 %v3100_v52, %v3099_v58  ;;  %v3098_v59 = vadd.f32 %v3097_v24, %v3096_v32 }
 0x3a5   : > { %v3117_v62 = vpop.f32.mrf.mxu0 }
 0x3a6   : > { %v2387_v36 = vpack.c.bf16 %v3116_v43, %v3113_v33  ;;  %v2384_v14 = vpack.c.bf16 %v3098_v59, %v3095_v27  ;;  %v2588_v33 = vld [vmem:[%s3589_s0 + $0x28] sm:$0xff] }
 0x3a7   : > { %s3195_s27 = spop %3194  ;;  %v3118_v19 = vpop.f32.mrf.mxu0 }
 0x3a8   : > { %v1217_v11 = vstv %s3195_s27  ;;  %v3119_v34 = vadd.f32 %v3118_v19, %v3117_v62  ;;  %v2584_v62 = vld [vmem:[%s3589_s0 + $0x8] sm:$0xff] }
 0x3a9   : > { %1219 = vst.msk [vmem:[%s378_s22] sm:$0x1] %vm1218_vm0, %v1217_v11  ;;  %v3120_v50 = vpop.f32.mrf.mxu0 }
 0x3ab   : > { %v3121_v51 = vpop.f32.mrf.mxu0 }
 0x3ac   : > { %v3122_v5 = vadd.f32 %v3121_v51, %v3120_v50  ;;  %v2583_v50 = vld [vmem:[%s3589_s0] sm:$0xff]  ;;  %v2585_v51 = vld [vmem:[%s3589_s0 + $0x10] sm:$0xff] }
 0x3ad   : > { %v3123_v12 = vpop.f32.mrf.mxu0 }
 0x3ae   : > { %v2388_v45 = vpack.c.bf16 %v3122_v5, %v3119_v34  ;;  %v2587_v34 = vld [vmem:[%s3589_s0 + $0x20] sm:$0xff] }
 0x3af   : > { %v3124_v26 = vpop.f32.mrf.mxu0 }
 0x3b0   : > { %v3125_v23 = vadd.f32 %v3124_v26, %v3123_v12 }
 0x3b1   : > { %v3126_v3 = vpop.f32.mrf.mxu0 }
 0x3b3   : > { %v3127_v1 = vpop.f32.mrf.mxu0 }
 0x3b4   : > { %v3128_v35 = vadd.f32 %v3127_v1, %v3126_v3  ;;  %v2586_v3 = vld [vmem:[%s3589_s0 + $0x18] sm:$0xff] }
 0x3b6   : > { %v2389_v48 = vpack.c.bf16 %v3128_v35, %v3125_v23 }
 0x3b8   : > { %3129 = vmatprep.subr.bf16.mxu1 %v2389_v48 }
 0x3b9   : > { %3130 = vmatpush3.bf16.msra.mxu1 %v2381_v47  ;;  %v2385_v47 = vpack.c.bf16 %v3104_v60, %v3101_v41  ;;  %v2589_v41 = vld [vmem:[%s3589_s0 + $0x30] sm:$0xff] }
 0x3ba   : > { %3131 = vmatprep.subr.bf16.mxu1 %v2388_v45 }
 0x3bd   : > { %3132 = vmatpush3.bf16.msra.mxu1 %v2380_v63 }
 0x3be   : > { %3133 = vmatprep.subr.bf16.mxu1 %v2387_v36 }
 0x3c1   : > { %3134 = vmatpush3.bf16.msra.mxu1 %v2379_v15 }
 0x3c2   : > { %3135 = vmatprep.subr.bf16.mxu1 %v2386_v2 }
 0x3c5   : > { %3136 = vmatpush3.bf16.msra.mxu1 %v2378_v29  ;;  %v3330_v29 = vld [vmem:[%s5006_s5 + $0x70] ss:$8 sps:$4 sm:$0xff]  }
 0x3c6   : > { %3137 = vmatprep.subr.bf16.mxu1 %v2385_v47 }
 0x3c9   : > { %3138 = vmatpush3.bf16.msra.mxu1 %v2377_v16  ;;  %v3327_v16 = vld [vmem:[%s5006_s5 + $0x60] ss:$8 sps:$4 sm:$0xff]  }
 0x3ca   : > { %3139 = vmatprep.subr.bf16.mxu1 %v2384_v14 }
 0x3cd   : > { %3140 = vmatpush3.bf16.msra.mxu1 %v2376_v46  ;;  %v3322_v46 = vld [vmem:[%s5006_s5 + $0x54] ss:$8 sps:$4 sm:$0xff]  }
 0x3ce   : > { %3141 = vmatprep.subr.bf16.mxu1 %v2383_v17 }
 0x3d1   : > { %3142 = vmatpush3.bf16.msra.mxu1 %v2375_v40  ;;  %v3319_v40 = vld [vmem:[%s5006_s5 + $0x44] ss:$8 sps:$4 sm:$0xff]  }
 0x3d2   : > { %3143 = vmatprep.subr.bf16.mxu1 %v2382_v55 }
 0x3d5   : > { %3144 = vmatpush3.bf16.msra.mxu1 %v2374_v28  ;;  %v3318_v28 = vld [vmem:[%s5006_s5 + $0x30] ss:$8 sps:$4 sm:$0xff]  }
 0x3d8   : > { %2503 = vmatmul.mubr.bf16.vlgmr.msra.gmra.mxu1 %v3307_v8  ;;  %v2590_v8 = vld [vmem:[%s3589_s0 + $0x38] sm:$0xff] }
 0x3d9   : > { %2510 = vmatprep.mubr.bf16.mxu1 %v3310_v53 }
 0x3e0   : > { %2511 = vmatmul.mubr.bf16.gmra.mxu1 %v3312_v39 }
 0x3e1   : > { %2518 = vmatprep.mubr.bf16.mxu1 %v3313_v13 }
 0x3e8   : > { %2519 = vmatmul.mubr.bf16.gmra.mxu1 %v3315_v22 }
 0x3e9   : > { %2526 = vmatprep.mubr.bf16.mxu1 %v3316_v37 }
 0x3f0   : > { %2527 = vmatmul.mubr.bf16.gmra.mxu1 %v3318_v28  ;;  %v2591_v28 = vld [vmem:[%s3589_s0 + $0x40] sm:$0xff] }
 0x3f1   : > { %2534 = vmatprep.mubr.bf16.mxu1 %v3319_v40 }
 0x3f8   : > { %2535 = vmatmul.mubr.bf16.gmra.mxu1 %v3321_v30 }
 0x3f9   : > { %2542 = vmatprep.mubr.bf16.mxu1 %v3322_v46 }
 0x400   : > { %2543 = vmatmul.mubr.bf16.gmra.mxu1 %v3324_v7 }
 0x401   : > { %2550 = vmatprep.mubr.bf16.mxu1 %v3325_v18  ;;  %v2592_v18 = vld [vmem:[%s3589_s0 + $0x48] sm:$0xff] }
 0x408   : > { %2551 = vmatmul.mubr.bf16.gmra.mxu1 %v3327_v16 }
 0x409   : > { %2558 = vmatprep.mubr.bf16.mxu1 %v3328_v25 }
 0x410   : > { %2559 = vmatmul.mubr.bf16.gmra.mxu1 %v3330_v29 }
 0x498   : > { %v3145_v10 = vpop.f32.mrf.mxu1 }
 0x49a   : > { %v3146_v49 = vpop.f32.mrf.mxu1 }
 0x49b   : > { %v3147_v15 = vadd.f32 %v3146_v49, %v3145_v10 }
 0x49c   : > { %v3148_v4 = vpop.f32.mrf.mxu1 }
 0x49d   : > { %2567 = vst [vmem:[%s4911_s29] sm:$0xff] %v3147_v15  ;;  %v2599_v5 = vsub.f32 %v3147_v15, %v2583_v50  ;;  %v2593_v15 = vld [vmem:[%s3589_s0 + $0x50] sm:$0xff] }
 0x49e   : > { %v3149_v63 = vpop.f32.mrf.mxu1 }
 0x49f   : > { %v3150_v54 = vadd.f32 %v3149_v63, %v3148_v4  ;;  %v2615_v36 = vmul.f32 %v2599_v5, %v2599_v5 }
 0x4a0   : > { %v3151_v56 = vpop.f32.mrf.mxu1 }
 0x4a1   : > { %2568 = vst [vmem:[%s4911_s29 + $0x8] sm:$0xff] %v3150_v54  ;;  %v2600_v26 = vsub.f32 %v3150_v54, %v2584_v62 }
 0x4a2   : > { %v3152_v55 = vpop.f32.mrf.mxu1 }
 0x4a3   : > { %v3153_v17 = vadd.f32 %v3152_v55, %v3151_v56  ;;  %v2616_v43 = vmul.f32 %v2600_v26, %v2600_v26  ;;  %v2594_v55 = vld [vmem:[%s3589_s0 + $0x58] sm:$0xff] }
 0x4a4   : > { %v3154_v61 = vpop.f32.mrf.mxu1 }
 0x4a5   : > { %2569 = vst [vmem:[%s4911_s29 + $0x10] sm:$0xff] %v3153_v17  ;;  %v2601_v23 = vsub.f32 %v3153_v17, %v2585_v51  ;;  %v2631_v47 = vadd.f32 %v2616_v43, %v2615_v36 }
 0x4a6   : > { %v3155_v31 = vpop.f32.mrf.mxu1 }
 0x4a7   : > { %v3156_v32 = vadd.f32 %v3155_v31, %v3154_v61  ;;  %v2617_v6 = vmul.f32 %v2601_v23, %v2601_v23 }
 0x4a8   : > { %v3157_v24 = vpop.f32.mrf.mxu1 }
 0x4a9   : > { %2570 = vst [vmem:[%s4911_s29 + $0x18] sm:$0xff] %v3156_v32  ;;  %v2602_v45 = vsub.f32 %v3156_v32, %v2586_v3  ;;  %v2632_v39 = vadd.f32 %v2631_v47, %v2617_v6  ;;  %v2597_v3 = vld [vmem:[%s3589_s0 + $0x70] sm:$0xff] }
 0x4aa   : > { %v3158_v58 = vpop.f32.mrf.mxu1 }
 0x4ab   : > { %v3159_v52 = vadd.f32 %v3158_v58, %v3157_v24  ;;  %v2618_v27 = vmul.f32 %v2602_v45, %v2602_v45  ;;  %v2595_v58 = vld [vmem:[%s3589_s0 + $0x60] sm:$0xff] }
 0x4ac   : > { %v3160_v38 = vpop.f32.mrf.mxu1 }
 0x4ad   : > { %2571 = vst [vmem:[%s4911_s29 + $0x20] sm:$0xff] %v3159_v52  ;;  %v2603_v60 = vsub.f32 %v3159_v52, %v2587_v34  ;;  %v2633_v30 = vadd.f32 %v2632_v39, %v2618_v27 }
 0x4ae   : > { %v3161_v44 = vpop.f32.mrf.mxu1 }
 0x4af   : > { %v3162_v0 = vadd.f32 %v3161_v44, %v3160_v38  ;;  %v2619_v13 = vmul.f32 %v2603_v60, %v2603_v60 }
 0x4b0   : > { %v3163_v9 = vpop.f32.mrf.mxu1 }
 0x4b1   : > { %2572 = vst [vmem:[%s4911_s29 + $0x28] sm:$0xff] %v3162_v0  ;;  %v2604_v14 = vsub.f32 %v3162_v0, %v2588_v33  ;;  %v2634_v25 = vadd.f32 %v2633_v30, %v2619_v13  ;;  %v2598_v33 = vld [vmem:[%s3589_s0 + $0x78] sm:$0xff] }
 0x4b2   : > { %v3164_v57 = vpop.f32.mrf.mxu1 }
 0x4b3   : > { %v3165_v42 = vadd.f32 %v3164_v57, %v3163_v9  ;;  %v2620_v46 = vmul.f32 %v2604_v14, %v2604_v14  ;;  %v2596_v57 = vld [vmem:[%s3589_s0 + $0x68] sm:$0xff]  ;;  %s4956_s0 = scalar_lea.sflag [#allocation3], %s353_s28 }
 0x4b4   : > { %v3166_v21 = vpop.f32.mrf.mxu1 }
 0x4b5   : > { %2573 = vst [vmem:[%s4911_s29 + $0x30] sm:$0xff] %v3165_v42  ;;  %v2605_v22 = vsub.f32 %v3165_v42, %v2589_v41  ;;  %v2635_v63 = vadd.f32 %v2634_v25, %v2620_v46 }
 0x4b6   : > { %v3167_v19 = vpop.f32.mrf.mxu1 }
 0x4b7   : > { %v3168_v11 = vadd.f32 %v3167_v19, %v3166_v21  ;;  %v2621_v29 = vmul.f32 %v2605_v22, %v2605_v22 }
 0x4b8   : > { %v3169_v12 = vpop.f32.mrf.mxu1 }
 0x4b9   : > { %2574 = vst [vmem:[%s4911_s29 + $0x38] sm:$0xff] %v3168_v11  ;;  %v2606_v7 = vsub.f32 %v3168_v11, %v2590_v8  ;;  %v2636_v61 = vadd.f32 %v2635_v63, %v2621_v29 }
 0x4ba   : > { %v3170_v1 = vpop.f32.mrf.mxu1 }
 0x4bb   : > { %v3171_v35 = vadd.f32 %v3170_v1, %v3169_v12  ;;  %v2622_v54 = vmul.f32 %v2606_v7, %v2606_v7 }
 0x4bc   : > { %v3172_v48 = vpop.f32.mrf.mxu1 }
 0x4bd   : > { %2575 = vst [vmem:[%s4911_s29 + $0x40] sm:$0xff] %v3171_v35  ;;  %v2607_v10 = vsub.f32 %v3171_v35, %v2591_v28  ;;  %v2637_v38 = vadd.f32 %v2636_v61, %v2622_v54 }
 0x4be   : > { %v3173_v20 = vpop.f32.mrf.mxu1 }
 0x4bf   : > { %v3174_v2 = vadd.f32 %v3173_v20, %v3172_v48  ;;  %v2623_v31 = vmul.f32 %v2607_v10, %v2607_v10 }
 0x4c0   : > { %v3175_v59 = vpop.f32.mrf.mxu1 }
 0x4c1   : > { %2576 = vst [vmem:[%s4911_s29 + $0x48] sm:$0xff] %v3174_v2  ;;  %v2608_v56 = vsub.f32 %v3174_v2, %v2592_v18  ;;  %v2638_v42 = vadd.f32 %v2637_v38, %v2623_v31 }
 0x4c2   : > { %v3176_v53 = vpop.f32.mrf.mxu1 }
 0x4c3   : > { %v3177_v37 = vadd.f32 %v3176_v53, %v3175_v59  ;;  %v2624_v44 = vmul.f32 %v2608_v56, %v2608_v56 }
 0x4c4   : > { %v3178_v40 = vpop.f32.mrf.mxu1 }
 0x4c5   : > { %2577 = vst [vmem:[%s4911_s29 + $0x50] sm:$0xff] %v3177_v37  ;;  %v2609_v32 = vsub.f32 %v3177_v37, %v2593_v15  ;;  %v2639_v50 = vadd.f32 %v2638_v42, %v2624_v44 }
 0x4c6   : > { %v3179_v16 = vpop.f32.mrf.mxu1 }
 0x4c7   : > { %v3180_v49 = vadd.f32 %v3179_v16, %v3178_v40  ;;  %v2625_v21 = vmul.f32 %v2609_v32, %v2609_v32 }
 0x4c8   : > { %v3181_v4 = vpop.f32.mrf.mxu1 }
 0x4c9   : > { %2578 = vst [vmem:[%s4911_s29 + $0x58] sm:$0xff] %v3180_v49  ;;  %v2610_v0 = vsub.f32 %v3180_v49, %v2594_v55  ;;  %v2640_v1 = vadd.f32 %v2639_v50, %v2625_v21 }
 0x4ca   : > { %v3182_v17 = vpop.f32.mrf.mxu1 }
 0x4cb   : > { %v3183_v24 = vadd.f32 %v3182_v17, %v3181_v4  ;;  %v2626_v51 = vmul.f32 %v2610_v0, %v2610_v0 }
 0x4cc   : > { %v3184_v52 = vpop.f32.mrf.mxu1 }
 0x4cd   : > { %2579 = vst [vmem:[%s4911_s29 + $0x60] sm:$0xff] %v3183_v24  ;;  %v2611_v62 = vsub.f32 %v3183_v24, %v2595_v58  ;;  %v2641_v34 = vadd.f32 %v2640_v1, %v2626_v51 }
 0x4ce   : > { %v3185_v9 = vpop.f32.mrf.mxu1 }
 0x4cf   : > { %v3186_v19 = vadd.f32 %v3185_v9, %v3184_v52  ;;  %v2627_v5 = vmul.f32 %v2611_v62, %v2611_v62 }
 0x4d0   : > { %v3187_v11 = vpop.f32.mrf.mxu1 }
 0x4d1   : > { %2580 = vst [vmem:[%s4911_s29 + $0x68] sm:$0xff] %v3186_v19  ;;  %v2612_v12 = vsub.f32 %v3186_v19, %v2596_v57  ;;  %v2642_v20 = vadd.f32 %v2641_v34, %v2627_v5 }
 0x4d2   : > { %v3188_v26 = vpop.f32.mrf.mxu1 }
 0x4d3   : > { %v3189_v23 = vadd.f32 %v3188_v26, %v3187_v11  ;;  %v2628_v48 = vmul.f32 %v2612_v12, %v2612_v12 }
 0x4d4   : > { %v3190_v35 = vpop.f32.mrf.mxu1 }
 0x4d5   : > { %2581 = vst [vmem:[%s4911_s29 + $0x70] sm:$0xff] %v3189_v23  ;;  %v2613_v43 = vsub.f32 %v3189_v23, %v2597_v3  ;;  %v2643_v60 = vadd.f32 %v2642_v20, %v2628_v48 }
 0x4d6   : > { %v3191_v45 = vpop.f32.mrf.mxu1 }
 0x4d7   : > { %v2629_v36 = vmul.f32 %v2613_v43, %v2613_v43  ;;  %v3192_v6 = vadd.f32 %v3191_v45, %v3190_v35 }
 0x4d9   : > { %2582 = vst [vmem:[%s4911_s29 + $0x78] sm:$0xff] %v3192_v6  ;;  %v2614_v2 = vsub.f32 %v3192_v6, %v2598_v33  ;;  %v2644_v59 = vadd.f32 %v2643_v60, %v2629_v36 }
 0x4db   : > { %v2630_v41 = vmul.f32 %v2614_v2, %v2614_v2 }
 0x4dd   : > { %v2645_v47 = vadd.f32 %v2644_v59, %v2630_v41 }
 0x4df   : > { %2646 = vadd.xlane.f32.xlu0 %v2645_v47 }
 0x4e0   : > { %3360 = shalt.err (!%p3357_p2)
}
 0x4e1   : > { %s3361_s6 = scalar_lea.hbm %s4950_s24, 2048  ;;  %s3365_s27 = scalar_lea.hbm %s5008_s7, 4096 }
 0x4e2   : > { %p3362_p3 = scmp.ne.s32.totalorder %s4950_s24, %s3361_s6  ;;  %p3366_p8 = scmp.lt.s32.totalorder %s4950_s24, %s5008_s7 }
 0x4e3   : > { %p3367_p9 = scmp.lt.s32.totalorder %s3365_s27, %s3361_s6 }
 0x4e4   : > { %p3363_p4 = pnand %p3362_p3, %p3506_p5 }
 0x4e5   : > { %p3368_p10 = por %p3367_p9, %p3366_p8 }
 0x4e6   : > { %p3364_p7 = pneg %p3363_p4 }
 0x4e8   : > { %p3369_p11 = pnand %p3368_p10, %p3364_p7 }
 0x4ea   : > { %3372 = shalt.err (!%p3369_p11)
}
 0x4eb   : > { %s3416_s29 = smov 128   ;;  %s3417_s14 = smov 8  }
 0x4ec   : > { %3202 = dma.vmem_to_hbm [thread:$0]  (%p3506_p5), %s4952_s17, 2048, %s4950_s24, %s4956_s0, %s3416_s29, %s3416_s29, %s3417_s14  }
 0x4ed   : > { %s381_s25 = scalar_lea.vmem %s5010_s9, %s3562_s16 }
 0x568   : > { %v2647_v27 = vpop.xlane.xlu0 %2646 }
 0x569   : > { %v2648_v14 = vrot.slane %v2647_v27, 4 }
 0x56b   : > { %v2649_v8 = vadd.f32 %v2648_v14, %v2647_v27 }
 0x56d   : > { %v2650_v53 = vrot.slane %v2649_v8, 2 }
 0x56f   : > { %v2651_v39 = vadd.f32 %v2650_v53, %v2649_v8 }
 0x571   : > { %v2652_v13 = vrot.slane %v2651_v39, 1 }
 0x573   : > { %v2653_v22 = vadd.f32 %v2652_v13, %v2651_v39 }
 0x575   : > { %3196 = vpush %v2653_v22 }
 0x5a6   : > { %s3197_s13 = spop %3196 }
 0x5a7   : > { %v2655_v37 = vstv %s3197_s13 }
 0x5a8   : > { %2656 = vst.msk [vmem:[%s381_s25] sm:$0x1] %vm1218_vm0, %v2655_v37 }
 0x5a9 PF: > { %p3214_p5 = scmp.ge.s32.totalorder %s3411_s12, 2  ;;  %s2698_s19 = sand.u32 1, %s3399_s30  }
 0x5aa   : > { %s2699_s17 = scalar_lea.sflag [#allocation3], %s2698_s19 }
 0x5ab   : > { %p3209_p12 = pnand %p3214_p5, %p3510_p6 }
 0x5ad   : > { %p3210_p13 = pneg %p3209_p12 }
 0x5af   : > { %3394 = dma.done.wait (%p3210_p13), %s2699_s17, 2048  }
 0x5b0   : > { %3396 = vsyncadd (%p3210_p13), %s2699_s17, 4294965248  ;;  %s5253_s16 = sld [smem:[#allocation8_spill]]  ;;  %p21_p0 = scmp.ge.s32.totalorder %s3493_s15, 4  }
 0x5b1   : > { %s5254_s30 = smov %s3403_s10  ;;  %s5255_s10 = smov %s3407_s11 }
 0x5b2   : > { %s5257_s12 = smov %s3493_s15  ;;  %23 = sbr.rel (!%p21_p0) target bundleno = 9 (0x9), region = 117 }
 0x5b6   : > { %s5256_s11 = smov %s5253_s16 }
 0x5b7   :  { %2716 = vsyncpa [#allocation3], 1 }
 0x5b8   :  { %2718 = vsyncpa [#allocation3 + $0x1], 1 }
 0x5b9   :  { %2719 = vsyncpa [#allocation4], 1 }
 0x5ba   :  { %2721 = vsyncpa [#allocation4 + $0x1], 1 }

</bundles_post_ra>
